<compile_context>
chip_gen: v5e
topology: v5e:2x2
jax: 0.10.0
libtpu: 0.0.40
codegen_flags: <defaults>
</compile_context>

<pallas_src>
import jax
import jax.numpy as jnp
from jax.experimental import pallas as pl
from jax.experimental.pallas import tpu as pltpu


# ----------------------------- Pallas kernels -----------------------------

def _conv_block_kernel(p_ref, w1_ref, b1_ref, w2_ref, b2_ref, o_ref):
    """conv1 + relu + 2x2 maxpool + conv2 + relu for one image, fully in VMEM.

    p_ref : (1, 25, 584) conv1 im2col patches (features x positions).  Column
            r = s*288 + q*144 + a*12 + b encodes conv1 output pixel
            (oh, ow) = (2a+q, 2b+s); columns 576..583 are zero padding.
    w1_ref: (10, 25)    conv1 weight (oc, kh*5+kw)
    b1_ref: (10, 1)
    w2_ref: (9, 20, 10) conv2 weight (kh*3+kw, oc, ic)
    b2_ref: (20, 1)
    o_ref : (1, 20, 120) conv2+relu output, column = a'*12 + b' (b' < 10 valid).
    """
    p = p_ref[0]                                                      # (25, 584)
    # conv1 + relu (positions on lanes -> lane-dense intermediates).
    y1 = jnp.dot(w1_ref[...], p, preferred_element_type=jnp.float32)
    y1 = jnp.maximum(y1 + b1_ref[...], 0.0)                           # (10, 584)
    # 2x2/2 max pool == elementwise max of the four (s, q) column quarters.
    # Each quarter is read 152 wide (144 real + 8 junk) so the 9 shifted conv2
    # slices below stay in bounds without any in-kernel concatenate.
    pooled = jnp.maximum(jnp.maximum(y1[:, 0:152], y1[:, 144:296]),
                         jnp.maximum(y1[:, 288:440], y1[:, 432:584]))  # (10, 152)
    # conv2 as 9 shifted matmuls over the flattened (12x12-padded) pooled map.
    acc = b2_ref[...] + jnp.zeros((20, 120), jnp.float32)
    for i in range(3):
        for j in range(3):
            off = i * 12 + j
            acc = acc + jnp.dot(w2_ref[i * 3 + j], pooled[:, off:off + 120],
                                preferred_element_type=jnp.float32)
    o_ref[0] = jnp.maximum(acc, 0.0)                                  # (20, 120)


def _mlp_kernel(x_ref, w1_ref, b1_ref, w2_ref, b2_ref, o_ref):
    """fc1 + relu + fc2 + log_softmax on a block of batch rows."""
    x = x_ref[...].astype(jnp.bfloat16)                               # (R, 2000)
    h = jnp.dot(x, w1_ref[...], preferred_element_type=jnp.float32) + b1_ref[...]
    h = jnp.maximum(h, 0.0)                                           # (R, 512)
    logits = jnp.dot(h.astype(jnp.bfloat16), w2_ref[...],
                     preferred_element_type=jnp.float32) + b2_ref[...]  # (R, 10)
    m = jnp.max(logits, axis=1, keepdims=True)
    s = logits - m
    lse = jnp.log(jnp.sum(jnp.exp(s), axis=1, keepdims=True))
    o_ref[...] = s - lse


# ----------------------------- wrappers ------------------------------------

def conv_block(p1, w1, b1, w2, b2):
    """p1: (B, 25, 584) -> (B, 20, 120) conv2+relu activations."""
    B = p1.shape[0]
    return pl.pallas_call(
        _conv_block_kernel,
        out_shape=jax.ShapeDtypeStruct((B, 20, 120), jnp.float32),
        grid=(B,),
        in_specs=[
            pl.BlockSpec((1, 25, 584), lambda b: (b, 0, 0)),
            pl.BlockSpec((10, 25), lambda b: (0, 0)),
            pl.BlockSpec((10, 1), lambda b: (0, 0)),
            pl.BlockSpec((9, 20, 10), lambda b: (0, 0, 0)),
            pl.BlockSpec((20, 1), lambda b: (0, 0)),
        ],
        out_specs=pl.BlockSpec((1, 20, 120), lambda b: (b, 0, 0)),
        compiler_params=pltpu.CompilerParams(dimension_semantics=("parallel",)),
    )(p1, w1, b1, w2, b2)


def mlp_head(feat, w1, b1, w2, b2, block_rows):
    """feat: (Bp, 2000) -> (Bp, 10) log-probabilities (Bp % block_rows == 0)."""
    Bp, F = feat.shape
    H = w1.shape[1]
    C = w2.shape[1]
    return pl.pallas_call(
        _mlp_kernel,
        out_shape=jax.ShapeDtypeStruct((Bp, C), jnp.float32),
        grid=(Bp // block_rows,),
        in_specs=[
            pl.BlockSpec((block_rows, F), lambda i: (i, 0)),
            pl.BlockSpec((F, H), lambda i: (0, 0)),
            pl.BlockSpec((1, H), lambda i: (0, 0)),
            pl.BlockSpec((H, C), lambda i: (0, 0)),
            pl.BlockSpec((1, C), lambda i: (0, 0)),
        ],
        out_specs=pl.BlockSpec((block_rows, C), lambda i: (i, 0)),
        compiler_params=pltpu.CompilerParams(dimension_semantics=("parallel",)),
    )(feat, w1, b1, w2, b2)


# ----------------------------- parameters ----------------------------------

def init_params(key):
    ks = jax.random.split(key, 8)

    def u(k, shape, fan_in):
        bound = 1.0 / jnp.sqrt(jnp.float32(fan_in))
        return jax.random.uniform(k, shape, jnp.float32, -bound, bound)

    return {
        "conv1_w": u(ks[0], (10, 1, 5, 5), 1 * 5 * 5),
        "conv1_b": u(ks[1], (10,), 1 * 5 * 5),
        "conv2_w": u(ks[2], (20, 10, 3, 3), 10 * 3 * 3),
        "conv2_b": u(ks[3], (20,), 10 * 3 * 3),
        "fc1_w": u(ks[4], (500, 2000), 2000),
        "fc1_b": u(ks[5], (500,), 2000),
        "fc2_w": u(ks[6], (10, 500), 500),
        "fc2_b": u(ks[7], (10,), 500),
    }


def prepare_params(params):
    """One-time relayout of PyTorch-shaped params into kernel layout."""
    w1k = params["conv1_w"].reshape(10, 25)                        # (oc, kh*5+kw)
    b1k = params["conv1_b"].reshape(10, 1)
    w2k = jnp.transpose(params["conv2_w"], (2, 3, 0, 1)).reshape(9, 20, 10)
    b2k = params["conv2_b"].reshape(20, 1)
    # fc1: (500, 2000) -> (2000, 512): input-major, hidden padded 500->512, bf16.
    w1p = jnp.pad(params["fc1_w"].T, ((0, 0), (0, 12))).astype(jnp.bfloat16)
    b1p = jnp.pad(params["fc1_b"], (0, 12)).reshape(1, 512)
    # fc2: (10, 500) -> (512, 10): zero rows for the padded hidden units, bf16.
    w2p = jnp.pad(params["fc2_w"].T, ((0, 12), (0, 0))).astype(jnp.bfloat16)
    b2p = params["fc2_b"].reshape(1, 10)
    return {"w1k": w1k, "b1k": b1k, "w2k": w2k, "b2k": b2k,
            "w1p": w1p, "b1p": b1p, "w2p": w2p, "b2p": b2p}


# ----------------------------- forward pass ---------------------------------

def _conv1_patches(x):
    """x: (B, 1, 28, 28) -> transposed im2col patches (B, 25, 584).

    Column r = s*288 + q*144 + a*12 + b encodes conv1 output pixel
    (oh, ow) = (2a + q, 2b + s), so the 2x2/2 max-pool becomes an elementwise
    max of the four 144-wide column quarters inside the kernel.
    """
    B = x.shape[0]
    xs = x.reshape(B, 28, 28)
    cols = [xs[:, i:i + 24, j:j + 24] for i in range(5) for j in range(5)]
    p = jnp.stack(cols, axis=1)                    # (B, 25, 24, 24)  [k, oh, ow]
    p = p.reshape(B, 25, 12, 2, 12, 2)             # (B, k, a, q, b, s)
    p = jnp.transpose(p, (0, 1, 5, 3, 2, 4))       # (B, k, s, q, a, b)
    p = p.reshape(B, 25, 576)
    return jnp.pad(p, ((0, 0), (0, 0), (0, 8)))    # (B, 25, 584)


def forward(prepared, x):
    """x: (B, 1, 28, 28) float32 -> (B, 10) log-probabilities."""
    B = x.shape[0]

    # TODO(synk): conv1 im2col patch extraction stays in XLA on the tiny
    # (3 KB/image) input instead of being built inside the kernel.
    p1 = _conv1_patches(x)

    # fused conv1 + relu + maxpool + conv2 + relu, one pallas_call, VMEM resident
    y2 = conv_block(p1, prepared["w1k"], prepared["b1k"],
                    prepared["w2k"], prepared["b2k"])              # (B, 20, 120)

    # drop the 2 padding columns per output row; resulting feature ordering is
    # exactly torch's .view(B, -1): index = c*100 + h*10 + w  (free HBM reshapes)
    feat = y2.reshape(B, 20, 10, 12)[:, :, :, :10].reshape(B, 2000)

    # fused fc1 + relu + fc2 + log_softmax, row-blocked over the batch.
    block_rows = 128 if B > 128 else max(8, ((B + 7) // 8) * 8)
    Bp = ((B + block_rows - 1) // block_rows) * block_rows
    if Bp != B:
        feat = jnp.pad(feat, ((0, Bp - B), (0, 0)))
    out = mlp_head(feat, prepared["w1p"], prepared["b1p"],
                   prepared["w2p"], prepared["b2p"], block_rows)
    return out[:B]


if __name__ == "__main__":
    key = jax.random.PRNGKey(0)
    pkey, xkey = jax.random.split(key)
    params = init_params(pkey)
    prepared = prepare_params(params)          # one-time weight layout prep
    x = jax.random.normal(xkey, (2, 1, 28, 28), jnp.float32)

    fwd = jax.jit(forward)
    out = jax.block_until_ready(fwd(prepared, x))

    assert out.shape == (2, 10)
    assert bool(jnp.all(jnp.isfinite(out)))
    # log_softmax rows must exponentiate-sum to ~1
    assert bool(jnp.allclose(jnp.sum(jnp.exp(out), axis=1), 1.0, atol=1e-3))
    print("KERNEL_OK")
</pallas_src>

<mosaic_0001>
module attributes {stable_mosaic.version = 11 : i64} {
  func.func @_conv_block_kernel(%arg0: i32, %arg1: memref<1x25x584xf32, #tpu.memory_space<vmem>>, %arg2: memref<10x25xf32, #tpu.memory_space<vmem>>, %arg3: memref<10x1xf32, #tpu.memory_space<vmem>>, %arg4: memref<9x20x10xf32, #tpu.memory_space<vmem>>, %arg5: memref<20x1xf32, #tpu.memory_space<vmem>>, %arg6: memref<1x20x120xf32, #tpu.memory_space<vmem>>) attributes {dimension_semantics = [#tpu.dimension_semantics<parallel>], iteration_bounds = array<i64: 2>, scalar_prefetch = 0 : i64, scratch_operands = 0 : i64, tpu.core_type = #tpu.core_type<tc>, window_params = [{transform_indices = @transform_0, window_bounds = array<i64: 1, 25, 584>}, {pipeline_mode = #tpu.pipeline_mode<synchronous>, transform_indices = @transform_1, window_bounds = array<i64: 10, 25>}, {pipeline_mode = #tpu.pipeline_mode<synchronous>, transform_indices = @transform_2, window_bounds = array<i64: 10, 1>}, {pipeline_mode = #tpu.pipeline_mode<synchronous>, transform_indices = @transform_3, window_bounds = array<i64: 9, 20, 10>}, {pipeline_mode = #tpu.pipeline_mode<synchronous>, transform_indices = @transform_4, window_bounds = array<i64: 20, 1>}, {transform_indices = @transform_5, window_bounds = array<i64: 1, 20, 120>}]} {
    %c0 = arith.constant 0 : index
    %c0_0 = arith.constant 0 : index
    %c0_1 = arith.constant 0 : index
    %0 = vector.load %arg1[%c0, %c0_0, %c0_1] : memref<1x25x584xf32, #tpu.memory_space<vmem>>, vector<1x25x584xf32>
    %1 = vector.shape_cast %0 : vector<1x25x584xf32> to vector<25x584xf32>
    %c0_2 = arith.constant 0 : index
    %c0_3 = arith.constant 0 : index
    %2 = vector.load %arg2[%c0_2, %c0_3] : memref<10x25xf32, #tpu.memory_space<vmem>>, vector<10x25xf32>
    %cst = arith.constant dense<0.000000e+00> : vector<10x584xf32>
    %3 = tpu.matmul %2, %1, %cst {dimension_numbers = #tpu.dot_dimension_numbers<[1], [0], [0], [1], [0, 0, 1, 1], [], []>} : vector<10x25xf32>, vector<25x584xf32>, vector<10x584xf32> -> vector<10x584xf32>
    %c0_4 = arith.constant 0 : index
    %c0_5 = arith.constant 0 : index
    %4 = vector.load %arg3[%c0_4, %c0_5] : memref<10x1xf32, #tpu.memory_space<vmem>>, vector<10x1xf32>
    %5 = vector.broadcast %4 : vector<10x1xf32> to vector<10x584xf32>
    %6 = arith.addf %3, %5 : vector<10x584xf32>
    %cst_6 = arith.constant 0.000000e+00 : f32
    %7 = vector.broadcast %cst_6 : f32 to vector<10x584xf32>
    %8 = arith.maximumf %6, %7 : vector<10x584xf32>
    %9 = vector.extract_strided_slice %8 {offsets = [0, 0], sizes = [10, 152], strides = [1, 1]} : vector<10x584xf32> to vector<10x152xf32>
    %10 = vector.extract_strided_slice %8 {offsets = [0, 144], sizes = [10, 152], strides = [1, 1]} : vector<10x584xf32> to vector<10x152xf32>
    %11 = arith.maximumf %9, %10 : vector<10x152xf32>
    %12 = vector.extract_strided_slice %8 {offsets = [0, 288], sizes = [10, 152], strides = [1, 1]} : vector<10x584xf32> to vector<10x152xf32>
    %13 = vector.extract_strided_slice %8 {offsets = [0, 432], sizes = [10, 152], strides = [1, 1]} : vector<10x584xf32> to vector<10x152xf32>
    %14 = arith.maximumf %12, %13 : vector<10x152xf32>
    %15 = arith.maximumf %11, %14 : vector<10x152xf32>
    %c0_7 = arith.constant 0 : index
    %c0_8 = arith.constant 0 : index
    %16 = vector.load %arg5[%c0_7, %c0_8] : memref<20x1xf32, #tpu.memory_space<vmem>>, vector<20x1xf32>
    %cst_9 = arith.constant 0.000000e+00 : f32
    %17 = vector.broadcast %cst_9 : f32 to vector<20x120xf32>
    %18 = vector.broadcast %16 : vector<20x1xf32> to vector<20x120xf32>
    %19 = arith.addf %18, %17 : vector<20x120xf32>
    %c0_10 = arith.constant 0 : index
    %c0_11 = arith.constant 0 : index
    %c0_12 = arith.constant 0 : index
    %20 = vector.load %arg4[%c0_10, %c0_11, %c0_12] : memref<9x20x10xf32, #tpu.memory_space<vmem>>, vector<1x20x10xf32>
    %21 = vector.shape_cast %20 : vector<1x20x10xf32> to vector<20x10xf32>
    %22 = vector.extract_strided_slice %15 {offsets = [0, 0], sizes = [10, 120], strides = [1, 1]} : vector<10x152xf32> to vector<10x120xf32>
    %cst_13 = arith.constant dense<0.000000e+00> : vector<20x120xf32>
    %23 = tpu.matmul %21, %22, %cst_13 {dimension_numbers = #tpu.dot_dimension_numbers<[1], [0], [0], [1], [0, 0, 1, 1], [], []>} : vector<20x10xf32>, vector<10x120xf32>, vector<20x120xf32> -> vector<20x120xf32>
    %24 = arith.addf %19, %23 : vector<20x120xf32>
    %c1 = arith.constant 1 : index
    %c0_14 = arith.constant 0 : index
    %c0_15 = arith.constant 0 : index
    %25 = vector.load %arg4[%c1, %c0_14, %c0_15] : memref<9x20x10xf32, #tpu.memory_space<vmem>>, vector<1x20x10xf32>
    %26 = vector.shape_cast %25 : vector<1x20x10xf32> to vector<20x10xf32>
    %27 = vector.extract_strided_slice %15 {offsets = [0, 1], sizes = [10, 120], strides = [1, 1]} : vector<10x152xf32> to vector<10x120xf32>
    %cst_16 = arith.constant dense<0.000000e+00> : vector<20x120xf32>
    %28 = tpu.matmul %26, %27, %cst_16 {dimension_numbers = #tpu.dot_dimension_numbers<[1], [0], [0], [1], [0, 0, 1, 1], [], []>} : vector<20x10xf32>, vector<10x120xf32>, vector<20x120xf32> -> vector<20x120xf32>
    %29 = arith.addf %24, %28 : vector<20x120xf32>
    %c2 = arith.constant 2 : index
    %c0_17 = arith.constant 0 : index
    %c0_18 = arith.constant 0 : index
    %30 = vector.load %arg4[%c2, %c0_17, %c0_18] : memref<9x20x10xf32, #tpu.memory_space<vmem>>, vector<1x20x10xf32>
    %31 = vector.shape_cast %30 : vector<1x20x10xf32> to vector<20x10xf32>
    %32 = vector.extract_strided_slice %15 {offsets = [0, 2], sizes = [10, 120], strides = [1, 1]} : vector<10x152xf32> to vector<10x120xf32>
    %cst_19 = arith.constant dense<0.000000e+00> : vector<20x120xf32>
    %33 = tpu.matmul %31, %32, %cst_19 {dimension_numbers = #tpu.dot_dimension_numbers<[1], [0], [0], [1], [0, 0, 1, 1], [], []>} : vector<20x10xf32>, vector<10x120xf32>, vector<20x120xf32> -> vector<20x120xf32>
    %34 = arith.addf %29, %33 : vector<20x120xf32>
    %c3 = arith.constant 3 : index
    %c0_20 = arith.constant 0 : index
    %c0_21 = arith.constant 0 : index
    %35 = vector.load %arg4[%c3, %c0_20, %c0_21] : memref<9x20x10xf32, #tpu.memory_space<vmem>>, vector<1x20x10xf32>
    %36 = vector.shape_cast %35 : vector<1x20x10xf32> to vector<20x10xf32>
    %37 = vector.extract_strided_slice %15 {offsets = [0, 12], sizes = [10, 120], strides = [1, 1]} : vector<10x152xf32> to vector<10x120xf32>
    %cst_22 = arith.constant dense<0.000000e+00> : vector<20x120xf32>
    %38 = tpu.matmul %36, %37, %cst_22 {dimension_numbers = #tpu.dot_dimension_numbers<[1], [0], [0], [1], [0, 0, 1, 1], [], []>} : vector<20x10xf32>, vector<10x120xf32>, vector<20x120xf32> -> vector<20x120xf32>
    %39 = arith.addf %34, %38 : vector<20x120xf32>
    %c4 = arith.constant 4 : index
    %c0_23 = arith.constant 0 : index
    %c0_24 = arith.constant 0 : index
    %40 = vector.load %arg4[%c4, %c0_23, %c0_24] : memref<9x20x10xf32, #tpu.memory_space<vmem>>, vector<1x20x10xf32>
    %41 = vector.shape_cast %40 : vector<1x20x10xf32> to vector<20x10xf32>
    %42 = vector.extract_strided_slice %15 {offsets = [0, 13], sizes = [10, 120], strides = [1, 1]} : vector<10x152xf32> to vector<10x120xf32>
    %cst_25 = arith.constant dense<0.000000e+00> : vector<20x120xf32>
    %43 = tpu.matmul %41, %42, %cst_25 {dimension_numbers = #tpu.dot_dimension_numbers<[1], [0], [0], [1], [0, 0, 1, 1], [], []>} : vector<20x10xf32>, vector<10x120xf32>, vector<20x120xf32> -> vector<20x120xf32>
    %44 = arith.addf %39, %43 : vector<20x120xf32>
    %c5 = arith.constant 5 : index
    %c0_26 = arith.constant 0 : index
    %c0_27 = arith.constant 0 : index
    %45 = vector.load %arg4[%c5, %c0_26, %c0_27] : memref<9x20x10xf32, #tpu.memory_space<vmem>>, vector<1x20x10xf32>
    %46 = vector.shape_cast %45 : vector<1x20x10xf32> to vector<20x10xf32>
    %47 = vector.extract_strided_slice %15 {offsets = [0, 14], sizes = [10, 120], strides = [1, 1]} : vector<10x152xf32> to vector<10x120xf32>
    %cst_28 = arith.constant dense<0.000000e+00> : vector<20x120xf32>
    %48 = tpu.matmul %46, %47, %cst_28 {dimension_numbers = #tpu.dot_dimension_numbers<[1], [0], [0], [1], [0, 0, 1, 1], [], []>} : vector<20x10xf32>, vector<10x120xf32>, vector<20x120xf32> -> vector<20x120xf32>
    %49 = arith.addf %44, %48 : vector<20x120xf32>
    %c6 = arith.constant 6 : index
    %c0_29 = arith.constant 0 : index
    %c0_30 = arith.constant 0 : index
    %50 = vector.load %arg4[%c6, %c0_29, %c0_30] : memref<9x20x10xf32, #tpu.memory_space<vmem>>, vector<1x20x10xf32>
    %51 = vector.shape_cast %50 : vector<1x20x10xf32> to vector<20x10xf32>
    %52 = vector.extract_strided_slice %15 {offsets = [0, 24], sizes = [10, 120], strides = [1, 1]} : vector<10x152xf32> to vector<10x120xf32>
    %cst_31 = arith.constant dense<0.000000e+00> : vector<20x120xf32>
    %53 = tpu.matmul %51, %52, %cst_31 {dimension_numbers = #tpu.dot_dimension_numbers<[1], [0], [0], [1], [0, 0, 1, 1], [], []>} : vector<20x10xf32>, vector<10x120xf32>, vector<20x120xf32> -> vector<20x120xf32>
    %54 = arith.addf %49, %53 : vector<20x120xf32>
    %c7 = arith.constant 7 : index
    %c0_32 = arith.constant 0 : index
    %c0_33 = arith.constant 0 : index
    %55 = vector.load %arg4[%c7, %c0_32, %c0_33] : memref<9x20x10xf32, #tpu.memory_space<vmem>>, vector<1x20x10xf32>
    %56 = vector.shape_cast %55 : vector<1x20x10xf32> to vector<20x10xf32>
    %57 = vector.extract_strided_slice %15 {offsets = [0, 25], sizes = [10, 120], strides = [1, 1]} : vector<10x152xf32> to vector<10x120xf32>
    %cst_34 = arith.constant dense<0.000000e+00> : vector<20x120xf32>
    %58 = tpu.matmul %56, %57, %cst_34 {dimension_numbers = #tpu.dot_dimension_numbers<[1], [0], [0], [1], [0, 0, 1, 1], [], []>} : vector<20x10xf32>, vector<10x120xf32>, vector<20x120xf32> -> vector<20x120xf32>
    %59 = arith.addf %54, %58 : vector<20x120xf32>
    %c8 = arith.constant 8 : index
    %c0_35 = arith.constant 0 : index
    %c0_36 = arith.constant 0 : index
    %60 = vector.load %arg4[%c8, %c0_35, %c0_36] : memref<9x20x10xf32, #tpu.memory_space<vmem>>, vector<1x20x10xf32>
    %61 = vector.shape_cast %60 : vector<1x20x10xf32> to vector<20x10xf32>
    %62 = vector.extract_strided_slice %15 {offsets = [0, 26], sizes = [10, 120], strides = [1, 1]} : vector<10x152xf32> to vector<10x120xf32>
    %cst_37 = arith.constant dense<0.000000e+00> : vector<20x120xf32>
    %63 = tpu.matmul %61, %62, %cst_37 {dimension_numbers = #tpu.dot_dimension_numbers<[1], [0], [0], [1], [0, 0, 1, 1], [], []>} : vector<20x10xf32>, vector<10x120xf32>, vector<20x120xf32> -> vector<20x120xf32>
    %64 = arith.addf %59, %63 : vector<20x120xf32>
    %cst_38 = arith.constant 0.000000e+00 : f32
    %65 = vector.broadcast %cst_38 : f32 to vector<20x120xf32>
    %66 = arith.maximumf %64, %65 : vector<20x120xf32>
    %c0_39 = arith.constant 0 : index
    %c0_40 = arith.constant 0 : index
    %c0_41 = arith.constant 0 : index
    %67 = vector.load %arg6[%c0_39, %c0_40, %c0_41] : memref<1x20x120xf32, #tpu.memory_space<vmem>>, vector<1x20x120xf32>
    %68 = vector.shape_cast %67 : vector<1x20x120xf32> to vector<20x120xf32>
    %69 = vector.shape_cast %66 : vector<20x120xf32> to vector<1x20x120xf32>
    tpu.vector_store %arg6[%c0_39, %c0_40, %c0_41], %69 {strides = array<i32>} : memref<1x20x120xf32, #tpu.memory_space<vmem>>, vector<1x20x120xf32>,
    return
  }
  func.func @transform_0(%arg0: i32) -> (i32, i32, i32) {
    %c0_i32 = arith.constant 0 : i32
    %c0_i32_0 = arith.constant 0 : i32
    %c0_i32_1 = arith.constant 0 : i32
    return %arg0, %c0_i32, %c0_i32_0 : i32, i32, i32
  }
  func.func @transform_1(%arg0: i32) -> (i32, i32) {
    %c0_i32 = arith.constant 0 : i32
    %c0_i32_0 = arith.constant 0 : i32
    %c0_i32_1 = arith.constant 0 : i32
    return %c0_i32, %c0_i32_0 : i32, i32
  }
  func.func @transform_2(%arg0: i32) -> (i32, i32) {
    %c0_i32 = arith.constant 0 : i32
    %c0_i32_0 = arith.constant 0 : i32
    %c0_i32_1 = arith.constant 0 : i32
    return %c0_i32, %c0_i32_0 : i32, i32
  }
  func.func @transform_3(%arg0: i32) -> (i32, i32, i32) {
    %c0_i32 = arith.constant 0 : i32
    %c0_i32_0 = arith.constant 0 : i32
    %c0_i32_1 = arith.constant 0 : i32
    %c0_i32_2 = arith.constant 0 : i32
    return %c0_i32, %c0_i32_0, %c0_i32_1 : i32, i32, i32
  }
  func.func @transform_4(%arg0: i32) -> (i32, i32) {
    %c0_i32 = arith.constant 0 : i32
    %c0_i32_0 = arith.constant 0 : i32
    %c0_i32_1 = arith.constant 0 : i32
    return %c0_i32, %c0_i32_0 : i32, i32
  }
  func.func @transform_5(%arg0: i32) -> (i32, i32, i32) {
    %c0_i32 = arith.constant 0 : i32
    %c0_i32_0 = arith.constant 0 : i32
    %c0_i32_1 = arith.constant 0 : i32
    return %arg0, %c0_i32, %c0_i32_0 : i32, i32, i32
  }
}

module attributes {stable_mosaic.version = 11 : i64} {
  func.func @_mlp_kernel(%arg0: i32, %arg1: memref<8x2000xf32, #tpu.memory_space<vmem>>, %arg2: memref<2000x512xbf16, #tpu.memory_space<vmem>>, %arg3: memref<1x512xf32, #tpu.memory_space<vmem>>, %arg4: memref<512x10xbf16, #tpu.memory_space<vmem>>, %arg5: memref<1x10xf32, #tpu.memory_space<vmem>>, %arg6: memref<8x10xf32, #tpu.memory_space<vmem>>) attributes {dimension_semantics = [#tpu.dimension_semantics<parallel>], iteration_bounds = array<i64: 1>, scalar_prefetch = 0 : i64, scratch_operands = 0 : i64, tpu.core_type = #tpu.core_type<tc>, window_params = [{transform_indices = @transform_0, window_bounds = array<i64: 8, 2000>}, {pipeline_mode = #tpu.pipeline_mode<synchronous>, transform_indices = @transform_1, window_bounds = array<i64: 2000, 512>}, {pipeline_mode = #tpu.pipeline_mode<synchronous>, transform_indices = @transform_2, window_bounds = array<i64: 1, 512>}, {pipeline_mode = #tpu.pipeline_mode<synchronous>, transform_indices = @transform_3, window_bounds = array<i64: 512, 10>}, {pipeline_mode = #tpu.pipeline_mode<synchronous>, transform_indices = @transform_4, window_bounds = array<i64: 1, 10>}, {transform_indices = @transform_5, window_bounds = array<i64: 8, 10>}]} {
    %c0 = arith.constant 0 : index
    %c0_0 = arith.constant 0 : index
    %0 = vector.load %arg1[%c0, %c0_0] : memref<8x2000xf32, #tpu.memory_space<vmem>>, vector<8x2000xf32>
    %1 = arith.truncf %0 : vector<8x2000xf32> to vector<8x2000xbf16>
    %c0_1 = arith.constant 0 : index
    %c0_2 = arith.constant 0 : index
    %2 = vector.load %arg2[%c0_1, %c0_2] : memref<2000x512xbf16, #tpu.memory_space<vmem>>, vector<2000x512xbf16>
    %cst = arith.constant dense<0.000000e+00> : vector<8x512xf32>
    %3 = tpu.matmul %1, %2, %cst {dimension_numbers = #tpu.dot_dimension_numbers<[1], [0], [0], [1], [0, 0, 1, 1], [], []>} : vector<8x2000xbf16>, vector<2000x512xbf16>, vector<8x512xf32> -> vector<8x512xf32>
    %c0_3 = arith.constant 0 : index
    %c0_4 = arith.constant 0 : index
    %4 = vector.load %arg3[%c0_3, %c0_4] : memref<1x512xf32, #tpu.memory_space<vmem>>, vector<1x512xf32>
    %5 = vector.broadcast %4 : vector<1x512xf32> to vector<8x512xf32>
    %6 = arith.addf %3, %5 : vector<8x512xf32>
    %cst_5 = arith.constant 0.000000e+00 : f32
    %7 = vector.broadcast %cst_5 : f32 to vector<8x512xf32>
    %8 = arith.maximumf %6, %7 : vector<8x512xf32>
    %9 = arith.truncf %8 : vector<8x512xf32> to vector<8x512xbf16>
    %c0_6 = arith.constant 0 : index
    %c0_7 = arith.constant 0 : index
    %10 = vector.load %arg4[%c0_6, %c0_7] : memref<512x10xbf16, #tpu.memory_space<vmem>>, vector<512x10xbf16>
    %cst_8 = arith.constant dense<0.000000e+00> : vector<8x10xf32>
    %11 = tpu.matmul %9, %10, %cst_8 {dimension_numbers = #tpu.dot_dimension_numbers<[1], [0], [0], [1], [0, 0, 1, 1], [], []>} : vector<8x512xbf16>, vector<512x10xbf16>, vector<8x10xf32> -> vector<8x10xf32>
    %c0_9 = arith.constant 0 : index
    %c0_10 = arith.constant 0 : index
    %12 = vector.load %arg5[%c0_9, %c0_10] : memref<1x10xf32, #tpu.memory_space<vmem>>, vector<1x10xf32>
    %13 = vector.broadcast %12 : vector<1x10xf32> to vector<8x10xf32>
    %14 = arith.addf %11, %13 : vector<8x10xf32>
    %cst_11 = arith.constant dense<0xFF800000> : vector<8xf32>
    %15 = vector.multi_reduction <maximumf>, %14, %cst_11 [1] : vector<8x10xf32> to vector<8xf32>
    %16 = vector.shape_cast %15 : vector<8xf32> to vector<8x1xf32>
    %17 = vector.broadcast %16 : vector<8x1xf32> to vector<8x10xf32>
    %18 = arith.subf %14, %17 : vector<8x10xf32>
    %19 = math.exp %18 : vector<8x10xf32>
    %cst_12 = arith.constant dense<0.000000e+00> : vector<8xf32>
    %20 = vector.multi_reduction <add>, %19, %cst_12 [1] : vector<8x10xf32> to vector<8xf32>
    %21 = vector.shape_cast %20 : vector<8xf32> to vector<8x1xf32>
    %22 = math.log %21 : vector<8x1xf32>
    %23 = vector.broadcast %22 : vector<8x1xf32> to vector<8x10xf32>
    %24 = arith.subf %18, %23 : vector<8x10xf32>
    %c0_13 = arith.constant 0 : index
    %c0_14 = arith.constant 0 : index
    %25 = vector.load %arg6[%c0_13, %c0_14] : memref<8x10xf32, #tpu.memory_space<vmem>>, vector<8x10xf32>
    tpu.vector_store %arg6[%c0_13, %c0_14], %24 {strides = array<i32>} : memref<8x10xf32, #tpu.memory_space<vmem>>, vector<8x10xf32>,
    return
  }
  func.func @transform_0(%arg0: i32) -> (i32, i32) {
    %c0_i32 = arith.constant 0 : i32
    %c0_i32_0 = arith.constant 0 : i32
    return %arg0, %c0_i32 : i32, i32
  }
  func.func @transform_1(%arg0: i32) -> (i32, i32) {
    %c0_i32 = arith.constant 0 : i32
    %c0_i32_0 = arith.constant 0 : i32
    %c0_i32_1 = arith.constant 0 : i32
    return %c0_i32, %c0_i32_0 : i32, i32
  }
  func.func @transform_2(%arg0: i32) -> (i32, i32) {
    %c0_i32 = arith.constant 0 : i32
    %c0_i32_0 = arith.constant 0 : i32
    %c0_i32_1 = arith.constant 0 : i32
    return %c0_i32, %c0_i32_0 : i32, i32
  }
  func.func @transform_3(%arg0: i32) -> (i32, i32) {
    %c0_i32 = arith.constant 0 : i32
    %c0_i32_0 = arith.constant 0 : i32
    %c0_i32_1 = arith.constant 0 : i32
    return %c0_i32, %c0_i32_0 : i32, i32
  }
  func.func @transform_4(%arg0: i32) -> (i32, i32) {
    %c0_i32 = arith.constant 0 : i32
    %c0_i32_0 = arith.constant 0 : i32
    %c0_i32_1 = arith.constant 0 : i32
    return %c0_i32, %c0_i32_0 : i32, i32
  }
  func.func @transform_5(%arg0: i32) -> (i32, i32) {
    %c0_i32 = arith.constant 0 : i32
    %c0_i32_0 = arith.constant 0 : i32
    return %arg0, %c0_i32 : i32, i32
  }
}

</mosaic_0001>

<bundles_post_ra>
// kernel: forward.2
= control target key start
LH: loop header
LB: loop body
LE: loop exit
PB: predicated region body
PF: predicated region fallthrough
CT: control target
= control target key end

     0   :  { %s1248_s18 = smov 0   ;;  %s1454_s0 = inlined_call_operand.vmem [shape: f32[2,25,584], index: 0, kind: input, shape index: {}]   ;;  %s1455_s1 = inlined_call_operand.vmem [shape: f32[10,25], index: 1, kind: input, shape index: {}]   ;;  %s1456_s2 = inlined_call_operand.vmem [shape: f32[10,1], index: 2, kind: input, shape index: {}]   ;;  %s1457_s3 = inlined_call_operand.vmem [shape: f32[9,20,10], index: 3, kind: input, shape index: {}]   ;;  %s1458_s4 = inlined_call_operand.vmem [shape: f32[20,1], index: 4, kind: input, shape index: {}]   ;;  %s1459_s5 = inlined_call_operand.vmem [shape: f32[2,20,120], index: 5, kind: output, shape index: {}]  }
   0x1 LB: > { %s1042_s19 = sadd.s32 4294967295, %s1205_s18   ;;  %p1046_p0 = scmp.ge.s32.totalorder %s1205_s18, 1  ;;  %s1205_s18 = sphi %s1248_s18, %s15_s18  }
   0x2   : > { %p187_p1 = scmp.lt.s32.totalorder %s1205_s18, 3 }
   0x4   : > { %p188_p2 = pnand %p1046_p0, %p187_p1 }
   0x5   : > { %p215_p3 = scmp.lt.s32.totalorder (!%p188_p2), %s1042_s19, 1  ;;  %s1208_s7 = smov (!%p188_p2), 112  }
   0x6   : > { %191 = sbr.rel (%p188_p2) target bundleno = 732 (0x2dc), region = 40  ;;  %s1209_s8 = smov (!%p188_p2), 96  }
   0x7   : > { %s1210_s9 = smov (!%p188_p2), 126   ;;  %s1211_s10 = smov (!%p188_p2), 127  }
   0x8   : > { %s1212_s11 = smov (!%p188_p2), 116   ;;  %s1213_s14 = smov (!%p188_p2), 115  }
   0x9   : > { %s1214_s15 = smov (!%p188_p2), 114   ;;  %s1215_s16 = smov (!%p188_p2), 104  }
   0xa   : > { %s1216_s17 = smov (!%p188_p2), 103   ;;  %s1217_s20 = smov (!%p188_p2), 102  }
   0xb   : > { %v248_v0 = vld [vmem:[%s1456_s2 + $0x8] sm:$0x3]  ;;  %s1461_s19 = smov (!%p215_p3, %s1042_s19), 1  ;;  %v1207_v1 = vmov 0   ;;  %vm266_vm0 = vcmask 1040384   ;;  %vm259_vm1 = vcmask 203776  }
   0xc   : > { %1151 = vset.pattern.permute.xlu0 %v1207_v1  ;;  %1197 = vset.pattern.permute.xlu1 %v1207_v1  ;;  %s1130_s22 = smul.u32 160, %s1461_s19  ;;  %v246_v10 = vld [vmem:[%s1455_s1 + $0x8] sm:$0x3]  ;;  %v245_v11 = vld [vmem:[%s1455_s1] sm:$0xff]  ;;  %vm419_vm2 = vcmask 916480   ;;  %vm464_vm3 = vcmask 785408  }
   0xd   : > { %256 = vperm.xlu0 %1151, %v248_v0   ;;  %1198 = vset.pattern.permute.xlu2 %v1207_v1  ;;  %v247_v17 = vld [vmem:[%s1456_s2] sm:$0xff]  ;;  %vm509_vm4 = vcmask 1041408   ;;  %vm499_vm5 = vcmask 80896   ;;  %vm655_vm6 = vcmask 949248   ;;  %vm711_vm7 = vcmask 941056  }
   0xe   : > { %s1265_s25 = scalar_lea.vmem %s1454_s0, %s1130_s22  ;;  %vm767_vm8 = vcmask 932864   ;;  %vm823_vm9 = vcmask 850944   ;;  %vm879_vm10 = vcmask 842752   ;;  %vm935_vm11 = vcmask 834560  }
   0xf   : > { %v240_v2 = vld [vmem:[%s1265_s25 + $0x78] sm:$0x1]  ;;  %v241_v3 = vld [vmem:[%s1265_s25 + $0x80] sm:$0x1]  ;;  %v235_v4 = vld [vmem:[%s1265_s25 + $0x50] sm:$0xff]  ;;  %vm982_vm12 = vcmask 982016  }
  0x10   : > { %1126 = vmatpush.msk.msra.mxu3 %vm266_vm0, %v240_v2  ;;  %1052 = vmatpush.msk.msra.mxu2 %vm266_vm0, %v241_v3  ;;  %v236_v5 = vld [vmem:[%s1265_s25 + $0x58] sm:$0xff]  ;;  %v230_v6 = vld [vmem:[%s1265_s25 + $0x28] sm:$0xff]  ;;  %v231_v7 = vld [vmem:[%s1265_s25 + $0x30] sm:$0xff]  ;;  %vm985_vm13 = vcmask 977920  }
  0x11   : > { %1049 = vmatpush.msk.msra.mxu0 %vm266_vm0, %v240_v2  ;;  %v225_v8 = vld [vmem:[%s1265_s25] sm:$0xff]  ;;  %v226_v9 = vld [vmem:[%s1265_s25 + $0x8] sm:$0xff]  ;;  %v243_v12 = vld [vmem:[%s1265_s25 + $0x90] sm:$0x1] }
  0x12   : > { %1127 = vmatpush.msra.mxu3 %v235_v4  ;;  %318 = vmatpush.msra.mxu2 %v236_v5  ;;  %v242_v13 = vld [vmem:[%s1265_s25 + $0x88] sm:$0x1]  ;;  %v244_v15 = vld [vmem:[%s1265_s25 + $0x98] sm:$0x1]  ;;  %v237_v16 = vld [vmem:[%s1265_s25 + $0x60] sm:$0xff] }
  0x13   : > { %295 = vmatpush.msra.mxu0 %v235_v4  ;;  %v238_v14 = vld [vmem:[%s1265_s25 + $0x68] sm:$0xff]  ;;  %v233_v18 = vld [vmem:[%s1265_s25 + $0x40] sm:$0xff]  ;;  %v239_v19 = vld [vmem:[%s1265_s25 + $0x70] sm:$0xff] }
  0x14   : > { %1128 = vmatpush.msra.mxu3 %v230_v6  ;;  %319 = vmatpush.msra.mxu2 %v231_v7  ;;  %v232_v20 = vld [vmem:[%s1265_s25 + $0x38] sm:$0xff]  ;;  %v234_v22 = vld [vmem:[%s1265_s25 + $0x48] sm:$0xff]  ;;  %v229_v23 = vld [vmem:[%s1265_s25 + $0x20] sm:$0xff] }
  0x15   : > { %296 = vmatpush.msra.mxu0 %v230_v6  ;;  %v228_v21 = vld [vmem:[%s1265_s25 + $0x18] sm:$0xff]  ;;  %251 = vperm.xlu0 %1151, %v247_v17   ;;  %v227_v24 = vld [vmem:[%s1265_s25 + $0x10] sm:$0xff] }
  0x16   : > { %1129 = vmatpush.msra.mxu3 %v225_v8  ;;  %320 = vmatpush.msra.mxu2 %v226_v9 }
  0x17   : > { %1051 = vmatmul.msk.f32.vlgmr.msra.gmra.mxu3 %vm259_vm1, %v246_v10  ;;  %1053 = vmatmul.msk.f32.vlgmr.msra.gmra.mxu2 %vm259_vm1, %v245_v11 }
  0x18   : > { %1058 = vmatpush.msk.msrb.mxu3 %vm266_vm0, %v243_v12  ;;  %297 = vmatpush.msra.mxu0 %v225_v8 }
  0x19   : > { %1050 = vmatmul.msk.f32.vlgmr.msra.gmra.mxu0 %vm259_vm1, %v245_v11  ;;  %1055 = vmatpush.msk.msrb.mxu2 %vm266_vm0, %v242_v13 }
  0x1a   : > { %364 = vmatpush.msrb.mxu3 %v238_v14  ;;  %1061 = vmatpush.msk.msrb.mxu0 %vm266_vm0, %v244_v15 }
  0x1b   : > { %341 = vmatpush.msrb.mxu2 %v237_v16 }
  0x1c   : > { %365 = vmatpush.msrb.mxu3 %v233_v18  ;;  %387 = vmatpush.msrb.mxu0 %v239_v19 }
  0x1d   : > { %342 = vmatpush.msrb.mxu2 %v232_v20 }
  0x1e   : > { %366 = vmatpush.msrb.mxu3 %v228_v21  ;;  %388 = vmatpush.msrb.mxu0 %v234_v22 }
  0x1f   : > { %1054 = vmatmul.msk.f32.gmra.mxu2 %vm259_vm1, %v246_v10  ;;  %1059 = vmatmul.msk.f32.vlgmr.msrb.gmra.mxu3 %vm259_vm1, %v245_v11 }
  0x20   : > { %389 = vmatpush.msrb.mxu0 %v229_v23  ;;  %343 = vmatpush.msrb.mxu2 %v227_v24 }
  0x21   : > { %1062 = vmatmul.msk.f32.vlgmr.msrb.gmra.mxu0 %vm259_vm1, %v245_v11 }
  0x27   : > { %1056 = vmatmul.msk.f32.vlgmr.msrb.gmra.mxu2 %vm259_vm1, %v245_v11  ;;  %1060 = vmatmul.msk.f32.gmra.mxu3 %vm259_vm1, %v246_v10 }
  0x29   : > { %1063 = vmatmul.msk.f32.gmra.mxu0 %vm259_vm1, %v246_v10 }
  0x2f   : > { %1057 = vmatmul.msk.f32.gmra.mxu2 %vm259_vm1, %v246_v10 }
  0x7f   : > { %v257_v25 = vpop.permute.xlu0 %256 }
  0x87   : > { %v252_v30 = vpop.permute.xlu0 %251 }
  0x96   : > { %v299_v26 = vpop.f32.mrf.mxu0 }
  0x97   : > { %v300_v9 = vadd.f32 %v299_v26, %v252_v30 }
  0x99   : > { %v397_v13 = vmax.f32 %v300_v9, 0.0 }
  0x9a   : > { %v302_v27 = vpop.f32.mrf.mxu3  ;;  %v322_v28 = vpop.f32.mrf.mxu2 }
  0x9b   : > { %v303_v29 = vadd.f32 %v302_v27, %v257_v25  ;;  %v323_v49 = vadd.f32 %v322_v28, %v252_v30 }
  0x9d   : > { %v398_v53 = vmax.f32 %v323_v49, 0.0  ;;  %v402_v1 = vmax.f32 %v303_v29, 0.0 }
  0x9e   : > { %v391_v31 = vpop.f32.mrf.mxu0 }
  0x9f   : > { %v392_v32 = vadd.f32 %v391_v31, %v252_v30  ;;  %v475_v31 = vld [vmem:[%s1458_s4] sm:$0xff] }
  0xa1   : > { %v401_v36 = vmax.f32 %v392_v32, 0.0 }
  0xa2   : > { %v325_v33 = vpop.f32.mrf.mxu2  ;;  %v368_v34 = vpop.f32.mrf.mxu3 }
  0xa3   : > { %v369_v35 = vadd.f32 %v368_v34, %v252_v30  ;;  %v1312_v41 = vadd.f32 %v325_v33, %v257_v25  ;;  %v497_v34 = vld [vmem:[%s1457_s3 + $0x8] sm:$0xff] }
  0xa5   : > { %v400_v37 = vmax.f32 %v369_v35, 0.0  ;;  %v403_v45 = vmax.f32 %v1312_v41, 0.0  ;;  %v1070_v41 = vld [vmem:[%s1457_s3 + $0x28] sm:$0xf] }
  0xa6   : > { %v394_v44 = vpop.f32.mrf.mxu0 }
  0xa7   : > { %v1152_v38 = vpack.i.bf16 %v401_v36, %v400_v37  ;;  %v395_v46 = vadd.f32 %v394_v44, %v257_v25  ;;  %v1068_v36 = vld [vmem:[%s1457_s3 + $0x18] sm:$0xff] }
  0xa9   : > { %1153 = vrot.lane.b32.xlu2 %v1152_v38, %s1208_s7  ;;  %v406_v51 = vmax.f32 %v395_v46, 0.0  ;;  %v498_v38 = vld [vmem:[%s1457_s3 + $0x10] sm:$0xf] }
  0xaa   : > { %v345_v39 = vpop.f32.mrf.mxu2  ;;  %v371_v40 = vpop.f32.mrf.mxu3 }
  0xab   : > { %v372_v42 = vadd.f32 %v371_v40, %v257_v25  ;;  %v346_v50 = vadd.f32 %v345_v39, %v252_v30  ;;  %v496_v30 = vld [vmem:[%s1457_s3] sm:$0xff]  ;;  %v476_v40 = vld [vmem:[%s1458_s4 + $0x8] sm:$0xff] }
  0xac   : > { %v1069_v39 = vld [vmem:[%s1457_s3 + $0x20] sm:$0xff] }
  0xad   : > { %v405_v43 = vmax.f32 %v372_v42, 0.0  ;;  %v399_v54 = vmax.f32 %v346_v50, 0.0 }
  0xaf   : > { %438 = vrot.lane.b32.xlu1 %v405_v43, %s1208_s7  ;;  %v1157_v55 = vpack.i.bf16 %v399_v54, %v398_v53 }
  0xb1   : > { %415 = vrot.lane.b32.xlu2 %v403_v45, %s1208_s7 }
  0xb2   : > { %v348_v47 = vpop.f32.mrf.mxu2 }
  0xb3   : > { %v349_v48 = vadd.f32 %v348_v47, %v257_v25 }
  0xb5   : > { %v404_v52 = vmax.f32 %v349_v48, 0.0  ;;  %v1082_v48 = vld [vmem:[%s1457_s3 + $0x48] sm:$0xff] }
  0xb7   : > { %417 = vrot.lane.b32.xlu0 %v404_v52, %s1208_s7  ;;  %440 = vrot.lane.b32.xlu1 %v406_v51, %s1208_s7  ;;  %v1075_v51 = vld [vmem:[%s1457_s3 + $0x30] sm:$0xff] }
  0xbf   : > { %1158 = vrot.lane.b32.xlu1 %v1157_v55, %s1208_s7 }
 0x103   : > { %v1154_v56 = vpop.permute.xlu2 %1153 }
 0x104   : > { %v1156_v57 = vunpack.i.h.bf16 %v1154_v56  ;;  %v1155_v58 = vunpack.i.l.bf16 %v1154_v56 }
 0x106   : > { %v449_v59 = vmax.f32 %v400_v37, %v1156_v57  ;;  %v442_v60 = vsel %vm419_vm2, %v1155_v58, %v1156_v57 }
 0x107   : > { %v448_v61 = vmax.f32 %v399_v54, %v442_v60 }
 0x109   : > { %v1162_v62 = vpack.i.bf16 %v449_v59, %v448_v61  ;;  %v1076_v59 = vld [vmem:[%s1457_s3 + $0x38] sm:$0xff]  ;;  %v1089_v61 = vld [vmem:[%s1457_s3 + $0x60] sm:$0xff] }
 0x10b   : > { %1163 = vrot.lane.b32.xlu1 %v1162_v62, %s1209_s8  ;;  %v416_v0 = vpop.permute.xlu2 %415 }
 0x121   : > { %v439_v63 = vpop.permute.xlu1 %438 }
 0x129   : > { %v418_v2 = vpop.permute.xlu0 %417  ;;  %v441_v3 = vpop.permute.xlu1 %440 }
 0x12a   : > { %v421_v4 = vsel %vm419_vm2, %v416_v0, %v418_v2  ;;  %v443_v5 = vsel %vm419_vm2, %v439_v63, %v441_v3  ;;  %v451_v6 = vmax.f32 %v405_v43, %v441_v3  ;;  %v429_v24 = vmax.f32 %v403_v45, %v418_v2  ;;  %v1084_v63 = vld [vmem:[%s1457_s3 + $0x58] sm:$0xf] }
 0x12b   : > { %v428_v7 = vmax.f32 %v402_v1, %v421_v4  ;;  %v450_v8 = vmax.f32 %v404_v52, %v443_v5  ;;  %v477_v4 = vld [vmem:[%s1458_s4 + $0x10] sm:$0xf] }
 0x12c   : > { %462 = vrot.lane.b32.xlu0 %v451_v6, %s1209_s8  ;;  %v1077_v6 = vld [vmem:[%s1457_s3 + $0x40] sm:$0xf] }
 0x12d   : > { %460 = vrot.lane.b32.xlu2 %v450_v8, %s1209_s8  ;;  %v1090_v8 = vld [vmem:[%s1457_s3 + $0x68] sm:$0xff]  ;;  %s1131_s8 = smul.u32 24, %s1461_s19 }
 0x131   : > { %v1159_v10 = vpop.permute.xlu1 %1158 }
 0x132   : > { %v1161_v11 = vunpack.i.h.bf16 %v1159_v10  ;;  %v1160_v12 = vunpack.i.l.bf16 %v1159_v10 }
 0x134   : > { %v420_v14 = vsel %vm419_vm2, %v1160_v12, %v1161_v11  ;;  %v427_v17 = vmax.f32 %v398_v53, %v1161_v11  ;;  %v1083_v53 = vld [vmem:[%s1457_s3 + $0x50] sm:$0xff] }
 0x135   : > { %v426_v15 = vmax.f32 %v397_v13, %v420_v14 }
 0x17d   : > { %v1164_v16 = vpop.permute.xlu1 %1163 }
 0x17e   : > { %v1166_v18 = vunpack.i.h.bf16 %v1164_v16  ;;  %v1165_v19 = vunpack.i.l.bf16 %v1164_v16  ;;  %v1103_v16 = vld [vmem:[%s1457_s3 + $0x90] sm:$0xff] }
 0x180   : > { %v472_v20 = vmax.f32 %v427_v17, %v1166_v18  ;;  %v465_v21 = vsel %vm464_vm3, %v1165_v19, %v1166_v18  ;;  %v1097_v17 = vld [vmem:[%s1457_s3 + $0x80] sm:$0xff]  ;;  %v1091_v19 = vld [vmem:[%s1457_s3 + $0x70] sm:$0xf] }
 0x181   : > { %v471_v22 = vmax.f32 %v426_v15, %v465_v21 }
 0x183   : > { %596 = vrot.lane.b32.xlu2 %v471_v22, %s1210_s9  ;;  %547 = vrot.lane.b32.xlu0 %v471_v22, %s1211_s10  ;;  %v1192_v23 = vpack.i.bf16 %v472_v20, %v471_v22 }
 0x187   : > { %v461_v25 = vpop.permute.xlu2 %460 }
 0x18b   : > { %1168 = vrot.lane.b32.xlu2 %v1192_v23, %s1212_s11 }
 0x19e   : > { %v463_v26 = vpop.permute.xlu0 %462 }
 0x19f   : > { %v466_v27 = vsel %vm464_vm3, %v461_v25, %v463_v26  ;;  %v474_v28 = vmax.f32 %v429_v24, %v463_v26  ;;  %v1104_v25 = vld [vmem:[%s1457_s3 + $0x98] sm:$0xff]  ;;  %v1110_v26 = vld [vmem:[%s1457_s3 + $0xa8] sm:$0xff] }
 0x1a0   : > { %v473_v29 = vmax.f32 %v428_v7, %v466_v27  ;;  %v1096_v7 = vld [vmem:[%s1457_s3 + $0x78] sm:$0xff] }
 0x1a1   : > { %653 = vrot.lane.b32.xlu1 %v474_v28, %s1212_s11 }
 0x1a2   : > { %1064 = vmatpush.msk.msra.mxu1 %vm509_vm4, %v473_v29  ;;  %549 = vrot.lane.b32.xlu2 %v473_v29, %s1211_s10 }
 0x1a3   : > { %651 = vrot.lane.b32.xlu0 %v473_v29, %s1212_s11  ;;  %s224_s11 = scalar_lea.vmem %s1459_s5, %s1131_s8 }
 0x1a4   : > { %528 = vmatpush.msra.mxu1 %v471_v22 }
 0x1a5   : > { %1065 = vmatmul.msk.f32.vlgmr.msra.gmra.mxu1 %vm499_vm5, %v496_v30 }
 0x1a9   : > { %598 = vrot.lane.b32.xlu1 %v473_v29, %s1210_s9 }
 0x1aa   : > { %1173 = vrot.lane.b32.xlu2 %v1192_v23, %s1213_s14 }
 0x1ab   : > { %707 = vrot.lane.b32.xlu0 %v473_v29, %s1213_s14 }
 0x1ad   : > { %1066 = vmatmul.msk.f32.gmra.mxu1 %vm499_vm5, %v497_v34 }
 0x1b1   : > { %709 = vrot.lane.b32.xlu1 %v474_v28, %s1213_s14 }
 0x1b2   : > { %1178 = vrot.lane.b32.xlu2 %v1192_v23, %s1214_s15 }
 0x1b3   : > { %763 = vrot.lane.b32.xlu0 %v473_v29, %s1214_s15 }
 0x1b5   : > { %1067 = vmatmul.msk.f32.gmra.mxu1 %vm499_vm5, %v498_v38  ;;  %v1117_v38 = vld [vmem:[%s1457_s3 + $0xc0] sm:$0xff] }
 0x1b9   : > { %765 = vrot.lane.b32.xlu1 %v474_v28, %s1214_s15 }
 0x1ba   : > { %1183 = vrot.lane.b32.xlu2 %v1192_v23, %s1215_s16 }
 0x1bb   : > { %819 = vrot.lane.b32.xlu0 %v473_v29, %s1215_s16 }
 0x1c1   : > { %821 = vrot.lane.b32.xlu1 %v474_v28, %s1215_s16 }
 0x1c2   : > { %1188 = vrot.lane.b32.xlu2 %v1192_v23, %s1216_s17 }
 0x1c3   : > { %875 = vrot.lane.b32.xlu0 %v473_v29, %s1216_s17 }
 0x1c9   : > { %877 = vrot.lane.b32.xlu1 %v474_v28, %s1216_s17 }
 0x1ca   : > { %1193 = vrot.lane.b32.xlu2 %v1192_v23, %s1217_s20 }
 0x1cb   : > { %931 = vrot.lane.b32.xlu0 %v473_v29, %s1217_s20 }
 0x1d1   : > { %933 = vrot.lane.b32.xlu1 %v474_v28, %s1217_s20  ;;  %v1098_v28 = vld [vmem:[%s1457_s3 + $0x88] sm:$0xf] }
 0x1d2   : > { %490 = vperm.xlu2 %1198, %v477_v4  }
 0x1d3   : > { %480 = vperm.xlu0 %1151, %v475_v31  }
 0x1d9   : > { %485 = vperm.xlu1 %1197, %v476_v40   ;;  %v1118_v40 = vld [vmem:[%s1457_s3 + $0xc8] sm:$0xff] }
 0x1dd   : > { %v597_v32 = vpop.permute.xlu2 %596 }
 0x1e5   : > { %v1169_v33 = vpop.permute.xlu2 %1168 }
 0x1e6   : > { %v1171_v43 = vunpack.i.h.bf16 %v1169_v33  ;;  %v1170_v44 = vunpack.i.l.bf16 %v1169_v33 }
 0x1e8   : > { %v656_v49 = vsel %vm655_vm6, %v1170_v44, %v1171_v43 }
 0x1f5   : > { %v548_v37 = vpop.permute.xlu0 %547 }
 0x1fc   : > { %v550_v35 = vpop.permute.xlu2 %549 }
 0x1fd   : > { %1071 = vmatpush.msk.msra.mxu2 %vm509_vm4, %v550_v35  ;;  %v1105_v35 = vld [vmem:[%s1457_s3 + $0xa0] sm:$0xf] }
 0x1ff   : > { %578 = vmatpush.msra.mxu2 %v548_v37 }
 0x200   : > { %1072 = vmatmul.msk.f32.vlgmr.msra.gmra.mxu2 %vm499_vm5, %v1068_v36  ;;  %v1111_v36 = vld [vmem:[%s1457_s3 + $0xb0] sm:$0xff] }
 0x204   : > { %v1174_v47 = vpop.permute.xlu2 %1173 }
 0x205   : > { %v1176_v55 = vunpack.i.h.bf16 %v1174_v47  ;;  %v1175_v56 = vunpack.i.l.bf16 %v1174_v47 }
 0x207   : > { %v712_v62 = vsel %vm711_vm7, %v1175_v56, %v1176_v55 }
 0x208   : > { %1073 = vmatmul.msk.f32.gmra.mxu2 %vm499_vm5, %v1069_v39  ;;  %v1112_v39 = vld [vmem:[%s1457_s3 + $0xb8] sm:$0xf] }
 0x20c   : > { %v1179_v54 = vpop.permute.xlu2 %1178 }
 0x20d   : > { %v1181_v0 = vunpack.i.h.bf16 %v1179_v54  ;;  %v1180_v1 = vunpack.i.l.bf16 %v1179_v54 }
 0x20f   : > { %v768_v9 = vsel %vm767_vm8, %v1180_v1, %v1181_v0 }
 0x210   : > { %1074 = vmatmul.msk.f32.gmra.mxu2 %vm499_vm5, %v1070_v41  ;;  %v1119_v41 = vld [vmem:[%s1457_s3 + $0xd0] sm:$0xf] }
 0x213   : > { %v654_v42 = vpop.permute.xlu1 %653 }
 0x214   : > { %v1184_v2 = vpop.permute.xlu2 %1183 }
 0x215   : > { %v652_v45 = vpop.permute.xlu0 %651  ;;  %v1186_v11 = vunpack.i.h.bf16 %v1184_v2  ;;  %v1185_v12 = vunpack.i.l.bf16 %v1184_v2 }
 0x216   : > { %v657_v46 = vsel %vm655_vm6, %v652_v45, %v654_v42 }
 0x217   : > { %1085 = vmatpush.msk.msra.mxu0 %vm509_vm4, %v657_v46  ;;  %v824_v18 = vsel %vm823_vm9, %v1185_v12, %v1186_v11 }
 0x219   : > { %685 = vmatpush.msra.mxu0 %v656_v49 }
 0x21a   : > { %1086 = vmatmul.msk.f32.vlgmr.msra.gmra.mxu0 %vm499_vm5, %v1082_v48 }
 0x21b   : > { %v599_v50 = vpop.permute.xlu1 %598 }
 0x21c   : > { %1078 = vmatpush.msk.msra.mxu3 %vm509_vm4, %v599_v50  ;;  %v1189_v15 = vpop.permute.xlu2 %1188 }
 0x21d   : > { %v708_v52 = vpop.permute.xlu0 %707  ;;  %v1191_v21 = vunpack.i.h.bf16 %v1189_v15  ;;  %v1190_v22 = vunpack.i.l.bf16 %v1189_v15 }
 0x21e   : > { %627 = vmatpush.msra.mxu3 %v597_v32 }
 0x21f   : > { %1079 = vmatmul.msk.f32.vlgmr.msra.gmra.mxu3 %vm499_vm5, %v1075_v51  ;;  %v880_v27 = vsel %vm879_vm10, %v1190_v22, %v1191_v21 }
 0x222   : > { %1087 = vmatmul.msk.f32.gmra.mxu0 %vm499_vm5, %v1083_v53  ;;  %v530_v42 = vpop.f32.mrf.mxu1 }
 0x223   : > { %v710_v57 = vpop.permute.xlu1 %709 }
 0x224   : > { %v713_v58 = vsel %vm711_vm7, %v708_v52, %v710_v57  ;;  %v1194_v29 = vpop.permute.xlu2 %1193 }
 0x225   : > { %v764_v60 = vpop.permute.xlu0 %763  ;;  %1092 = vmatpush.msk.msrb.mxu1 %vm509_vm4, %v713_v58  ;;  %v1196_v30 = vunpack.i.h.bf16 %v1194_v29  ;;  %v1195_v31 = vunpack.i.l.bf16 %v1194_v29 }
 0x227   : > { %741 = vmatpush.msrb.mxu1 %v712_v62  ;;  %1080 = vmatmul.msk.f32.gmra.mxu3 %vm499_vm5, %v1076_v59  ;;  %v936_v37 = vsel %vm935_vm11, %v1195_v31, %v1196_v30 }
 0x228   : > { %1093 = vmatmul.msk.f32.vlgmr.msrb.gmra.mxu1 %vm499_vm5, %v1089_v61 }
 0x22a   : > { %1088 = vmatmul.msk.f32.gmra.mxu0 %vm499_vm5, %v1084_v63  ;;  %v533_v43 = vpop.f32.mrf.mxu1 }
 0x22b   : > { %v766_v3 = vpop.permute.xlu1 %765 }
 0x22c   : > { %v769_v5 = vsel %vm767_vm8, %v764_v60, %v766_v3  ;;  %v491_v2 = vpop.permute.xlu2 %490 }
 0x22d   : > { %1099 = vmatpush.msk.msrb.mxu2 %vm509_vm4, %v769_v5  ;;  %v820_v10 = vpop.permute.xlu0 %819 }
 0x22f   : > { %797 = vmatpush.msrb.mxu2 %v768_v9  ;;  %1081 = vmatmul.msk.f32.gmra.mxu3 %vm499_vm5, %v1077_v6 }
 0x230   : > { %1100 = vmatmul.msk.f32.vlgmr.msrb.gmra.mxu2 %vm499_vm5, %v1096_v7  ;;  %1094 = vmatmul.msk.f32.gmra.mxu1 %vm499_vm5, %v1090_v8 }
 0x232   : > { %v536_v46 = vpop.f32.mrf.mxu1 }
 0x233   : > { %v822_v13 = vpop.permute.xlu1 %821  ;;  %v541_v8 = vadd.f32 %v536_v46, %v491_v2 }
 0x234   : > { %v825_v14 = vsel %vm823_vm9, %v820_v10, %v822_v13 }
 0x235   : > { %1106 = vmatpush.msk.msrb.mxu3 %vm509_vm4, %v825_v14  ;;  %v876_v20 = vpop.permute.xlu0 %875 }
 0x237   : > { %853 = vmatpush.msrb.mxu3 %v824_v18 }
 0x238   : > { %1107 = vmatmul.msk.f32.vlgmr.msrb.gmra.mxu3 %vm499_vm5, %v1103_v16  ;;  %1101 = vmatmul.msk.f32.gmra.mxu2 %vm499_vm5, %v1097_v17 }
 0x239   : > { %1095 = vmatmul.msk.f32.gmra.mxu1 %vm499_vm5, %v1091_v19 }
 0x23b   : > { %v878_v23 = vpop.permute.xlu1 %877 }
 0x23c   : > { %v881_v24 = vsel %vm879_vm10, %v876_v20, %v878_v23 }
 0x23d   : > { %1113 = vmatpush.msk.msrb.mxu0 %vm509_vm4, %v881_v24  ;;  %v932_v32 = vpop.permute.xlu0 %931 }
 0x23f   : > { %909 = vmatpush.msrb.mxu0 %v880_v27 }
 0x240   : > { %1108 = vmatmul.msk.f32.gmra.mxu3 %vm499_vm5, %v1104_v25  ;;  %1114 = vmatmul.msk.f32.vlgmr.msrb.gmra.mxu0 %vm499_vm5, %v1110_v26 }
 0x241   : > { %1102 = vmatmul.msk.f32.gmra.mxu2 %vm499_vm5, %v1098_v28 }
 0x243   : > { %v934_v33 = vpop.permute.xlu1 %933 }
 0x244   : > { %v937_v34 = vsel %vm935_vm11, %v932_v32, %v934_v33 }
 0x245   : > { %1120 = vmatpush.msk.msra.mxu1 %vm509_vm4, %v937_v34  ;;  %v481_v52 = vpop.permute.xlu0 %480 }
 0x246   : > { %v539_v54 = vadd.f32 %v530_v42, %v481_v52 }
 0x247   : > { %965 = vmatpush.msra.mxu1 %v936_v37 }
 0x248   : > { %1109 = vmatmul.msk.f32.gmra.mxu3 %vm499_vm5, %v1105_v35  ;;  %1115 = vmatmul.msk.f32.gmra.mxu0 %vm499_vm5, %v1111_v36 }
 0x249   : > { %1121 = vmatmul.msk.f32.vlgmr.msra.gmra.mxu1 %vm499_vm5, %v1117_v38 }
 0x24b   : > { %v486_v57 = vpop.permute.xlu1 %485 }
 0x24c   : > { %v540_v61 = vadd.f32 %v533_v43, %v486_v57 }
 0x250   : > { %1116 = vmatmul.msk.f32.gmra.mxu0 %vm499_vm5, %v1112_v39 }
 0x251   : > { %1122 = vmatmul.msk.f32.gmra.mxu1 %vm499_vm5, %v1118_v40 }
 0x259   : > { %1123 = vmatmul.msk.f32.gmra.mxu1 %vm499_vm5, %v1119_v41 }
 0x283   : > { %v580_v44 = vpop.f32.mrf.mxu2 }
 0x284   : > { %v589_v56 = vadd.f32 %v580_v44, %v539_v54 }
 0x28b   : > { %v583_v48 = vpop.f32.mrf.mxu2 }
 0x28c   : > { %v590_v0 = vadd.f32 %v583_v48, %v540_v61 }
 0x293   : > { %v586_v53 = vpop.f32.mrf.mxu2 }
 0x294   : > { %v591_v12 = vadd.f32 %v586_v53, %v541_v8 }
 0x297   : > { %v687_v45 = vpop.f32.mrf.mxu0 }
 0x29f   : > { %v690_v49 = vpop.f32.mrf.mxu0 }
 0x2a2   : > { %v629_v47 = vpop.f32.mrf.mxu3 }
 0x2a3   : > { %v638_v60 = vadd.f32 %v629_v47, %v589_v56 }
 0x2a5   : > { %v743_v50 = vpop.f32.mrf.mxu1  ;;  %v696_v63 = vadd.f32 %v687_v45, %v638_v60 }
 0x2a7   : > { %v693_v58 = vpop.f32.mrf.mxu0  ;;  %v752_v3 = vadd.f32 %v743_v50, %v696_v63 }
 0x2aa   : > { %v632_v51 = vpop.f32.mrf.mxu3 }
 0x2ab   : > { %v639_v4 = vadd.f32 %v632_v51, %v590_v0 }
 0x2ad   : > { %v746_v59 = vpop.f32.mrf.mxu1  ;;  %v697_v9 = vadd.f32 %v690_v49, %v639_v4 }
 0x2af   : > { %v753_v14 = vadd.f32 %v746_v59, %v697_v9 }
 0x2b2   : > { %v635_v55 = vpop.f32.mrf.mxu3 }
 0x2b3   : > { %v799_v62 = vpop.f32.mrf.mxu2  ;;  %v640_v15 = vadd.f32 %v635_v55, %v591_v12 }
 0x2b4   : > { %v808_v7 = vadd.f32 %v799_v62, %v752_v3 }
 0x2b5   : > { %v698_v21 = vadd.f32 %v693_v58, %v640_v15 }
 0x2b6   : > { %v749_v5 = vpop.f32.mrf.mxu1 }
 0x2b7   : > { %v754_v25 = vadd.f32 %v749_v5, %v698_v21 }
 0x2bb   : > { %v855_v1 = vpop.f32.mrf.mxu3  ;;  %v802_v11 = vpop.f32.mrf.mxu2 }
 0x2bc   : > { %v864_v10 = vadd.f32 %v855_v1, %v808_v7  ;;  %v809_v18 = vadd.f32 %v802_v11, %v753_v14 }
 0x2bd   : > { %v911_v6 = vpop.f32.mrf.mxu0 }
 0x2be   : > { %v920_v16 = vadd.f32 %v911_v6, %v864_v10 }
 0x2c3   : > { %v858_v13 = vpop.f32.mrf.mxu3 }
 0x2c4   : > { %v865_v22 = vadd.f32 %v858_v13, %v809_v18  ;;  %v805_v24 = vpop.f32.mrf.mxu2 }
 0x2c5   : > { %v914_v20 = vpop.f32.mrf.mxu0  ;;  %v810_v29 = vadd.f32 %v805_v24, %v754_v25 }
 0x2c6   : > { %v967_v17 = vpop.f32.mrf.mxu1  ;;  %v921_v26 = vadd.f32 %v914_v20, %v865_v22 }
 0x2c7   : > { %v976_v19 = vadd.f32 %v967_v17, %v920_v16 }
 0x2c9   : > { %v979_v23 = vmax.f32 %v976_v19, 0.0 }
 0x2cb   : > { %983 = vst.msk [vmem:[%s224_s11] sm:$0xff] %vm982_vm12, %v979_v23  ;;  %v861_v27 = vpop.f32.mrf.mxu3 }
 0x2cc   : > { %v866_v31 = vadd.f32 %v861_v27, %v810_v29 }
 0x2cd   : > { %v917_v33 = vpop.f32.mrf.mxu0 }
 0x2ce   : > { %v970_v28 = vpop.f32.mrf.mxu1  ;;  %v922_v34 = vadd.f32 %v917_v33, %v866_v31 }
 0x2cf   : > { %v977_v30 = vadd.f32 %v970_v28, %v921_v26 }
 0x2d1   : > { %v980_v32 = vmax.f32 %v977_v30, 0.0 }
 0x2d3   : > { %984 = vst.msk [vmem:[%s224_s11 + $0x8] sm:$0xff] %vm982_vm12, %v980_v32 }
 0x2d6   : > { %v973_v35 = vpop.f32.mrf.mxu1 }
 0x2d7   : > { %v978_v36 = vadd.f32 %v973_v35, %v922_v34 }
 0x2d9   : > { %v981_v37 = vmax.f32 %v978_v36, 0.0 }
 0x2db   : > { %986 = vst.msk [vmem:[%s224_s11 + $0x10] sm:$0xf] %vm985_vm13, %v981_v37 }
 0x2dc PF: > { %s15_s18 = sadd.s32 1, %s1205_s18  }
 0x2dd   : > { %p12_p4 = scmp.ge.s32.totalorder %s15_s18, 4  }
 0x2df   :  { %14 = sbr.rel (!%p12_p4) target bundleno = 1 (0x1), region = 78 }

// kernel: forward.3
= control target key start
LH: loop header
LB: loop body
LE: loop exit
PB: predicated region body
PF: predicated region fallthrough
CT: control target
= control target key end

     0   :  { %vm3063_vm0 = vcmask 654336   ;;  %vm4219_vm1 = vcmask 80896   ;;  %s10249_s1 = inlined_call_operand.vmem [shape: bf16[2000,512], index: 1, kind: input, shape index: {}]   ;;  %s10250_s0 = inlined_call_operand.vmem [shape: f32[8,2000], index: 0, kind: input, shape index: {}]   ;;  %s10251_s2 = inlined_call_operand.vmem [shape: f32[1,512], index: 2, kind: input, shape index: {}]   ;;  %s10252_s3 = inlined_call_operand.vmem [shape: bf16[512,10], index: 3, kind: input, shape index: {}]   ;;  %s10253_s4 = inlined_call_operand.vmem [shape: f32[1,10], index: 4, kind: input, shape index: {}]   ;;  %s10254_s5 = inlined_call_operand.vmem [shape: f32[8,10], index: 5, kind: output, shape index: {}]  }
   0x1   :  { %v4351_v0 = vld [vmem:[%s10249_s1 + $0xe0] sm:$0xf]  ;;  %v6399_v1 = vld [vmem:[%s10249_s1 + $0xec] sm:$0xf0] }
   0x2   :  { %v4479_v2 = vld [vmem:[%s10249_s1 + $0x1e0] sm:$0xf]  ;;  %v4352_v3 = vor.u32 %v6399_v1, %v4351_v0  ;;  %v6431_v4 = vld [vmem:[%s10249_s1 + $0x1ec] sm:$0xf0] }
   0x3   :  { %v4607_v5 = vld [vmem:[%s10249_s1 + $0x2e0] sm:$0xf]  ;;  %v6463_v6 = vld [vmem:[%s10249_s1 + $0x2ec] sm:$0xf0]  ;;  %v4480_v7 = vor.u32 %v6431_v4, %v4479_v2 }
   0x4   :  { %v4608_v8 = vor.u32 %v6463_v6, %v4607_v5  ;;  %v4735_v9 = vld [vmem:[%s10249_s1 + $0x3e0] sm:$0xf]  ;;  %v6495_v10 = vld [vmem:[%s10249_s1 + $0x3ec] sm:$0xf0]  ;;  %3067 = vmatpush.bf16.msra.mxu0 %v4352_v3 }
   0x5   :  { %v4335_v11 = vld [vmem:[%s10249_s1 + $0xc0] sm:$0xf]  ;;  %v4736_v12 = vor.u32 %v6495_v10, %v4735_v9  ;;  %v6395_v13 = vld [vmem:[%s10249_s1 + $0xcc] sm:$0xf0]  ;;  %3080 = vmatpush.bf16.msra.mxu1 %v4480_v7 }
   0x6   :  { %v4463_v14 = vld [vmem:[%s10249_s1 + $0x1c0] sm:$0xf]  ;;  %v6427_v15 = vld [vmem:[%s10249_s1 + $0x1cc] sm:$0xf0]  ;;  %3093 = vmatpush.bf16.msra.mxu2 %v4608_v8  ;;  %v4336_v16 = vor.u32 %v6395_v13, %v4335_v11 }
   0x7   :  { %v4464_v17 = vor.u32 %v6427_v15, %v4463_v14  ;;  %v4591_v18 = vld [vmem:[%s10249_s1 + $0x2c0] sm:$0xf]  ;;  %v6459_v19 = vld [vmem:[%s10249_s1 + $0x2cc] sm:$0xf0]  ;;  %3106 = vmatpush.bf16.msra.mxu3 %v4736_v12 }
   0x8   :  { %v4719_v20 = vld [vmem:[%s10249_s1 + $0x3c0] sm:$0xf]  ;;  %v4592_v21 = vor.u32 %v6459_v19, %v4591_v18  ;;  %v6491_v22 = vld [vmem:[%s10249_s1 + $0x3cc] sm:$0xf0]  ;;  %3068 = vmatpush.bf16.msra.mxu0 %v4336_v16 }
   0x9   :  { %v4319_v23 = vld [vmem:[%s10249_s1 + $0xa0] sm:$0xf]  ;;  %v6391_v24 = vld [vmem:[%s10249_s1 + $0xac] sm:$0xf0]  ;;  %v4720_v25 = vor.u32 %v6491_v22, %v4719_v20  ;;  %3081 = vmatpush.bf16.msra.mxu1 %v4464_v17 }
   0xa   :  { %v4447_v26 = vld [vmem:[%s10249_s1 + $0x1a0] sm:$0xf]  ;;  %v6423_v27 = vld [vmem:[%s10249_s1 + $0x1ac] sm:$0xf0]  ;;  %v4320_v29 = vor.u32 %v6391_v24, %v4319_v23  ;;  %3094 = vmatpush.bf16.msra.mxu2 %v4592_v21 }
   0xb   :  { %v4575_v28 = vld [vmem:[%s10249_s1 + $0x2a0] sm:$0xf]  ;;  %v6455_v30 = vld [vmem:[%s10249_s1 + $0x2ac] sm:$0xf0]  ;;  %v4448_v33 = vor.u32 %v6423_v27, %v4447_v26  ;;  %3107 = vmatpush.bf16.msra.mxu3 %v4720_v25 }
   0xc   :  { %v4703_v31 = vld [vmem:[%s10249_s1 + $0x3a0] sm:$0xf]  ;;  %v6487_v32 = vld [vmem:[%s10249_s1 + $0x3ac] sm:$0xf0]  ;;  %v4576_v34 = vor.u32 %v6455_v30, %v4575_v28  ;;  %3069 = vmatpush.bf16.msra.mxu0 %v4320_v29 }
   0xd   :  { %v4303_v35 = vld [vmem:[%s10249_s1 + $0x80] sm:$0xf]  ;;  %v6387_v36 = vld [vmem:[%s10249_s1 + $0x8c] sm:$0xf0]  ;;  %v4704_v38 = vor.u32 %v6487_v32, %v4703_v31  ;;  %3082 = vmatpush.bf16.msra.mxu1 %v4448_v33 }
   0xe   :  { %v4431_v37 = vld [vmem:[%s10249_s1 + $0x180] sm:$0xf]  ;;  %v6419_v39 = vld [vmem:[%s10249_s1 + $0x18c] sm:$0xf0]  ;;  %v4304_v44 = vor.u32 %v6387_v36, %v4303_v35  ;;  %3095 = vmatpush.bf16.msra.mxu2 %v4576_v34 }
   0xf   :  { %v4559_v40 = vld [vmem:[%s10249_s1 + $0x280] sm:$0xf]  ;;  %v6451_v41 = vld [vmem:[%s10249_s1 + $0x28c] sm:$0xf0]  ;;  %v4432_v45 = vor.u32 %v6419_v39, %v4431_v37  ;;  %3108 = vmatpush.bf16.msra.mxu3 %v4704_v38 }
  0x10   :  { %v4687_v42 = vld [vmem:[%s10249_s1 + $0x380] sm:$0xf]  ;;  %v6483_v43 = vld [vmem:[%s10249_s1 + $0x38c] sm:$0xf0]  ;;  %v4560_v46 = vor.u32 %v6451_v41, %v4559_v40  ;;  %3070 = vmatpush.bf16.msra.mxu0 %v4304_v44 }
  0x11   :  { %v4287_v47 = vld [vmem:[%s10249_s1 + $0x60] sm:$0xf]  ;;  %v6383_v48 = vld [vmem:[%s10249_s1 + $0x6c] sm:$0xf0]  ;;  %v4688_v50 = vor.u32 %v6483_v43, %v4687_v42  ;;  %3083 = vmatpush.bf16.msra.mxu1 %v4432_v45 }
  0x12   :  { %v4415_v49 = vld [vmem:[%s10249_s1 + $0x160] sm:$0xf]  ;;  %v6415_v51 = vld [vmem:[%s10249_s1 + $0x16c] sm:$0xf0]  ;;  %v4288_v56 = vor.u32 %v6383_v48, %v4287_v47  ;;  %3096 = vmatpush.bf16.msra.mxu2 %v4560_v46 }
  0x13   :  { %v4543_v52 = vld [vmem:[%s10249_s1 + $0x260] sm:$0xf]  ;;  %v6447_v53 = vld [vmem:[%s10249_s1 + $0x26c] sm:$0xf0]  ;;  %v4416_v57 = vor.u32 %v6415_v51, %v4415_v49  ;;  %3109 = vmatpush.bf16.msra.mxu3 %v4688_v50 }
  0x14   :  { %v4671_v54 = vld [vmem:[%s10249_s1 + $0x360] sm:$0xf]  ;;  %v6479_v55 = vld [vmem:[%s10249_s1 + $0x36c] sm:$0xf0]  ;;  %v4544_v58 = vor.u32 %v6447_v53, %v4543_v52  ;;  %3071 = vmatpush.bf16.msra.mxu0 %v4288_v56 }
  0x15   :  { %v4271_v59 = vld [vmem:[%s10249_s1 + $0x40] sm:$0xf]  ;;  %v6379_v60 = vld [vmem:[%s10249_s1 + $0x4c] sm:$0xf0]  ;;  %v4672_v62 = vor.u32 %v6479_v55, %v4671_v54  ;;  %3084 = vmatpush.bf16.msra.mxu1 %v4416_v57 }
  0x16   :  { %v4399_v61 = vld [vmem:[%s10249_s1 + $0x140] sm:$0xf]  ;;  %v6411_v63 = vld [vmem:[%s10249_s1 + $0x14c] sm:$0xf0]  ;;  %v4272_v4 = vor.u32 %v6379_v60, %v4271_v59  ;;  %3097 = vmatpush.bf16.msra.mxu2 %v4544_v58 }
  0x17   :  { %v4527_v0 = vld [vmem:[%s10249_s1 + $0x240] sm:$0xf]  ;;  %v6443_v1 = vld [vmem:[%s10249_s1 + $0x24c] sm:$0xf0]  ;;  %v4400_v5 = vor.u32 %v6411_v63, %v4399_v61  ;;  %3110 = vmatpush.bf16.msra.mxu3 %v4672_v62 }
  0x18   :  { %v4655_v2 = vld [vmem:[%s10249_s1 + $0x340] sm:$0xf]  ;;  %v6475_v3 = vld [vmem:[%s10249_s1 + $0x34c] sm:$0xf0]  ;;  %v4528_v6 = vor.u32 %v6443_v1, %v4527_v0  ;;  %3072 = vmatpush.bf16.msra.mxu0 %v4272_v4 }
  0x19   :  { %v4255_v7 = vld [vmem:[%s10249_s1 + $0x20] sm:$0xf]  ;;  %v6375_v8 = vld [vmem:[%s10249_s1 + $0x2c] sm:$0xf0]  ;;  %v4656_v10 = vor.u32 %v6475_v3, %v4655_v2  ;;  %3085 = vmatpush.bf16.msra.mxu1 %v4400_v5 }
  0x1a   :  { %v4383_v9 = vld [vmem:[%s10249_s1 + $0x120] sm:$0xf]  ;;  %v6407_v11 = vld [vmem:[%s10249_s1 + $0x12c] sm:$0xf0]  ;;  %v4256_v16 = vor.u32 %v6375_v8, %v4255_v7  ;;  %3098 = vmatpush.bf16.msra.mxu2 %v4528_v6 }
  0x1b   :  { %v4511_v12 = vld [vmem:[%s10249_s1 + $0x220] sm:$0xf]  ;;  %v6439_v13 = vld [vmem:[%s10249_s1 + $0x22c] sm:$0xf0]  ;;  %v4384_v19 = vor.u32 %v6407_v11, %v4383_v9  ;;  %3111 = vmatpush.bf16.msra.mxu3 %v4656_v10  ;;  %v24_v10 = vld [vmem:[%s10250_s0 + $0x18] sm:$0xff] }
  0x1c   :  { %v4639_v14 = vld [vmem:[%s10249_s1 + $0x320] sm:$0xf]  ;;  %v6471_v15 = vld [vmem:[%s10249_s1 + $0x32c] sm:$0xf0]  ;;  %v4512_v20 = vor.u32 %v6439_v13, %v4511_v12  ;;  %3073 = vmatpush.bf16.msra.mxu0 %v4256_v16 }
  0x1d   :  { %v4239_v17 = vld [vmem:[%s10249_s1] sm:$0xf]  ;;  %v6371_v18 = vld [vmem:[%s10249_s1 + $0xc] sm:$0xf0]  ;;  %v4640_v24 = vor.u32 %v6471_v15, %v4639_v14  ;;  %3086 = vmatpush.bf16.msra.mxu1 %v4384_v19  ;;  %v7233_v15 = vpack.c.bf16 %v24_v10, %v24_v10  ;;  %v22_v19 = vld [vmem:[%s10250_s0 + $0x8] sm:$0xff] }
  0x1e   :  { %v4367_v21 = vld [vmem:[%s10249_s1 + $0x100] sm:$0xf]  ;;  %v6403_v22 = vld [vmem:[%s10249_s1 + $0x10c] sm:$0xf0]  ;;  %v4240_v31 = vor.u32 %v6371_v18, %v4239_v17  ;;  %3099 = vmatpush.bf16.msra.mxu2 %v4512_v20 }
  0x1f   :  { %v4495_v23 = vld [vmem:[%s10249_s1 + $0x200] sm:$0xf]  ;;  %v6435_v25 = vld [vmem:[%s10249_s1 + $0x20c] sm:$0xf0]  ;;  %v4368_v35 = vor.u32 %v6403_v22, %v4367_v21  ;;  %3112 = vmatpush.bf16.msra.mxu3 %v4640_v24 }
  0x20   :  { %v4623_v26 = vld [vmem:[%s10249_s1 + $0x300] sm:$0xf]  ;;  %v6467_v27 = vld [vmem:[%s10249_s1 + $0x30c] sm:$0xf0]  ;;  %v4496_v36 = vor.u32 %v6435_v25, %v4495_v23  ;;  %3074 = vmatpush.bf16.msra.mxu0 %v4240_v31  ;;  %v7256_v25 = vpack.c.bf16 %v22_v19, %v22_v19 }
  0x21   :  { %v4863_v28 = vld [vmem:[%s10249_s1 + $0x4e0] sm:$0xf]  ;;  %v6527_v29 = vld [vmem:[%s10249_s1 + $0x4ec] sm:$0xf0]  ;;  %v4624_v39 = vor.u32 %v6467_v27, %v4623_v26  ;;  %3087 = vmatpush.bf16.msra.mxu1 %v4368_v35 }
  0x22   :  { %v4991_v30 = vld [vmem:[%s10249_s1 + $0x5e0] sm:$0xf]  ;;  %v6559_v32 = vld [vmem:[%s10249_s1 + $0x5ec] sm:$0xf0]  ;;  %v4864_v40 = vor.u32 %v6527_v29, %v4863_v28  ;;  %3100 = vmatpush.bf16.msra.mxu2 %v4496_v36 }
  0x23   :  { %v5119_v33 = vld [vmem:[%s10249_s1 + $0x6e0] sm:$0xf]  ;;  %v6591_v34 = vld [vmem:[%s10249_s1 + $0x6ec] sm:$0xf0]  ;;  %v4992_v41 = vor.u32 %v6559_v32, %v4991_v30  ;;  %3113 = vmatpush.bf16.msra.mxu3 %v4624_v39 }
  0x24   :  { %v5247_v37 = vld [vmem:[%s10249_s1 + $0x7e0] sm:$0xf]  ;;  %v6623_v38 = vld [vmem:[%s10249_s1 + $0x7ec] sm:$0xf0]  ;;  %v5120_v42 = vor.u32 %v6591_v34, %v5119_v33  ;;  %3119 = vmatpush.bf16.msrb.mxu0 %v4864_v40  ;;  %3088 = vmatmul.bf16.vlgmr.msra.gmra.mxu1 %v7256_v25 }
  0x25   :  { %v4847_v43 = vld [vmem:[%s10249_s1 + $0x4c0] sm:$0xf]  ;;  %v6523_v44 = vld [vmem:[%s10249_s1 + $0x4cc] sm:$0xf0]  ;;  %v5248_v46 = vor.u32 %v6623_v38, %v5247_v37  ;;  %3132 = vmatpush.bf16.msrb.mxu1 %v4992_v41 }
  0x26   :  { %v4975_v45 = vld [vmem:[%s10249_s1 + $0x5c0] sm:$0xf]  ;;  %v6555_v47 = vld [vmem:[%s10249_s1 + $0x5cc] sm:$0xf0]  ;;  %v4848_v52 = vor.u32 %v6523_v44, %v4847_v43  ;;  %3145 = vmatpush.bf16.msrb.mxu2 %v5120_v42  ;;  %3114 = vmatmul.bf16.vlgmr.msra.gmra.mxu3 %v7233_v15 }
  0x27   :  { %v5103_v48 = vld [vmem:[%s10249_s1 + $0x6c0] sm:$0xf]  ;;  %v6587_v49 = vld [vmem:[%s10249_s1 + $0x6cc] sm:$0xf0]  ;;  %v4976_v54 = vor.u32 %v6555_v47, %v4975_v45  ;;  %3158 = vmatpush.bf16.msrb.mxu3 %v5248_v46 }
  0x28   :  { %v5231_v50 = vld [vmem:[%s10249_s1 + $0x7c0] sm:$0xf]  ;;  %v6619_v51 = vld [vmem:[%s10249_s1 + $0x7cc] sm:$0xf0]  ;;  %v5104_v55 = vor.u32 %v6587_v49, %v5103_v48  ;;  %3120 = vmatpush.bf16.msrb.mxu0 %v4848_v52 }
  0x29   :  { %v4831_v53 = vld [vmem:[%s10249_s1 + $0x4a0] sm:$0xf]  ;;  %v6519_v56 = vld [vmem:[%s10249_s1 + $0x4ac] sm:$0xf0]  ;;  %v5232_v59 = vor.u32 %v6619_v51, %v5231_v50  ;;  %3133 = vmatpush.bf16.msrb.mxu1 %v4976_v54 }
  0x2a   :  { %v4959_v57 = vld [vmem:[%s10249_s1 + $0x5a0] sm:$0xf]  ;;  %v6551_v58 = vld [vmem:[%s10249_s1 + $0x5ac] sm:$0xf0]  ;;  %v4832_v0 = vor.u32 %v6519_v56, %v4831_v53  ;;  %3146 = vmatpush.bf16.msrb.mxu2 %v5104_v55 }
  0x2b   :  { %v5087_v60 = vld [vmem:[%s10249_s1 + $0x6a0] sm:$0xf]  ;;  %v6583_v61 = vld [vmem:[%s10249_s1 + $0x6ac] sm:$0xf0]  ;;  %v4960_v1 = vor.u32 %v6551_v58, %v4959_v57  ;;  %3159 = vmatpush.bf16.msrb.mxu3 %v5232_v59 }
  0x2c   :  { %v5215_v62 = vld [vmem:[%s10249_s1 + $0x7a0] sm:$0xf]  ;;  %v6615_v63 = vld [vmem:[%s10249_s1 + $0x7ac] sm:$0xf0]  ;;  %v5088_v5 = vor.u32 %v6583_v61, %v5087_v60  ;;  %3121 = vmatpush.bf16.msrb.mxu0 %v4832_v0 }
  0x2d   :  { %v4815_v2 = vld [vmem:[%s10249_s1 + $0x480] sm:$0xf]  ;;  %v23_v3 = vld [vmem:[%s10250_s0 + $0x10] sm:$0xff]  ;;  %v5216_v11 = vor.u32 %v6615_v63, %v5215_v62  ;;  %3134 = vmatpush.bf16.msrb.mxu1 %v4960_v1 }
  0x2e   :  { %v21_v4 = vld [vmem:[%s10250_s0] sm:$0xff]  ;;  %v6515_v6 = vld [vmem:[%s10249_s1 + $0x48c] sm:$0xf0]  ;;  %v7217_v8 = vpack.c.bf16 %v23_v3, %v23_v3  ;;  %3147 = vmatpush.bf16.msrb.mxu2 %v5088_v5 }
  0x2f   :  { %v4943_v7 = vld [vmem:[%s10249_s1 + $0x580] sm:$0xf]  ;;  %v7219_v9 = vpack.c.bf16 %v21_v4, %v21_v4  ;;  %v6547_v12 = vld [vmem:[%s10249_s1 + $0x58c] sm:$0xf0]  ;;  %v4816_v18 = vor.u32 %v6515_v6, %v4815_v2  ;;  %3160 = vmatpush.bf16.msrb.mxu3 %v5216_v11 }
  0x30   :  { %v5071_v13 = vld [vmem:[%s10249_s1 + $0x680] sm:$0xf]  ;;  %v6579_v14 = vld [vmem:[%s10249_s1 + $0x68c] sm:$0xf0]  ;;  %3101 = vmatmul.bf16.vlgmr.msra.gmra.mxu2 %v7217_v8  ;;  %v4944_v20 = vor.u32 %v6547_v12, %v4943_v7 }
  0x31   :  { %v5199_v16 = vld [vmem:[%s10249_s1 + $0x780] sm:$0xf]  ;;  %v6611_v17 = vld [vmem:[%s10249_s1 + $0x78c] sm:$0xf0]  ;;  %3075 = vmatmul.bf16.vlgmr.msra.gmra.mxu0 %v7219_v9  ;;  %v5072_v21 = vor.u32 %v6579_v14, %v5071_v13 }
  0x32   :  { %v4799_v22 = vld [vmem:[%s10249_s1 + $0x460] sm:$0xf]  ;;  %v6511_v23 = vld [vmem:[%s10249_s1 + $0x46c] sm:$0xf0]  ;;  %v5200_v26 = vor.u32 %v6611_v17, %v5199_v16  ;;  %3122 = vmatpush.bf16.msrb.mxu0 %v4816_v18  ;;  %3135 = vmatpush.bf16.msrb.mxu1 %v4944_v20 }
  0x33   :  { %v4927_v24 = vld [vmem:[%s10249_s1 + $0x560] sm:$0xf]  ;;  %v6543_v27 = vld [vmem:[%s10249_s1 + $0x56c] sm:$0xf0]  ;;  %v4800_v32 = vor.u32 %v6511_v23, %v4799_v22  ;;  %3148 = vmatpush.bf16.msrb.mxu2 %v5072_v21  ;;  %v28_v23 = vld [vmem:[%s10250_s0 + $0x38] sm:$0xff] }
  0x34   :  { %v5055_v28 = vld [vmem:[%s10249_s1 + $0x660] sm:$0xf]  ;;  %v6575_v29 = vld [vmem:[%s10249_s1 + $0x66c] sm:$0xf0]  ;;  %v4928_v33 = vor.u32 %v6543_v27, %v4927_v24  ;;  %3161 = vmatpush.bf16.msrb.mxu3 %v5200_v26 }
  0x35   :  { %v5183_v30 = vld [vmem:[%s10249_s1 + $0x760] sm:$0xf]  ;;  %v6607_v31 = vld [vmem:[%s10249_s1 + $0x76c] sm:$0xf0]  ;;  %v5056_v34 = vor.u32 %v6575_v29, %v5055_v28  ;;  %v26_v29 = vld [vmem:[%s10250_s0 + $0x28] sm:$0xff] }
  0x36   :  { %v4783_v35 = vld [vmem:[%s10249_s1 + $0x440] sm:$0xf]  ;;  %v6507_v36 = vld [vmem:[%s10249_s1 + $0x44c] sm:$0xf0]  ;;  %v5184_v38 = vor.u32 %v6607_v31, %v5183_v30  ;;  %3123 = vmatpush.bf16.msrb.mxu0 %v4800_v32  ;;  %3136 = vmatpush.bf16.msrb.mxu1 %v4928_v33 }
  0x37   :  { %v4911_v37 = vld [vmem:[%s10249_s1 + $0x540] sm:$0xf]  ;;  %v6539_v39 = vld [vmem:[%s10249_s1 + $0x54c] sm:$0xf0]  ;;  %v4784_v44 = vor.u32 %v6507_v36, %v4783_v35  ;;  %3149 = vmatpush.bf16.msrb.mxu2 %v5056_v34 }
  0x38   :  { %v5039_v40 = vld [vmem:[%s10249_s1 + $0x640] sm:$0xf]  ;;  %v6571_v41 = vld [vmem:[%s10249_s1 + $0x64c] sm:$0xf0]  ;;  %v4912_v45 = vor.u32 %v6539_v39, %v4911_v37  ;;  %3162 = vmatpush.bf16.msrb.mxu3 %v5184_v38  ;;  %v7410_v38 = vpack.c.bf16 %v28_v23, %v28_v23 }
  0x39   :  { %v5167_v42 = vld [vmem:[%s10249_s1 + $0x740] sm:$0xf]  ;;  %v6603_v43 = vld [vmem:[%s10249_s1 + $0x74c] sm:$0xf0]  ;;  %v5040_v46 = vor.u32 %v6571_v41, %v5039_v40  ;;  %v7412_v40 = vpack.c.bf16 %v26_v29, %v26_v29 }
  0x3a   :  { %v4767_v47 = vld [vmem:[%s10249_s1 + $0x420] sm:$0xf]  ;;  %v6503_v48 = vld [vmem:[%s10249_s1 + $0x42c] sm:$0xf0]  ;;  %v5168_v50 = vor.u32 %v6603_v43, %v5167_v42  ;;  %3124 = vmatpush.bf16.msrb.mxu0 %v4784_v44  ;;  %3137 = vmatpush.bf16.msrb.mxu1 %v4912_v45 }
  0x3b   :  { %v4895_v49 = vld [vmem:[%s10249_s1 + $0x520] sm:$0xf]  ;;  %v6535_v51 = vld [vmem:[%s10249_s1 + $0x52c] sm:$0xf0]  ;;  %v4768_v56 = vor.u32 %v6503_v48, %v4767_v47  ;;  %3150 = vmatpush.bf16.msrb.mxu2 %v5040_v46 }
  0x3c   :  { %v5023_v52 = vld [vmem:[%s10249_s1 + $0x620] sm:$0xf]  ;;  %v6567_v53 = vld [vmem:[%s10249_s1 + $0x62c] sm:$0xf0]  ;;  %v4896_v59 = vor.u32 %v6535_v51, %v4895_v49  ;;  %3163 = vmatpush.bf16.msrb.mxu3 %v5168_v50 }
  0x3d   :  { %v5151_v54 = vld [vmem:[%s10249_s1 + $0x720] sm:$0xf]  ;;  %v6599_v55 = vld [vmem:[%s10249_s1 + $0x72c] sm:$0xf0]  ;;  %v5024_v60 = vor.u32 %v6567_v53, %v5023_v52 }
  0x3e   :  { %v4751_v57 = vld [vmem:[%s10249_s1 + $0x400] sm:$0xf]  ;;  %v6499_v58 = vld [vmem:[%s10249_s1 + $0x40c] sm:$0xf0]  ;;  %v5152_v0 = vor.u32 %v6599_v55, %v5151_v54  ;;  %3125 = vmatpush.bf16.msrb.mxu0 %v4768_v56  ;;  %3138 = vmatpush.bf16.msrb.mxu1 %v4896_v59 }
  0x3f   :  { %v4879_v61 = vld [vmem:[%s10249_s1 + $0x500] sm:$0xf]  ;;  %v6531_v62 = vld [vmem:[%s10249_s1 + $0x50c] sm:$0xf0]  ;;  %v4752_v7 = vor.u32 %v6499_v58, %v4751_v57  ;;  %3151 = vmatpush.bf16.msrb.mxu2 %v5024_v60 }
  0x40   :  { %v5007_v63 = vld [vmem:[%s10249_s1 + $0x600] sm:$0xf]  ;;  %v6563_v1 = vld [vmem:[%s10249_s1 + $0x60c] sm:$0xf0]  ;;  %v4880_v13 = vor.u32 %v6531_v62, %v4879_v61  ;;  %3164 = vmatpush.bf16.msrb.mxu3 %v5152_v0 }
  0x41   :  { %v5135_v2 = vld [vmem:[%s10249_s1 + $0x700] sm:$0xf]  ;;  %v6595_v3 = vld [vmem:[%s10249_s1 + $0x70c] sm:$0xf0]  ;;  %v5008_v14 = vor.u32 %v6563_v1, %v5007_v63 }
  0x42   :  { %v5375_v4 = vld [vmem:[%s10249_s1 + $0x8e0] sm:$0xf]  ;;  %v6655_v5 = vld [vmem:[%s10249_s1 + $0x8ec] sm:$0xf0]  ;;  %v5136_v19 = vor.u32 %v6595_v3, %v5135_v2  ;;  %3126 = vmatpush.bf16.msrb.mxu0 %v4752_v7  ;;  %3139 = vmatpush.bf16.msrb.mxu1 %v4880_v13 }
  0x43   :  { %v5503_v6 = vld [vmem:[%s10249_s1 + $0x9e0] sm:$0xf]  ;;  %v6687_v10 = vld [vmem:[%s10249_s1 + $0x9ec] sm:$0xf0]  ;;  %v5376_v20 = vor.u32 %v6655_v5, %v5375_v4  ;;  %3152 = vmatpush.bf16.msrb.mxu2 %v5008_v14 }
  0x44   :  { %v5631_v11 = vld [vmem:[%s10249_s1 + $0xae0] sm:$0xf]  ;;  %v6719_v12 = vld [vmem:[%s10249_s1 + $0xaec] sm:$0xf0]  ;;  %v5504_v24 = vor.u32 %v6687_v10, %v5503_v6  ;;  %3165 = vmatpush.bf16.msrb.mxu3 %v5136_v19 }
  0x45   :  { %v5759_v16 = vld [vmem:[%s10249_s1 + $0xbe0] sm:$0xf]  ;;  %v6751_v17 = vld [vmem:[%s10249_s1 + $0xbec] sm:$0xf0]  ;;  %v5632_v26 = vor.u32 %v6719_v12, %v5631_v11  ;;  %3140 = vmatmul.bf16.vlgmr.msrb.gmra.mxu1 %v7412_v40 }
  0x46   :  { %v27_v18 = vld [vmem:[%s10250_s0 + $0x30] sm:$0xff]  ;;  %v5359_v21 = vld [vmem:[%s10249_s1 + $0x8c0] sm:$0xf]  ;;  %v5760_v30 = vor.u32 %v6751_v17, %v5759_v16  ;;  %3171 = vmatpush.bf16.msra.mxu0 %v5376_v20  ;;  %3184 = vmatpush.bf16.msra.mxu1 %v5504_v24 }
  0x47   :  { %v25_v22 = vld [vmem:[%s10250_s0 + $0x20] sm:$0xff]  ;;  %v6651_v27 = vld [vmem:[%s10249_s1 + $0x8cc] sm:$0xf0]  ;;  %v7400_v34 = vpack.c.bf16 %v27_v18, %v27_v18  ;;  %3197 = vmatpush.bf16.msra.mxu2 %v5632_v26  ;;  %3166 = vmatmul.bf16.vlgmr.msrb.gmra.mxu3 %v7410_v38 }
  0x48   :  { %v5487_v28 = vld [vmem:[%s10249_s1 + $0x9c0] sm:$0xf]  ;;  %v6683_v31 = vld [vmem:[%s10249_s1 + $0x9cc] sm:$0xf0]  ;;  %v7408_v37 = vpack.c.bf16 %v25_v22, %v25_v22  ;;  %v5360_v39 = vor.u32 %v6651_v27, %v5359_v21  ;;  %3210 = vmatpush.bf16.msra.mxu3 %v5760_v30 }
  0x49   :  { %v5615_v32 = vld [vmem:[%s10249_s1 + $0xac0] sm:$0xf]  ;;  %v6715_v33 = vld [vmem:[%s10249_s1 + $0xacc] sm:$0xf0]  ;;  %v5488_v41 = vor.u32 %v6683_v31, %v5487_v28  ;;  %3153 = vmatmul.bf16.vlgmr.msrb.gmra.mxu2 %v7400_v34 }
  0x4a   :  { %v5743_v35 = vld [vmem:[%s10249_s1 + $0xbc0] sm:$0xf]  ;;  %v6747_v36 = vld [vmem:[%s10249_s1 + $0xbcc] sm:$0xf0]  ;;  %v5616_v42 = vor.u32 %v6715_v33, %v5615_v32  ;;  %3127 = vmatmul.bf16.vlgmr.msrb.gmra.mxu0 %v7408_v37 }
  0x4b   :  { %v5343_v43 = vld [vmem:[%s10249_s1 + $0x8a0] sm:$0xf]  ;;  %v6647_v44 = vld [vmem:[%s10249_s1 + $0x8ac] sm:$0xf0]  ;;  %v5744_v46 = vor.u32 %v6747_v36, %v5743_v35  ;;  %3172 = vmatpush.bf16.msra.mxu0 %v5360_v39  ;;  %3185 = vmatpush.bf16.msra.mxu1 %v5488_v41 }
  0x4c   :  { %v5471_v45 = vld [vmem:[%s10249_s1 + $0x9a0] sm:$0xf]  ;;  %v6679_v47 = vld [vmem:[%s10249_s1 + $0x9ac] sm:$0xf0]  ;;  %v5344_v52 = vor.u32 %v6647_v44, %v5343_v43  ;;  %3198 = vmatpush.bf16.msra.mxu2 %v5616_v42 }
  0x4d   :  { %v5599_v48 = vld [vmem:[%s10249_s1 + $0xaa0] sm:$0xf]  ;;  %v6711_v49 = vld [vmem:[%s10249_s1 + $0xaac] sm:$0xf0]  ;;  %v5472_v53 = vor.u32 %v6679_v47, %v5471_v45  ;;  %3211 = vmatpush.bf16.msra.mxu3 %v5744_v46 }
  0x4e   :  { %v5727_v50 = vld [vmem:[%s10249_s1 + $0xba0] sm:$0xf]  ;;  %v6743_v51 = vld [vmem:[%s10249_s1 + $0xbac] sm:$0xf0]  ;;  %v5600_v54 = vor.u32 %v6711_v49, %v5599_v48 }
  0x4f   :  { %v5327_v55 = vld [vmem:[%s10249_s1 + $0x880] sm:$0xf]  ;;  %v6643_v56 = vld [vmem:[%s10249_s1 + $0x88c] sm:$0xf0]  ;;  %v5728_v58 = vor.u32 %v6743_v51, %v5727_v50  ;;  %3173 = vmatpush.bf16.msra.mxu0 %v5344_v52  ;;  %3186 = vmatpush.bf16.msra.mxu1 %v5472_v53 }
  0x50   :  { %v5455_v57 = vld [vmem:[%s10249_s1 + $0x980] sm:$0xf]  ;;  %v6675_v59 = vld [vmem:[%s10249_s1 + $0x98c] sm:$0xf0]  ;;  %v5328_v0 = vor.u32 %v6643_v56, %v5327_v55  ;;  %3199 = vmatpush.bf16.msra.mxu2 %v5600_v54 }
  0x51   :  { %v5583_v60 = vld [vmem:[%s10249_s1 + $0xa80] sm:$0xf]  ;;  %v6707_v61 = vld [vmem:[%s10249_s1 + $0xa8c] sm:$0xf0]  ;;  %v5456_v1 = vor.u32 %v6675_v59, %v5455_v57  ;;  %3212 = vmatpush.bf16.msra.mxu3 %v5728_v58 }
  0x52   :  { %v5711_v62 = vld [vmem:[%s10249_s1 + $0xb80] sm:$0xf]  ;;  %v6739_v63 = vld [vmem:[%s10249_s1 + $0xb8c] sm:$0xf0]  ;;  %v5584_v2 = vor.u32 %v6707_v61, %v5583_v60 }
  0x53   :  { %v5311_v3 = vld [vmem:[%s10249_s1 + $0x860] sm:$0xf]  ;;  %v6639_v4 = vld [vmem:[%s10249_s1 + $0x86c] sm:$0xf0]  ;;  %v5712_v6 = vor.u32 %v6739_v63, %v5711_v62  ;;  %3174 = vmatpush.bf16.msra.mxu0 %v5328_v0  ;;  %3187 = vmatpush.bf16.msra.mxu1 %v5456_v1 }
  0x54   :  { %v5439_v5 = vld [vmem:[%s10249_s1 + $0x960] sm:$0xf]  ;;  %v6671_v7 = vld [vmem:[%s10249_s1 + $0x96c] sm:$0xf0]  ;;  %v5312_v14 = vor.u32 %v6639_v4, %v5311_v3  ;;  %3200 = vmatpush.bf16.msra.mxu2 %v5584_v2 }
  0x55   :  { %v5567_v10 = vld [vmem:[%s10249_s1 + $0xa60] sm:$0xf]  ;;  %v6703_v11 = vld [vmem:[%s10249_s1 + $0xa6c] sm:$0xf0]  ;;  %v5440_v16 = vor.u32 %v6671_v7, %v5439_v5  ;;  %3213 = vmatpush.bf16.msra.mxu3 %v5712_v6  ;;  %v30_v7 = vld [vmem:[%s10250_s0 + $0x48] sm:$0xff] }
  0x56   :  { %v5695_v12 = vld [vmem:[%s10249_s1 + $0xb60] sm:$0xf]  ;;  %v6735_v13 = vld [vmem:[%s10249_s1 + $0xb6c] sm:$0xf0]  ;;  %v5568_v17 = vor.u32 %v6703_v11, %v5567_v10  ;;  %v32_v10 = vld [vmem:[%s10250_s0 + $0x58] sm:$0xff] }
  0x57   :  { %v5295_v18 = vld [vmem:[%s10249_s1 + $0x840] sm:$0xf]  ;;  %v6635_v19 = vld [vmem:[%s10249_s1 + $0x84c] sm:$0xf0]  ;;  %v5696_v21 = vor.u32 %v6735_v13, %v5695_v12  ;;  %3175 = vmatpush.bf16.msra.mxu0 %v5312_v14  ;;  %3188 = vmatpush.bf16.msra.mxu1 %v5440_v16 }
  0x58   :  { %v5423_v20 = vld [vmem:[%s10249_s1 + $0x940] sm:$0xf]  ;;  %v6667_v22 = vld [vmem:[%s10249_s1 + $0x94c] sm:$0xf0]  ;;  %v5296_v28 = vor.u32 %v6635_v19, %v5295_v18  ;;  %3201 = vmatpush.bf16.msra.mxu2 %v5568_v17 }
  0x59   :  { %v5551_v23 = vld [vmem:[%s10249_s1 + $0xa40] sm:$0xf]  ;;  %v6699_v24 = vld [vmem:[%s10249_s1 + $0xa4c] sm:$0xf0]  ;;  %v5424_v29 = vor.u32 %v6667_v22, %v5423_v20  ;;  %3214 = vmatpush.bf16.msra.mxu3 %v5696_v21 }
  0x5a   :  { %v5679_v26 = vld [vmem:[%s10249_s1 + $0xb40] sm:$0xf]  ;;  %v6731_v27 = vld [vmem:[%s10249_s1 + $0xb4c] sm:$0xf0]  ;;  %v5552_v30 = vor.u32 %v6699_v24, %v5551_v23  ;;  %v7620_v23 = vpack.c.bf16 %v30_v7, %v30_v7 }
  0x5b   :  { %v5279_v31 = vld [vmem:[%s10249_s1 + $0x820] sm:$0xf]  ;;  %v6631_v32 = vld [vmem:[%s10249_s1 + $0x82c] sm:$0xf0]  ;;  %v5680_v35 = vor.u32 %v6731_v27, %v5679_v26  ;;  %3176 = vmatpush.bf16.msra.mxu0 %v5296_v28  ;;  %3189 = vmatpush.bf16.msra.mxu1 %v5424_v29  ;;  %v7628_v27 = vpack.c.bf16 %v32_v10, %v32_v10 }
  0x5c   :  { %v5407_v33 = vld [vmem:[%s10249_s1 + $0x920] sm:$0xf]  ;;  %v6663_v36 = vld [vmem:[%s10249_s1 + $0x92c] sm:$0xf0]  ;;  %v5280_v44 = vor.u32 %v6631_v32, %v5279_v31  ;;  %3202 = vmatpush.bf16.msra.mxu2 %v5552_v30 }
  0x5d   :  { %v5535_v39 = vld [vmem:[%s10249_s1 + $0xa20] sm:$0xf]  ;;  %v6695_v41 = vld [vmem:[%s10249_s1 + $0xa2c] sm:$0xf0]  ;;  %v5408_v47 = vor.u32 %v6663_v36, %v5407_v33  ;;  %3215 = vmatpush.bf16.msra.mxu3 %v5680_v35 }
  0x5e   :  { %v5663_v42 = vld [vmem:[%s10249_s1 + $0xb20] sm:$0xf]  ;;  %v6727_v43 = vld [vmem:[%s10249_s1 + $0xb2c] sm:$0xf0]  ;;  %v5536_v48 = vor.u32 %v6695_v41, %v5535_v39 }
  0x5f   :  { %v5263_v45 = vld [vmem:[%s10249_s1 + $0x800] sm:$0xf]  ;;  %v6627_v46 = vld [vmem:[%s10249_s1 + $0x80c] sm:$0xf0]  ;;  %v5664_v52 = vor.u32 %v6727_v43, %v5663_v42  ;;  %3177 = vmatpush.bf16.msra.mxu0 %v5280_v44  ;;  %3190 = vmatpush.bf16.msra.mxu1 %v5408_v47 }
  0x60   :  { %v5391_v49 = vld [vmem:[%s10249_s1 + $0x900] sm:$0xf]  ;;  %v6659_v50 = vld [vmem:[%s10249_s1 + $0x90c] sm:$0xf0]  ;;  %v5264_v59 = vor.u32 %v6627_v46, %v5263_v45  ;;  %3203 = vmatpush.bf16.msra.mxu2 %v5536_v48 }
  0x61   :  { %v5519_v51 = vld [vmem:[%s10249_s1 + $0xa00] sm:$0xf]  ;;  %v6691_v53 = vld [vmem:[%s10249_s1 + $0xa0c] sm:$0xf0]  ;;  %v5392_v63 = vor.u32 %v6659_v50, %v5391_v49  ;;  %3216 = vmatpush.bf16.msra.mxu3 %v5664_v52 }
  0x62   :  { %v5647_v54 = vld [vmem:[%s10249_s1 + $0xb00] sm:$0xf]  ;;  %v6723_v55 = vld [vmem:[%s10249_s1 + $0xb0c] sm:$0xf0]  ;;  %v5520_v0 = vor.u32 %v6691_v53, %v5519_v51 }
  0x63   :  { %v5887_v56 = vld [vmem:[%s10249_s1 + $0xce0] sm:$0xf]  ;;  %v6783_v57 = vld [vmem:[%s10249_s1 + $0xcec] sm:$0xf0]  ;;  %v5648_v4 = vor.u32 %v6723_v55, %v5647_v54  ;;  %3178 = vmatpush.bf16.msra.mxu0 %v5264_v59  ;;  %3191 = vmatpush.bf16.msra.mxu1 %v5392_v63 }
  0x64   :  { %v6015_v58 = vld [vmem:[%s10249_s1 + $0xde0] sm:$0xf]  ;;  %v6815_v60 = vld [vmem:[%s10249_s1 + $0xdec] sm:$0xf0]  ;;  %v5888_v5 = vor.u32 %v6783_v57, %v5887_v56  ;;  %3204 = vmatpush.bf16.msra.mxu2 %v5520_v0 }
  0x65   :  { %v6143_v61 = vld [vmem:[%s10249_s1 + $0xee0] sm:$0xf]  ;;  %v6847_v62 = vld [vmem:[%s10249_s1 + $0xeec] sm:$0xf0]  ;;  %v6016_v11 = vor.u32 %v6815_v60, %v6015_v58  ;;  %3217 = vmatpush.bf16.msra.mxu3 %v5648_v4 }
  0x66   :  { %v6223_v1 = vld [vmem:[%s10249_s1 + $0xf80] sm:$0xf]  ;;  %v6867_v2 = vld [vmem:[%s10249_s1 + $0xf8c] sm:$0xf0]  ;;  %v6144_v12 = vor.u32 %v6847_v62, %v6143_v61  ;;  %3192 = vmatmul.bf16.vlgmr.msra.gmra.mxu1 %v7620_v23 }
  0x67   :  { %v29_v3 = vld [vmem:[%s10250_s0 + $0x40] sm:$0xff]  ;;  %v31_v6 = vld [vmem:[%s10250_s0 + $0x50] sm:$0xff]  ;;  %v6224_v17 = vor.u32 %v6867_v2, %v6223_v1  ;;  %3223 = vmatpush.bf16.msrb.mxu0 %v5888_v5  ;;  %3236 = vmatpush.bf16.msrb.mxu1 %v6016_v11 }
  0x68   :  { %v5871_v13 = vld [vmem:[%s10249_s1 + $0xcc0] sm:$0xf]  ;;  %v6779_v14 = vld [vmem:[%s10249_s1 + $0xccc] sm:$0xf0]  ;;  %v7607_v18 = vpack.c.bf16 %v29_v3, %v29_v3  ;;  %v7618_v22 = vpack.c.bf16 %v31_v6, %v31_v6  ;;  %3249 = vmatpush.bf16.msrb.mxu2 %v6144_v12  ;;  %3218 = vmatmul.bf16.vlgmr.msra.gmra.mxu3 %v7628_v27  ;;  %v6397_v5 = vld [vmem:[%s10249_s1 + $0xe4] sm:$0xf] }
  0x69   :  { %v5999_v16 = vld [vmem:[%s10249_s1 + $0xdc0] sm:$0xf]  ;;  %v6811_v19 = vld [vmem:[%s10249_s1 + $0xdcc] sm:$0xf0]  ;;  %v5872_v28 = vor.u32 %v6779_v14, %v5871_v13  ;;  %3265 = vmatpush.bf16.msrb.mxu3 %v6224_v17  ;;  %v4353_v6 = vld [vmem:[%s10249_s1 + $0xf0] sm:$0xf0] }
  0x6a   :  { %v6127_v20 = vld [vmem:[%s10249_s1 + $0xec0] sm:$0xf]  ;;  %v6843_v21 = vld [vmem:[%s10249_s1 + $0xecc] sm:$0xf0]  ;;  %v6000_v29 = vor.u32 %v6811_v19, %v5999_v16  ;;  %3179 = vmatmul.bf16.vlgmr.msra.gmra.mxu0 %v7607_v18  ;;  %3205 = vmatmul.bf16.vlgmr.msra.gmra.mxu2 %v7618_v22 }
  0x6b   :  { %v6207_v24 = vld [vmem:[%s10249_s1 + $0xf60] sm:$0xf]  ;;  %v6863_v26 = vld [vmem:[%s10249_s1 + $0xf6c] sm:$0xf0]  ;;  %v6128_v30 = vor.u32 %v6843_v21, %v6127_v20  ;;  %3224 = vmatpush.bf16.msrb.mxu0 %v5872_v28  ;;  %v4356_v20 = vor.u32 %v6397_v5, %v4353_v6  ;;  %v36_v21 = vld [vmem:[%s10250_s0 + $0x78] sm:$0xff] }
  0x6c   :  { %v5855_v31 = vld [vmem:[%s10249_s1 + $0xca0] sm:$0xf]  ;;  %v6775_v32 = vld [vmem:[%s10249_s1 + $0xcac] sm:$0xf0]  ;;  %v6208_v35 = vor.u32 %v6863_v26, %v6207_v24  ;;  %3237 = vmatpush.bf16.msrb.mxu1 %v6000_v29  ;;  %v6393_v26 = vld [vmem:[%s10249_s1 + $0xc4] sm:$0xf] }
  0x6d   :  { %v5983_v33 = vld [vmem:[%s10249_s1 + $0xda0] sm:$0xf]  ;;  %v6807_v36 = vld [vmem:[%s10249_s1 + $0xdac] sm:$0xf0]  ;;  %v5856_v44 = vor.u32 %v6775_v32, %v5855_v31  ;;  %3250 = vmatpush.bf16.msrb.mxu2 %v6128_v30  ;;  %v4337_v28 = vld [vmem:[%s10249_s1 + $0xd0] sm:$0xf0] }
  0x6e   :  { %v6111_v39 = vld [vmem:[%s10249_s1 + $0xea0] sm:$0xf]  ;;  %v6839_v41 = vld [vmem:[%s10249_s1 + $0xeac] sm:$0xf0]  ;;  %v5984_v45 = vor.u32 %v6807_v36, %v5983_v33  ;;  %3266 = vmatpush.bf16.msrb.mxu3 %v6208_v35  ;;  %v34_v6 = vld [vmem:[%s10250_s0 + $0x68] sm:$0xff] }
  0x6f   :  { %v6191_v42 = vld [vmem:[%s10249_s1 + $0xf40] sm:$0xf]  ;;  %v6859_v43 = vld [vmem:[%s10249_s1 + $0xf4c] sm:$0xf0]  ;;  %v6112_v46 = vor.u32 %v6839_v41, %v6111_v39  ;;  %3225 = vmatpush.bf16.msrb.mxu0 %v5856_v44  ;;  %v7757_v41 = vpack.c.bf16 %v36_v21, %v36_v21  ;;  %v6489_v21 = vld [vmem:[%s10249_s1 + $0x3c4] sm:$0xf] }
  0x70   :  { %v5839_v47 = vld [vmem:[%s10249_s1 + $0xc80] sm:$0xf]  ;;  %v6771_v48 = vld [vmem:[%s10249_s1 + $0xc8c] sm:$0xf0]  ;;  %v6192_v50 = vor.u32 %v6859_v43, %v6191_v42  ;;  %3238 = vmatpush.bf16.msrb.mxu1 %v5984_v45  ;;  %v4340_v42 = vor.u32 %v6393_v26, %v4337_v28  ;;  %v6389_v43 = vld [vmem:[%s10249_s1 + $0xa4] sm:$0xf]  ;;  %v7846_v26 = vpack.c.bf16 %v34_v6, %v34_v6 }
  0x71   :  { %v5967_v49 = vld [vmem:[%s10249_s1 + $0xd80] sm:$0xf]  ;;  %v6803_v51 = vld [vmem:[%s10249_s1 + $0xd8c] sm:$0xf0]  ;;  %v5840_v56 = vor.u32 %v6771_v48, %v5839_v47  ;;  %3251 = vmatpush.bf16.msrb.mxu2 %v6112_v46  ;;  %v4321_v45 = vld [vmem:[%s10249_s1 + $0xb0] sm:$0xf0] }
  0x72   :  { %v6095_v52 = vld [vmem:[%s10249_s1 + $0xe80] sm:$0xf]  ;;  %v6835_v53 = vld [vmem:[%s10249_s1 + $0xe8c] sm:$0xf0]  ;;  %v5968_v57 = vor.u32 %v6803_v51, %v5967_v49  ;;  %3267 = vmatpush.bf16.msrb.mxu3 %v6192_v50  ;;  %v4865_v6 = vld [vmem:[%s10249_s1 + $0x4f0] sm:$0xf0] }
  0x73   :  { %v6175_v54 = vld [vmem:[%s10249_s1 + $0xf20] sm:$0xf]  ;;  %v6855_v55 = vld [vmem:[%s10249_s1 + $0xf2c] sm:$0xf0]  ;;  %v6096_v58 = vor.u32 %v6835_v53, %v6095_v52  ;;  %3226 = vmatpush.bf16.msrb.mxu0 %v5840_v56  ;;  %v4324_v56 = vor.u32 %v6389_v43, %v4321_v45  ;;  %v6485_v43 = vld [vmem:[%s10249_s1 + $0x3a4] sm:$0xf] }
  0x74   :  { %v5823_v59 = vld [vmem:[%s10249_s1 + $0xc60] sm:$0xf]  ;;  %v6767_v60 = vld [vmem:[%s10249_s1 + $0xc6c] sm:$0xf0]  ;;  %v6176_v62 = vor.u32 %v6855_v55, %v6175_v54  ;;  %3239 = vmatpush.bf16.msrb.mxu1 %v5968_v57  ;;  %v6385_v54 = vld [vmem:[%s10249_s1 + $0x84] sm:$0xf] }
  0x75   :  { %v5951_v61 = vld [vmem:[%s10249_s1 + $0xd60] sm:$0xf]  ;;  %v6799_v63 = vld [vmem:[%s10249_s1 + $0xd6c] sm:$0xf0]  ;;  %v5824_v4 = vor.u32 %v6767_v60, %v5823_v59  ;;  %3252 = vmatpush.bf16.msrb.mxu2 %v6096_v58  ;;  %v6429_v55 = vld [vmem:[%s10249_s1 + $0x1e4] sm:$0xf] }
  0x76   :  { %v6079_v0 = vld [vmem:[%s10249_s1 + $0xe60] sm:$0xf]  ;;  %v6831_v1 = vld [vmem:[%s10249_s1 + $0xe6c] sm:$0xf0]  ;;  %v5952_v7 = vor.u32 %v6799_v63, %v5951_v61  ;;  %3268 = vmatpush.bf16.msrb.mxu3 %v6176_v62  ;;  %v4481_v57 = vld [vmem:[%s10249_s1 + $0x1f0] sm:$0xf0] }
  0x77   :  { %v6159_v2 = vld [vmem:[%s10249_s1 + $0xf00] sm:$0xf]  ;;  %v6851_v3 = vld [vmem:[%s10249_s1 + $0xf0c] sm:$0xf0]  ;;  %v6080_v10 = vor.u32 %v6831_v1, %v6079_v0  ;;  %3227 = vmatpush.bf16.msrb.mxu0 %v5824_v4  ;;  %v6461_v58 = vld [vmem:[%s10249_s1 + $0x2e4] sm:$0xf]  ;;  %v4484_v4 = vor.u32 %v6429_v55, %v4481_v57 }
  0x78   :  { %v5807_v11 = vld [vmem:[%s10249_s1 + $0xc40] sm:$0xf]  ;;  %v6763_v12 = vld [vmem:[%s10249_s1 + $0xc4c] sm:$0xf0]  ;;  %v6160_v14 = vor.u32 %v6851_v3, %v6159_v2  ;;  %3240 = vmatpush.bf16.msrb.mxu1 %v5952_v7  ;;  %v4609_v59 = vld [vmem:[%s10249_s1 + $0x2f0] sm:$0xf0] }
  0x79   :  { %v5935_v13 = vld [vmem:[%s10249_s1 + $0xd40] sm:$0xf]  ;;  %v6795_v16 = vld [vmem:[%s10249_s1 + $0xd4c] sm:$0xf0]  ;;  %v5808_v24 = vor.u32 %v6763_v12, %v5807_v11  ;;  %3253 = vmatpush.bf16.msrb.mxu2 %v6080_v10  ;;  %v4305_v61 = vld [vmem:[%s10249_s1 + $0x90] sm:$0xf0]  ;;  %v4612_v5 = vor.u32 %v6461_v58, %v4609_v59 }
  0x7a   :  { %v6063_v17 = vld [vmem:[%s10249_s1 + $0xe40] sm:$0xf]  ;;  %v6827_v19 = vld [vmem:[%s10249_s1 + $0xe4c] sm:$0xf0]  ;;  %v5936_v29 = vor.u32 %v6795_v16, %v5935_v13  ;;  %3269 = vmatpush.bf16.msrb.mxu3 %v6160_v14  ;;  %v6493_v62 = vld [vmem:[%s10249_s1 + $0x3e4] sm:$0xf]  ;;  %v4308_v11 = vor.u32 %v6385_v54, %v4305_v61 }
  0x7b   :  { %v6064_v30 = vor.u32 %v6827_v19, %v6063_v17  ;;  %v5791_v31 = vld [vmem:[%s10249_s1 + $0xc20] sm:$0xf]  ;;  %v6759_v32 = vld [vmem:[%s10249_s1 + $0xc2c] sm:$0xf0]  ;;  %3228 = vmatpush.bf16.msrb.mxu0 %v5808_v24  ;;  %v4737_v63 = vld [vmem:[%s10249_s1 + $0x3f0] sm:$0xf0] }
  0x7c   :  { %v5919_v33 = vld [vmem:[%s10249_s1 + $0xd20] sm:$0xf]  ;;  %v6791_v35 = vld [vmem:[%s10249_s1 + $0xd2c] sm:$0xf0]  ;;  %v5792_v44 = vor.u32 %v6759_v32, %v5791_v31  ;;  %3241 = vmatpush.bf16.msrb.mxu1 %v5936_v29  ;;  %v6381_v7 = vld [vmem:[%s10249_s1 + $0x64] sm:$0xf]  ;;  %v4740_v12 = vor.u32 %v6493_v62, %v4737_v63 }
  0x7d   :  { %v6047_v36 = vld [vmem:[%s10249_s1 + $0xe20] sm:$0xf]  ;;  %v6823_v39 = vld [vmem:[%s10249_s1 + $0xe2c] sm:$0xf0]  ;;  %3254 = vmatpush.bf16.msrb.mxu2 %v6064_v30  ;;  %v5920_v48 = vor.u32 %v6791_v35, %v5919_v33  ;;  %6237 = vmatmul.msk.bf16.vlgmr.msrb.gmra.mxu3 %vm3063_vm0, %v7757_v41  ;;  %v6425_v10 = vld [vmem:[%s10249_s1 + $0x1c4] sm:$0xf] }
  0x7e   :  { %3275 = vmatpush.bf16.msra.mxu3 %v4356_v20  ;;  %v5775_v46 = vld [vmem:[%s10249_s1 + $0xc00] sm:$0xf]  ;;  %v6755_v47 = vld [vmem:[%s10249_s1 + $0xc0c] sm:$0xf0]  ;;  %v6048_v49 = vor.u32 %v6823_v39, %v6047_v36  ;;  %v4465_v13 = vld [vmem:[%s10249_s1 + $0x1d0] sm:$0xf0] }
  0x7f   :  { %v5903_v50 = vld [vmem:[%s10249_s1 + $0xd00] sm:$0xf]  ;;  %v6787_v51 = vld [vmem:[%s10249_s1 + $0xd0c] sm:$0xf0]  ;;  %3229 = vmatpush.bf16.msrb.mxu0 %v5792_v44  ;;  %v5776_v60 = vor.u32 %v6755_v47, %v5775_v46  ;;  %v6457_v14 = vld [vmem:[%s10249_s1 + $0x2c4] sm:$0xf]  ;;  %v4468_v28 = vor.u32 %v6425_v10, %v4465_v13 }
  0x80   :  { %v6031_v52 = vld [vmem:[%s10249_s1 + $0xe00] sm:$0xf]  ;;  %v6819_v53 = vld [vmem:[%s10249_s1 + $0xe0c] sm:$0xf0]  ;;  %3242 = vmatpush.bf16.msrb.mxu1 %v5920_v48  ;;  %v5904_v0 = vor.u32 %v6787_v51, %v5903_v50  ;;  %v4593_v16 = vld [vmem:[%s10249_s1 + $0x2d0] sm:$0xf0] }
  0x81   :  { %3255 = vmatpush.bf16.msrb.mxu2 %v6048_v49  ;;  %v6032_v1 = vor.u32 %v6819_v53, %v6031_v52  ;;  %v33_v2 = vld [vmem:[%s10250_s0 + $0x60] sm:$0xff]  ;;  %v35_v3 = vld [vmem:[%s10250_s0 + $0x70] sm:$0xff]  ;;  %v4596_v29 = vor.u32 %v6457_v14, %v4593_v16 }
  0x82   :  { %3276 = vmatpush.bf16.msra.mxu3 %v4340_v42  ;;  %v7833_v17 = vpack.c.bf16 %v33_v2, %v33_v2  ;;  %v7835_v19 = vpack.c.bf16 %v35_v3, %v35_v3  ;;  %v4289_v20 = vld [vmem:[%s10249_s1 + $0x70] sm:$0xf0]  ;;  %v6377_v30 = vld [vmem:[%s10249_s1 + $0x44] sm:$0xf] }
  0x83   :  { %3230 = vmatpush.bf16.msrb.mxu0 %v5776_v60  ;;  %v4721_v24 = vld [vmem:[%s10249_s1 + $0x3d0] sm:$0xf0]  ;;  %v6421_v31 = vld [vmem:[%s10249_s1 + $0x1a4] sm:$0xf]  ;;  %v4292_v32 = vor.u32 %v6381_v7, %v4289_v20 }
  0x84   :  { %3243 = vmatpush.bf16.msrb.mxu1 %v5904_v0  ;;  %v4724_v33 = vor.u32 %v6489_v21, %v4721_v24  ;;  %v4449_v35 = vld [vmem:[%s10249_s1 + $0x1b0] sm:$0xf0]  ;;  %v6453_v36 = vld [vmem:[%s10249_s1 + $0x2a4] sm:$0xf] }
  0x85   :  { %3256 = vmatpush.bf16.msrb.mxu2 %v6032_v1  ;;  %v4577_v39 = vld [vmem:[%s10249_s1 + $0x2b0] sm:$0xf0]  ;;  %v4452_v45 = vor.u32 %v6421_v31, %v4449_v35  ;;  %v6373_v47 = vld [vmem:[%s10249_s1 + $0x24] sm:$0xf] }
  0x86   :  { %3277 = vmatpush.bf16.msra.mxu3 %v4324_v56  ;;  %3231 = vmatmul.bf16.vlgmr.msrb.gmra.mxu0 %v7833_v17  ;;  %v4273_v42 = vld [vmem:[%s10249_s1 + $0x50] sm:$0xf0]  ;;  %v4580_v46 = vor.u32 %v6453_v36, %v4577_v39  ;;  %v6417_v48 = vld [vmem:[%s10249_s1 + $0x184] sm:$0xf] }
  0x87   :  { %3288 = vmatpush.bf16.msra.mxu0 %v4484_v4  ;;  %v4705_v44 = vld [vmem:[%s10249_s1 + $0x3b0] sm:$0xf0]  ;;  %3244 = vmatmul.bf16.vlgmr.msrb.gmra.mxu1 %v7846_v26  ;;  %v4276_v49 = vor.u32 %v6377_v30, %v4273_v42  ;;  %v6449_v52 = vld [vmem:[%s10249_s1 + $0x284] sm:$0xf] }
  0x88   :  { %3301 = vmatpush.bf16.msra.mxu1 %v4612_v5  ;;  %3257 = vmatmul.bf16.vlgmr.msrb.gmra.mxu2 %v7835_v19  ;;  %v4708_v50 = vor.u32 %v6485_v43, %v4705_v44  ;;  %v4433_v51 = vld [vmem:[%s10249_s1 + $0x190] sm:$0xf0]  ;;  %v6481_v55 = vld [vmem:[%s10249_s1 + $0x384] sm:$0xf] }
  0x89   :  { %3314 = vmatpush.bf16.msra.mxu2 %v4740_v12  ;;  %v4561_v53 = vld [vmem:[%s10249_s1 + $0x290] sm:$0xf0]  ;;  %v4436_v57 = vor.u32 %v6417_v48, %v4433_v51  ;;  %v6369_v59 = vld [vmem:[%s10249_s1 + $0x4] sm:$0xf] }
  0x8a   :  { %3278 = vmatpush.bf16.msra.mxu3 %v4308_v11  ;;  %v4257_v54 = vld [vmem:[%s10249_s1 + $0x30] sm:$0xf0]  ;;  %v4564_v58 = vor.u32 %v6449_v52, %v4561_v53  ;;  %v6413_v60 = vld [vmem:[%s10249_s1 + $0x164] sm:$0xf] }
  0x8b   :  { %3289 = vmatpush.bf16.msra.mxu0 %v4468_v28  ;;  %v4689_v56 = vld [vmem:[%s10249_s1 + $0x390] sm:$0xf0]  ;;  %v4260_v61 = vor.u32 %v6373_v47, %v4257_v54  ;;  %v6445_v0 = vld [vmem:[%s10249_s1 + $0x264] sm:$0xf] }
  0x8c   :  { %3302 = vmatpush.bf16.msra.mxu1 %v4596_v29  ;;  %v4692_v62 = vor.u32 %v6481_v55, %v4689_v56  ;;  %v4417_v63 = vld [vmem:[%s10249_s1 + $0x170] sm:$0xf0]  ;;  %v6477_v3 = vld [vmem:[%s10249_s1 + $0x364] sm:$0xf] }
  0x8d   :  { %3315 = vmatpush.bf16.msra.mxu2 %v4724_v33  ;;  %v4545_v1 = vld [vmem:[%s10249_s1 + $0x270] sm:$0xf0]  ;;  %v6525_v5 = vld [vmem:[%s10249_s1 + $0x4e4] sm:$0xf]  ;;  %v4420_v7 = vor.u32 %v6413_v60, %v4417_v63 }
  0x8e   :  { %3279 = vmatpush.bf16.msra.mxu3 %v4292_v32  ;;  %v4241_v2 = vld [vmem:[%s10249_s1 + $0x10] sm:$0xf0]  ;;  %v4548_v10 = vor.u32 %v6445_v0, %v4545_v1  ;;  %v6409_v11 = vld [vmem:[%s10249_s1 + $0x144] sm:$0xf]  ;;  %v4868_v21 = vor.u32 %v6525_v5, %v4865_v6 }
  0x8f   :  { %3290 = vmatpush.bf16.msra.mxu0 %v4452_v45  ;;  %v4673_v4 = vld [vmem:[%s10249_s1 + $0x370] sm:$0xf0]  ;;  %v4244_v12 = vor.u32 %v6369_v59, %v4241_v2  ;;  %v6441_v16 = vld [vmem:[%s10249_s1 + $0x244] sm:$0xf] }
  0x90   :  { %3303 = vmatpush.bf16.msra.mxu1 %v4580_v46  ;;  %v4676_v13 = vor.u32 %v6477_v3, %v4673_v4  ;;  %v4401_v14 = vld [vmem:[%s10249_s1 + $0x150] sm:$0xf0]  ;;  %v6473_v24 = vld [vmem:[%s10249_s1 + $0x344] sm:$0xf] }
  0x91   :  { %3316 = vmatpush.bf16.msra.mxu2 %v4708_v50  ;;  %v4529_v20 = vld [vmem:[%s10249_s1 + $0x250] sm:$0xf0]  ;;  %v6521_v29 = vld [vmem:[%s10249_s1 + $0x4c4] sm:$0xf]  ;;  %v4404_v31 = vor.u32 %v6409_v11, %v4401_v14 }
  0x92   :  { %3280 = vmatpush.bf16.msra.mxu3 %v4276_v49  ;;  %v4657_v28 = vld [vmem:[%s10249_s1 + $0x350] sm:$0xf0]  ;;  %v4532_v32 = vor.u32 %v6441_v16, %v4529_v20  ;;  %v6405_v33 = vld [vmem:[%s10249_s1 + $0x124] sm:$0xf] }
  0x93   :  { %3291 = vmatpush.bf16.msra.mxu0 %v4436_v57  ;;  %v4849_v30 = vld [vmem:[%s10249_s1 + $0x4d0] sm:$0xf0]  ;;  %v4660_v35 = vor.u32 %v6473_v24, %v4657_v28  ;;  %v6437_v39 = vld [vmem:[%s10249_s1 + $0x224] sm:$0xf] }
  0x94   :  { %3304 = vmatpush.bf16.msra.mxu1 %v4564_v58  ;;  %v4385_v36 = vld [vmem:[%s10249_s1 + $0x130] sm:$0xf0]  ;;  %v4852_v43 = vor.u32 %v6521_v29, %v4849_v30  ;;  %v6469_v44 = vld [vmem:[%s10249_s1 + $0x324] sm:$0xf] }
  0x95   :  { %3317 = vmatpush.bf16.msra.mxu2 %v4692_v62  ;;  %v4513_v42 = vld [vmem:[%s10249_s1 + $0x230] sm:$0xf0]  ;;  %v6517_v46 = vld [vmem:[%s10249_s1 + $0x4a4] sm:$0xf]  ;;  %v4388_v48 = vor.u32 %v6405_v33, %v4385_v36 }
  0x96   :  { %3281 = vmatpush.bf16.msra.mxu3 %v4260_v61  ;;  %v4641_v45 = vld [vmem:[%s10249_s1 + $0x330] sm:$0xf0]  ;;  %v4516_v49 = vor.u32 %v6437_v39, %v4513_v42  ;;  %v6401_v50 = vld [vmem:[%s10249_s1 + $0x104] sm:$0xf] }
  0x97   :  { %3292 = vmatpush.bf16.msra.mxu0 %v4420_v7  ;;  %v4833_v47 = vld [vmem:[%s10249_s1 + $0x4b0] sm:$0xf0]  ;;  %v6433_v52 = vld [vmem:[%s10249_s1 + $0x204] sm:$0xf]  ;;  %v4644_v53 = vor.u32 %v6469_v44, %v4641_v45 }
  0x98   :  { %3305 = vmatpush.bf16.msra.mxu1 %v4548_v10  ;;  %v4369_v51 = vld [vmem:[%s10249_s1 + $0x110] sm:$0xf0]  ;;  %v6465_v55 = vld [vmem:[%s10249_s1 + $0x304] sm:$0xf]  ;;  %v4836_v57 = vor.u32 %v6517_v46, %v4833_v47 }
  0x99   :  { %3318 = vmatpush.bf16.msra.mxu2 %v4676_v13  ;;  %v4497_v54 = vld [vmem:[%s10249_s1 + $0x210] sm:$0xf0]  ;;  %v6513_v58 = vld [vmem:[%s10249_s1 + $0x484] sm:$0xf]  ;;  %v4372_v0 = vor.u32 %v6401_v50, %v4369_v51 }
  0x9a   :  { %3282 = vmatpush.bf16.msra.mxu3 %v4244_v12  ;;  %v4625_v56 = vld [vmem:[%s10249_s1 + $0x310] sm:$0xf0]  ;;  %v6557_v59 = vld [vmem:[%s10249_s1 + $0x5e4] sm:$0xf]  ;;  %v4500_v1 = vor.u32 %v6433_v52, %v4497_v54 }
  0x9b   :  { %3293 = vmatpush.bf16.msra.mxu0 %v4404_v31  ;;  %v4993_v60 = vld [vmem:[%s10249_s1 + $0x5f0] sm:$0xf0]  ;;  %v6589_v62 = vld [vmem:[%s10249_s1 + $0x6e4] sm:$0xf]  ;;  %v4628_v4 = vor.u32 %v6465_v55, %v4625_v56 }
  0x9c   :  { %3306 = vmatpush.bf16.msra.mxu1 %v4532_v32  ;;  %v4817_v61 = vld [vmem:[%s10249_s1 + $0x490] sm:$0xf0]  ;;  %v6621_v2 = vld [vmem:[%s10249_s1 + $0x7e4] sm:$0xf]  ;;  %v4996_v5 = vor.u32 %v6557_v59, %v4993_v60 }
  0x9d   :  { %3319 = vmatpush.bf16.msra.mxu2 %v4660_v35  ;;  %3283 = vmatmul.bf16.vlgmr.msra.gmra.mxu3 %v7219_v9  ;;  %v5121_v63 = vld [vmem:[%s10249_s1 + $0x6f0] sm:$0xf0]  ;;  %v4820_v6 = vor.u32 %v6513_v58, %v4817_v61  ;;  %v6509_v10 = vld [vmem:[%s10249_s1 + $0x464] sm:$0xf] }
  0x9e   :  { %3327 = vmatpush.bf16.msrb.mxu3 %v4868_v21  ;;  %v5249_v3 = vld [vmem:[%s10249_s1 + $0x7f0] sm:$0xf0]  ;;  %v5124_v7 = vor.u32 %v6589_v62, %v5121_v63  ;;  %v6553_v11 = vld [vmem:[%s10249_s1 + $0x5c4] sm:$0xf] }
  0x9f   :  { %3294 = vmatpush.bf16.msra.mxu0 %v4388_v48  ;;  %v4977_v12 = vld [vmem:[%s10249_s1 + $0x5d0] sm:$0xf0]  ;;  %v5252_v13 = vor.u32 %v6621_v2, %v5249_v3  ;;  %v6585_v16 = vld [vmem:[%s10249_s1 + $0x6c4] sm:$0xf] }
  0xa0   :  { %3307 = vmatpush.bf16.msra.mxu1 %v4516_v49  ;;  %v4801_v14 = vld [vmem:[%s10249_s1 + $0x470] sm:$0xf0]  ;;  %v6617_v21 = vld [vmem:[%s10249_s1 + $0x7c4] sm:$0xf]  ;;  %v4980_v28 = vor.u32 %v6553_v11, %v4977_v12 }
  0xa1   :  { %3320 = vmatpush.bf16.msra.mxu2 %v4644_v53  ;;  %v5105_v20 = vld [vmem:[%s10249_s1 + $0x6d0] sm:$0xf0]  ;;  %v4804_v29 = vor.u32 %v6509_v10, %v4801_v14  ;;  %v6505_v31 = vld [vmem:[%s10249_s1 + $0x444] sm:$0xf] }
  0xa2   :  { %3328 = vmatpush.bf16.msrb.mxu3 %v4852_v43  ;;  %v5233_v24 = vld [vmem:[%s10249_s1 + $0x7d0] sm:$0xf0]  ;;  %v5108_v30 = vor.u32 %v6585_v16, %v5105_v20  ;;  %v6549_v32 = vld [vmem:[%s10249_s1 + $0x5a4] sm:$0xf] }
  0xa3   :  { %3295 = vmatpush.bf16.msra.mxu0 %v4372_v0  ;;  %v4961_v33 = vld [vmem:[%s10249_s1 + $0x5b0] sm:$0xf0]  ;;  %v5236_v35 = vor.u32 %v6617_v21, %v5233_v24  ;;  %v6581_v39 = vld [vmem:[%s10249_s1 + $0x6a4] sm:$0xf] }
  0xa4   :  { %3308 = vmatpush.bf16.msra.mxu1 %v4500_v1  ;;  %v4785_v36 = vld [vmem:[%s10249_s1 + $0x450] sm:$0xf0]  ;;  %v6613_v43 = vld [vmem:[%s10249_s1 + $0x7a4] sm:$0xf]  ;;  %v4964_v45 = vor.u32 %v6549_v32, %v4961_v33 }
  0xa5   :  { %3321 = vmatpush.bf16.msra.mxu2 %v4628_v4  ;;  %v5089_v42 = vld [vmem:[%s10249_s1 + $0x6b0] sm:$0xf0]  ;;  %v4788_v46 = vor.u32 %v6505_v31, %v4785_v36  ;;  %v6501_v48 = vld [vmem:[%s10249_s1 + $0x424] sm:$0xf] }
  0xa6   :  { %3329 = vmatpush.bf16.msrb.mxu3 %v4836_v57  ;;  %3296 = vmatmul.bf16.vlgmr.msra.gmra.mxu0 %v7256_v25  ;;  %v5217_v44 = vld [vmem:[%s10249_s1 + $0x7b0] sm:$0xf0]  ;;  %v5092_v47 = vor.u32 %v6581_v39, %v5089_v42  ;;  %v6545_v49 = vld [vmem:[%s10249_s1 + $0x584] sm:$0xf]  ;;  %v553_v57 = vld [vmem:[%s10251_s2] sm:$0xf] }
  0xa7   :  { %3340 = vmatpush.bf16.msrb.mxu0 %v4996_v5  ;;  %3309 = vmatmul.bf16.vlgmr.msra.gmra.mxu1 %v7217_v8  ;;  %v4945_v50 = vld [vmem:[%s10249_s1 + $0x590] sm:$0xf0]  ;;  %v5220_v51 = vor.u32 %v6613_v43, %v5217_v44  ;;  %v6577_v53 = vld [vmem:[%s10249_s1 + $0x684] sm:$0xf]  ;;  %v555_v5 = vperm.slane %v553_v57, 0  ;;  %v3089_v44 = vpop.f32.mrf.mxu1 }
  0xa8   :  { %3353 = vmatpush.bf16.msrb.mxu1 %v5124_v7  ;;  %3322 = vmatmul.bf16.vlgmr.msra.gmra.mxu2 %v7233_v15  ;;  %v4769_v52 = vld [vmem:[%s10249_s1 + $0x430] sm:$0xf0]  ;;  %v6609_v55 = vld [vmem:[%s10249_s1 + $0x784] sm:$0xf]  ;;  %v4948_v58 = vor.u32 %v6545_v49, %v4945_v50 }
  0xa9   :  { %3366 = vmatpush.bf16.msrb.mxu2 %v5252_v13  ;;  %v5073_v54 = vld [vmem:[%s10249_s1 + $0x690] sm:$0xf0]  ;;  %v6497_v59 = vld [vmem:[%s10249_s1 + $0x404] sm:$0xf]  ;;  %v4772_v61 = vor.u32 %v6501_v48, %v4769_v52 }
  0xaa   :  { %3330 = vmatpush.bf16.msrb.mxu3 %v4820_v6  ;;  %v5201_v56 = vld [vmem:[%s10249_s1 + $0x790] sm:$0xf0]  ;;  %v5076_v62 = vor.u32 %v6577_v53, %v5073_v54  ;;  %v6541_v63 = vld [vmem:[%s10249_s1 + $0x564] sm:$0xf] }
  0xab   :  { %3341 = vmatpush.bf16.msrb.mxu0 %v4980_v28  ;;  %v4753_v60 = vld [vmem:[%s10249_s1 + $0x410] sm:$0xf0]  ;;  %v6573_v1 = vld [vmem:[%s10249_s1 + $0x664] sm:$0xf]  ;;  %v5204_v2 = vor.u32 %v6609_v55, %v5201_v56 }
  0xac   :  { %3354 = vmatpush.bf16.msrb.mxu1 %v5108_v30  ;;  %v4929_v0 = vld [vmem:[%s10249_s1 + $0x570] sm:$0xf0]  ;;  %v6605_v4 = vld [vmem:[%s10249_s1 + $0x764] sm:$0xf]  ;;  %v4756_v12 = vor.u32 %v6497_v59, %v4753_v60  ;;  %v3115_v59 = vpop.f32.mrf.mxu3 }
  0xad   :  { %3367 = vmatpush.bf16.msrb.mxu2 %v5236_v35  ;;  %v5057_v3 = vld [vmem:[%s10249_s1 + $0x670] sm:$0xf0]  ;;  %v6653_v7 = vld [vmem:[%s10249_s1 + $0x8e4] sm:$0xf]  ;;  %v4932_v11 = vor.u32 %v6541_v63, %v4929_v0 }
  0xae   :  { %3331 = vmatpush.bf16.msrb.mxu3 %v4804_v29  ;;  %v5185_v6 = vld [vmem:[%s10249_s1 + $0x770] sm:$0xf0]  ;;  %v5060_v13 = vor.u32 %v6573_v1, %v5057_v3  ;;  %v6537_v14 = vld [vmem:[%s10249_s1 + $0x544] sm:$0xf]  ;;  %v3076_v20 = vpop.f32.mrf.mxu0 }
  0xaf   :  { %3342 = vmatpush.bf16.msrb.mxu0 %v4964_v45  ;;  %v5377_v10 = vld [vmem:[%s10249_s1 + $0x8f0] sm:$0xf0]  ;;  %v5188_v21 = vor.u32 %v6605_v4, %v5185_v6  ;;  %v6569_v28 = vld [vmem:[%s10249_s1 + $0x644] sm:$0xf]  ;;  %v3077_v31 = vadd.f32 %v3076_v20, %v555_v5 }
  0xb0   :  { %3355 = vmatpush.bf16.msrb.mxu1 %v5092_v47  ;;  %v4913_v16 = vld [vmem:[%s10249_s1 + $0x550] sm:$0xf0]  ;;  %v5380_v24 = vor.u32 %v6653_v7, %v5377_v10  ;;  %v6601_v30 = vld [vmem:[%s10249_s1 + $0x744] sm:$0xf] }
  0xb1   :  { %3368 = vmatpush.bf16.msrb.mxu2 %v5220_v51  ;;  %v5041_v29 = vld [vmem:[%s10249_s1 + $0x650] sm:$0xf0]  ;;  %v6649_v33 = vld [vmem:[%s10249_s1 + $0x8c4] sm:$0xf]  ;;  %v4916_v36 = vor.u32 %v6537_v14, %v4913_v16  ;;  %v3090_v50 = vadd.f32 %v3089_v44, %v3077_v31 }
  0xb2   :  { %3332 = vmatpush.bf16.msrb.mxu3 %v4788_v46  ;;  %v5169_v32 = vld [vmem:[%s10249_s1 + $0x750] sm:$0xf0]  ;;  %v5044_v39 = vor.u32 %v6569_v28, %v5041_v29  ;;  %v6533_v42 = vld [vmem:[%s10249_s1 + $0x524] sm:$0xf] }
  0xb3   :  { %3343 = vmatpush.bf16.msrb.mxu0 %v4948_v58  ;;  %v5361_v35 = vld [vmem:[%s10249_s1 + $0x8d0] sm:$0xf0]  ;;  %v5172_v45 = vor.u32 %v6601_v30, %v5169_v32  ;;  %v6565_v47 = vld [vmem:[%s10249_s1 + $0x624] sm:$0xf]  ;;  %v3102_v54 = vpop.f32.mrf.mxu2 }
  0xb4   :  { %3356 = vmatpush.bf16.msrb.mxu1 %v5076_v62  ;;  %v4897_v43 = vld [vmem:[%s10249_s1 + $0x530] sm:$0xf0]  ;;  %v5364_v46 = vor.u32 %v6649_v33, %v5361_v35  ;;  %v6597_v49 = vld [vmem:[%s10249_s1 + $0x724] sm:$0xf]  ;;  %v3103_v58 = vadd.f32 %v3102_v54, %v3090_v50 }
  0xb5   :  { %3369 = vmatpush.bf16.msrb.mxu2 %v5204_v2  ;;  %v5025_v48 = vld [vmem:[%s10249_s1 + $0x630] sm:$0xf0]  ;;  %v6645_v52 = vld [vmem:[%s10249_s1 + $0x8a4] sm:$0xf]  ;;  %v4900_v55 = vor.u32 %v6533_v42, %v4897_v43 }
  0xb6   :  { %3333 = vmatpush.bf16.msrb.mxu3 %v4772_v61  ;;  %v5153_v51 = vld [vmem:[%s10249_s1 + $0x730] sm:$0xf0]  ;;  %v6529_v56 = vld [vmem:[%s10249_s1 + $0x504] sm:$0xf]  ;;  %v5028_v60 = vor.u32 %v6565_v47, %v5025_v48  ;;  %v3078_v0 = vpop.f32.mrf.mxu0  ;;  %v8201_v6 = vadd.f32 %v3115_v59, %v3103_v58 }
  0xb7   :  { %3344 = vmatpush.bf16.msrb.mxu0 %v4932_v11  ;;  %v5345_v53 = vld [vmem:[%s10249_s1 + $0x8b0] sm:$0xf0]  ;;  %v6561_v61 = vld [vmem:[%s10249_s1 + $0x604] sm:$0xf]  ;;  %v5156_v1 = vor.u32 %v6597_v49, %v5153_v51 }
  0xb8   :  { %3357 = vmatpush.bf16.msrb.mxu1 %v5060_v13  ;;  %v4881_v57 = vld [vmem:[%s10249_s1 + $0x510] sm:$0xf0]  ;;  %v6593_v63 = vld [vmem:[%s10249_s1 + $0x704] sm:$0xf]  ;;  %v5348_v2 = vor.u32 %v6645_v52, %v5345_v53 }
  0xb9   :  { %3370 = vmatpush.bf16.msrb.mxu2 %v5188_v21  ;;  %v5009_v62 = vld [vmem:[%s10249_s1 + $0x610] sm:$0xf0]  ;;  %v6685_v4 = vld [vmem:[%s10249_s1 + $0x9e4] sm:$0xf] }
  0xba   :  { %3334 = vmatpush.bf16.msrb.mxu3 %v4756_v12  ;;  %v5137_v3 = vld [vmem:[%s10249_s1 + $0x710] sm:$0xf0]  ;;  %v6641_v7 = vld [vmem:[%s10249_s1 + $0x884] sm:$0xf]  ;;  %v4884_v12 = vor.u32 %v6529_v56, %v4881_v57  ;;  %v5012_v20 = vor.u32 %v6561_v61, %v5009_v62 }
  0xbb   :  { %3345 = vmatpush.bf16.msrb.mxu0 %v4916_v36  ;;  %v5505_v5 = vld [vmem:[%s10249_s1 + $0x9f0] sm:$0xf0]  ;;  %v6717_v11 = vld [vmem:[%s10249_s1 + $0xae4] sm:$0xf]  ;;  %v5140_v28 = vor.u32 %v6593_v63, %v5137_v3  ;;  %v3104_v42 = vpop.f32.mrf.mxu2 }
  0xbc   :  { %3358 = vmatpush.bf16.msrb.mxu1 %v5044_v39  ;;  %v5329_v10 = vld [vmem:[%s10249_s1 + $0x890] sm:$0xf0]  ;;  %v6749_v14 = vld [vmem:[%s10249_s1 + $0xbe4] sm:$0xf]  ;;  %v5508_v21 = vor.u32 %v6685_v4, %v5505_v5 }
  0xbd   :  { %3335 = vmatmul.bf16.vlgmr.msrb.gmra.mxu3 %v7408_v37  ;;  %3371 = vmatpush.bf16.msrb.mxu2 %v5172_v45  ;;  %v5633_v13 = vld [vmem:[%s10249_s1 + $0xaf0] sm:$0xf0]  ;;  %v5332_v29 = vor.u32 %v6641_v7, %v5329_v10  ;;  %v6681_v30 = vld [vmem:[%s10249_s1 + $0x9c4] sm:$0xf] }
  0xbe   :  { %3379 = vmatpush.bf16.msra.mxu3 %v5380_v24  ;;  %v5761_v16 = vld [vmem:[%s10249_s1 + $0xbf0] sm:$0xf0]  ;;  %v3091_v24 = vpop.f32.mrf.mxu1  ;;  %v5636_v32 = vor.u32 %v6717_v11, %v5633_v13  ;;  %v6637_v35 = vld [vmem:[%s10249_s1 + $0x864] sm:$0xf] }
  0xbf   :  { %3346 = vmatpush.bf16.msrb.mxu0 %v4900_v55  ;;  %v5489_v31 = vld [vmem:[%s10249_s1 + $0x9d0] sm:$0xf0]  ;;  %v5764_v33 = vor.u32 %v6749_v14, %v5761_v16  ;;  %v6713_v39 = vld [vmem:[%s10249_s1 + $0xac4] sm:$0xf] }
  0xc0   :  { %3359 = vmatpush.bf16.msrb.mxu1 %v5028_v60  ;;  %v5313_v36 = vld [vmem:[%s10249_s1 + $0x870] sm:$0xf0]  ;;  %v6745_v44 = vld [vmem:[%s10249_s1 + $0xbc4] sm:$0xf]  ;;  %v5492_v47 = vor.u32 %v6681_v30, %v5489_v31 }
  0xc1   :  { %3372 = vmatpush.bf16.msrb.mxu2 %v5156_v1  ;;  %v5617_v43 = vld [vmem:[%s10249_s1 + $0xad0] sm:$0xf0]  ;;  %v5316_v48 = vor.u32 %v6637_v35, %v5313_v36  ;;  %v6677_v49 = vld [vmem:[%s10249_s1 + $0x9a4] sm:$0xf] }
  0xc2   :  { %3380 = vmatpush.bf16.msra.mxu3 %v5364_v46  ;;  %v5745_v45 = vld [vmem:[%s10249_s1 + $0xbd0] sm:$0xf0]  ;;  %v3117_v46 = vpop.f32.mrf.mxu3  ;;  %v5620_v51 = vor.u32 %v6713_v39, %v5617_v43  ;;  %v6633_v53 = vld [vmem:[%s10249_s1 + $0x844] sm:$0xf] }
  0xc3   :  { %3347 = vmatpush.bf16.msrb.mxu0 %v4884_v12  ;;  %v5473_v50 = vld [vmem:[%s10249_s1 + $0x9b0] sm:$0xf0]  ;;  %v5748_v52 = vor.u32 %v6745_v44, %v5745_v45  ;;  %v6709_v55 = vld [vmem:[%s10249_s1 + $0xaa4] sm:$0xf] }
  0xc4   :  { %3360 = vmatpush.bf16.msrb.mxu1 %v5012_v20  ;;  %v5297_v54 = vld [vmem:[%s10249_s1 + $0x850] sm:$0xf0]  ;;  %v6741_v57 = vld [vmem:[%s10249_s1 + $0xba4] sm:$0xf]  ;;  %v5476_v59 = vor.u32 %v6677_v49, %v5473_v50 }
  0xc5   :  { %3373 = vmatpush.bf16.msrb.mxu2 %v5140_v28  ;;  %v5601_v56 = vld [vmem:[%s10249_s1 + $0xab0] sm:$0xf0]  ;;  %v5300_v60 = vor.u32 %v6633_v53, %v5297_v54  ;;  %v6673_v61 = vld [vmem:[%s10249_s1 + $0x984] sm:$0xf] }
  0xc6   :  { %3381 = vmatpush.bf16.msra.mxu3 %v5348_v2  ;;  %3348 = vmatmul.bf16.vlgmr.msrb.gmra.mxu0 %v7412_v40  ;;  %v5729_v58 = vld [vmem:[%s10249_s1 + $0xbb0] sm:$0xf0]  ;;  %v5604_v63 = vor.u32 %v6709_v55, %v5601_v56  ;;  %v6629_v1 = vld [vmem:[%s10249_s1 + $0x824] sm:$0xf] }
  0xc7   :  { %3392 = vmatpush.bf16.msra.mxu0 %v5508_v21  ;;  %3361 = vmatmul.bf16.vlgmr.msrb.gmra.mxu1 %v7400_v34  ;;  %v5457_v62 = vld [vmem:[%s10249_s1 + $0x990] sm:$0xf0]  ;;  %v5732_v0 = vor.u32 %v6741_v57, %v5729_v58  ;;  %v6705_v3 = vld [vmem:[%s10249_s1 + $0xa84] sm:$0xf]  ;;  %v3128_v28 = vpop.f32.mrf.mxu0 }
  0xc8   :  { %3405 = vmatpush.bf16.msra.mxu1 %v5636_v32  ;;  %3374 = vmatmul.bf16.vlgmr.msrb.gmra.mxu2 %v7410_v38  ;;  %v5281_v2 = vld [vmem:[%s10249_s1 + $0x830] sm:$0xf0]  ;;  %v6737_v5 = vld [vmem:[%s10249_s1 + $0xb84] sm:$0xf]  ;;  %v5460_v10 = vor.u32 %v6673_v61, %v5457_v62  ;;  %v3129_v32 = vadd.f32 %v3128_v28, %v8201_v6 }
  0xc9   :  { %3418 = vmatpush.bf16.msra.mxu2 %v5764_v33  ;;  %v5585_v4 = vld [vmem:[%s10249_s1 + $0xa90] sm:$0xf0]  ;;  %v5284_v11 = vor.u32 %v6629_v1, %v5281_v2  ;;  %v6669_v12 = vld [vmem:[%s10249_s1 + $0x964] sm:$0xf]  ;;  %v3141_v33 = vpop.f32.mrf.mxu1 }
  0xca   :  { %3382 = vmatpush.bf16.msra.mxu3 %v5332_v29  ;;  %v5713_v7 = vld [vmem:[%s10249_s1 + $0xb90] sm:$0xf0]  ;;  %v5588_v14 = vor.u32 %v6705_v3, %v5585_v4  ;;  %v6625_v20 = vld [vmem:[%s10249_s1 + $0x804] sm:$0xf]  ;;  %v3142_v44 = vadd.f32 %v3141_v33, %v3129_v32  ;;  %v3167_v57 = vpop.f32.mrf.mxu3 }
  0xcb   :  { %3393 = vmatpush.bf16.msra.mxu0 %v5492_v47  ;;  %v5441_v13 = vld [vmem:[%s10249_s1 + $0x970] sm:$0xf0]  ;;  %v5716_v16 = vor.u32 %v6737_v5, %v5713_v7  ;;  %v6701_v24 = vld [vmem:[%s10249_s1 + $0xa64] sm:$0xf] }
  0xcc   :  { %3406 = vmatpush.bf16.msra.mxu1 %v5620_v51  ;;  %v5265_v21 = vld [vmem:[%s10249_s1 + $0x810] sm:$0xf0]  ;;  %v6733_v30 = vld [vmem:[%s10249_s1 + $0xb64] sm:$0xf]  ;;  %v5444_v35 = vor.u32 %v6669_v12, %v5441_v13 }
  0xcd   :  { %3419 = vmatpush.bf16.msra.mxu2 %v5748_v52  ;;  %v5569_v29 = vld [vmem:[%s10249_s1 + $0xa70] sm:$0xf0]  ;;  %v6781_v36 = vld [vmem:[%s10249_s1 + $0xce4] sm:$0xf]  ;;  %v5268_v42 = vor.u32 %v6625_v20, %v5265_v21  ;;  %v3154_v52 = vpop.f32.mrf.mxu2 }
  0xce   :  { %3383 = vmatpush.bf16.msra.mxu3 %v5316_v48  ;;  %v5697_v31 = vld [vmem:[%s10249_s1 + $0xb70] sm:$0xf0]  ;;  %v6665_v43 = vld [vmem:[%s10249_s1 + $0x944] sm:$0xf]  ;;  %v5572_v45 = vor.u32 %v6701_v24, %v5569_v29  ;;  %v3155_v56 = vadd.f32 %v3154_v52, %v3142_v44 }
  0xcf   :  { %3394 = vmatpush.bf16.msra.mxu0 %v5476_v59  ;;  %v5889_v39 = vld [vmem:[%s10249_s1 + $0xcf0] sm:$0xf0]  ;;  %v5700_v46 = vor.u32 %v6733_v30, %v5697_v31  ;;  %v6697_v47 = vld [vmem:[%s10249_s1 + $0xa44] sm:$0xf] }
  0xd0   :  { %3407 = vmatpush.bf16.msra.mxu1 %v5604_v63  ;;  %v5425_v6 = vld [vmem:[%s10249_s1 + $0x950] sm:$0xf0]  ;;  %v5892_v48 = vor.u32 %v6781_v36, %v5889_v39  ;;  %v6729_v50 = vld [vmem:[%s10249_s1 + $0xb44] sm:$0xf]  ;;  %v8360_v63 = vadd.f32 %v3167_v57, %v3155_v56 }
  0xd1   :  { %3420 = vmatpush.bf16.msra.mxu2 %v5732_v0  ;;  %v5553_v49 = vld [vmem:[%s10249_s1 + $0xa50] sm:$0xf0]  ;;  %v5428_v53 = vor.u32 %v6665_v43, %v5425_v6  ;;  %v6777_v54 = vld [vmem:[%s10249_s1 + $0xcc4] sm:$0xf]  ;;  %v3130_v0 = vpop.f32.mrf.mxu0  ;;  %v3143_v5 = vpop.f32.mrf.mxu1 }
  0xd2   :  { %3384 = vmatpush.bf16.msra.mxu3 %v5300_v60  ;;  %v5681_v51 = vld [vmem:[%s10249_s1 + $0xb50] sm:$0xf0]  ;;  %v6661_v58 = vld [vmem:[%s10249_s1 + $0x924] sm:$0xf]  ;;  %v5556_v60 = vor.u32 %v6697_v47, %v5553_v49  ;;  %v3169_v43 = vpop.f32.mrf.mxu3 }
  0xd3   :  { %3395 = vmatpush.bf16.msra.mxu0 %v5460_v10  ;;  %v5873_v55 = vld [vmem:[%s10249_s1 + $0xcd0] sm:$0xf0]  ;;  %v5684_v61 = vor.u32 %v6729_v50, %v5681_v51  ;;  %v6693_v62 = vld [vmem:[%s10249_s1 + $0xa24] sm:$0xf] }
  0xd4   :  { %3408 = vmatpush.bf16.msra.mxu1 %v5588_v14  ;;  %v5409_v59 = vld [vmem:[%s10249_s1 + $0x930] sm:$0xf0]  ;;  %v5876_v1 = vor.u32 %v6777_v54, %v5873_v55  ;;  %v6725_v3 = vld [vmem:[%s10249_s1 + $0xb24] sm:$0xf] }
  0xd5   :  { %3421 = vmatpush.bf16.msra.mxu2 %v5716_v16  ;;  %v5537_v2 = vld [vmem:[%s10249_s1 + $0xa30] sm:$0xf0]  ;;  %v5412_v7 = vor.u32 %v6661_v58, %v5409_v59  ;;  %v6773_v10 = vld [vmem:[%s10249_s1 + $0xca4] sm:$0xf]  ;;  %v3156_v33 = vpop.f32.mrf.mxu2 }
  0xd6   :  { %3385 = vmatpush.bf16.msra.mxu3 %v5284_v11  ;;  %v5665_v4 = vld [vmem:[%s10249_s1 + $0xb30] sm:$0xf0]  ;;  %v6657_v12 = vld [vmem:[%s10249_s1 + $0x904] sm:$0xf]  ;;  %v5540_v16 = vor.u32 %v6693_v62, %v5537_v2 }
  0xd7   :  { %3396 = vmatpush.bf16.msra.mxu0 %v5444_v35  ;;  %v5857_v11 = vld [vmem:[%s10249_s1 + $0xcb0] sm:$0xf0]  ;;  %v6689_v14 = vld [vmem:[%s10249_s1 + $0xa04] sm:$0xf]  ;;  %v5668_v20 = vor.u32 %v6725_v3, %v5665_v4 }
  0xd8   :  { %3409 = vmatpush.bf16.msra.mxu1 %v5572_v45  ;;  %v5393_v13 = vld [vmem:[%s10249_s1 + $0x910] sm:$0xf0]  ;;  %v6813_v24 = vld [vmem:[%s10249_s1 + $0xde4] sm:$0xf]  ;;  %v5860_v29 = vor.u32 %v6773_v10, %v5857_v11 }
  0xd9   :  { %3422 = vmatpush.bf16.msra.mxu2 %v5700_v46  ;;  %v5521_v21 = vld [vmem:[%s10249_s1 + $0xa10] sm:$0xf0]  ;;  %v6721_v30 = vld [vmem:[%s10249_s1 + $0xb04] sm:$0xf]  ;;  %v5396_v35 = vor.u32 %v6657_v12, %v5393_v13 }
  0xda   :  { %3386 = vmatpush.bf16.msra.mxu3 %v5268_v42  ;;  %v6017_v28 = vld [vmem:[%s10249_s1 + $0xdf0] sm:$0xf0]  ;;  %v6769_v32 = vld [vmem:[%s10249_s1 + $0xc84] sm:$0xf]  ;;  %v5524_v46 = vor.u32 %v6689_v14, %v5521_v21 }
  0xdb   :  { %3397 = vmatpush.bf16.msra.mxu0 %v5428_v53  ;;  %v5649_v31 = vld [vmem:[%s10249_s1 + $0xb10] sm:$0xf0]  ;;  %v6845_v39 = vld [vmem:[%s10249_s1 + $0xee4] sm:$0xf]  ;;  %v6020_v6 = vor.u32 %v6813_v24, %v6017_v28 }
  0xdc   :  { %3410 = vmatpush.bf16.msra.mxu1 %v5556_v60  ;;  %v5841_v36 = vld [vmem:[%s10249_s1 + $0xc90] sm:$0xf0]  ;;  %v6865_v44 = vld [vmem:[%s10249_s1 + $0xf84] sm:$0xf]  ;;  %v5652_v47 = vor.u32 %v6721_v30, %v5649_v31 }
  0xdd   :  { %3387 = vmatmul.bf16.vlgmr.msra.gmra.mxu3 %v7607_v18  ;;  %3423 = vmatpush.bf16.msra.mxu2 %v5684_v61  ;;  %v6145_v42 = vld [vmem:[%s10249_s1 + $0xef0] sm:$0xf0]  ;;  %v6765_v50 = vld [vmem:[%s10249_s1 + $0xc64] sm:$0xf] }
  0xde   :  { %3431 = vmatpush.bf16.msrb.mxu3 %v5892_v48  ;;  %v6225_v45 = vld [vmem:[%s10249_s1 + $0xf90] sm:$0xf0]  ;;  %v5844_v48 = vor.u32 %v6769_v32, %v5841_v36  ;;  %v6148_v49 = vor.u32 %v6845_v39, %v6145_v42  ;;  %v6809_v51 = vld [vmem:[%s10249_s1 + $0xdc4] sm:$0xf] }
  0xdf   :  { %3398 = vmatpush.bf16.msra.mxu0 %v5412_v7  ;;  %v6001_v52 = vld [vmem:[%s10249_s1 + $0xdd0] sm:$0xf0]  ;;  %v6228_v53 = vor.u32 %v6865_v44, %v6225_v45  ;;  %v6841_v55 = vld [vmem:[%s10249_s1 + $0xec4] sm:$0xf] }
  0xe0   :  { %3411 = vmatpush.bf16.msra.mxu1 %v5540_v16  ;;  %v5825_v54 = vld [vmem:[%s10249_s1 + $0xc70] sm:$0xf0]  ;;  %v6861_v57 = vld [vmem:[%s10249_s1 + $0xf64] sm:$0xf]  ;;  %v6004_v59 = vor.u32 %v6809_v51, %v6001_v52  ;;  %v6432_v51 = vld [vmem:[%s10249_s1 + $0x1f4] sm:$0xf0] }
  0xe1   :  { %3424 = vmatpush.bf16.msra.mxu2 %v5668_v20  ;;  %v6129_v56 = vld [vmem:[%s10249_s1 + $0xed0] sm:$0xf0]  ;;  %v5828_v60 = vor.u32 %v6765_v50, %v5825_v54  ;;  %v6761_v62 = vld [vmem:[%s10249_s1 + $0xc44] sm:$0xf]  ;;  %v4359_v54 = vld [vmem:[%s10249_s1 + $0xe8] sm:$0xf] }
  0xe2   :  { %3432 = vmatpush.bf16.msrb.mxu3 %v5876_v1  ;;  %v6209_v58 = vld [vmem:[%s10249_s1 + $0xf70] sm:$0xf0]  ;;  %v6132_v61 = vor.u32 %v6841_v55, %v6129_v56  ;;  %v6805_v0 = vld [vmem:[%s10249_s1 + $0xda4] sm:$0xf]  ;;  %v6400_v55 = vld [vmem:[%s10249_s1 + $0xf4] sm:$0xf0] }
  0xe3   :  { %3399 = vmatpush.bf16.msra.mxu0 %v5396_v35  ;;  %v5985_v1 = vld [vmem:[%s10249_s1 + $0xdb0] sm:$0xf0]  ;;  %v6212_v2 = vor.u32 %v6861_v57, %v6209_v58  ;;  %v6837_v4 = vld [vmem:[%s10249_s1 + $0xea4] sm:$0xf] }
  0xe4   :  { %3412 = vmatpush.bf16.msra.mxu1 %v5524_v46  ;;  %v5809_v3 = vld [vmem:[%s10249_s1 + $0xc50] sm:$0xf0]  ;;  %v6857_v7 = vld [vmem:[%s10249_s1 + $0xf44] sm:$0xf]  ;;  %v5988_v11 = vor.u32 %v6805_v0, %v5985_v1  ;;  %v3193_v46 = vpop.f32.mrf.mxu1  ;;  %v4360_v1 = vor.u32 %v6400_v55, %v4359_v54  ;;  %v4311_v54 = vld [vmem:[%s10249_s1 + $0x88] sm:$0xf] }
  0xe5   :  { %3425 = vmatpush.bf16.msra.mxu2 %v5652_v47  ;;  %v6113_v5 = vld [vmem:[%s10249_s1 + $0xeb0] sm:$0xf0]  ;;  %v5812_v12 = vor.u32 %v6761_v62, %v5809_v3  ;;  %v6757_v14 = vld [vmem:[%s10249_s1 + $0xc24] sm:$0xf]  ;;  %v6428_v3 = vld [vmem:[%s10249_s1 + $0x1d4] sm:$0xf0] }
  0xe6   :  { %3433 = vmatpush.bf16.msrb.mxu3 %v5860_v29  ;;  %3400 = vmatmul.bf16.vlgmr.msra.gmra.mxu0 %v7620_v23  ;;  %v6193_v10 = vld [vmem:[%s10249_s1 + $0xf50] sm:$0xf0]  ;;  %v6116_v13 = vor.u32 %v6837_v4, %v6113_v5  ;;  %v6801_v16 = vld [vmem:[%s10249_s1 + $0xd84] sm:$0xf]  ;;  %v6388_v55 = vld [vmem:[%s10249_s1 + $0x94] sm:$0xf0] }
  0xe7   :  { %3444 = vmatpush.bf16.msrb.mxu0 %v6020_v6  ;;  %3413 = vmatmul.bf16.vlgmr.msra.gmra.mxu1 %v7618_v22  ;;  %v5969_v20 = vld [vmem:[%s10249_s1 + $0xd90] sm:$0xf0]  ;;  %v6196_v21 = vor.u32 %v6857_v7, %v6193_v10  ;;  %v6833_v28 = vld [vmem:[%s10249_s1 + $0xe84] sm:$0xf]  ;;  %v3180_v35 = vpop.f32.mrf.mxu0  ;;  %v4343_v7 = vld [vmem:[%s10249_s1 + $0xc8] sm:$0xf] }
  0xe8   :  { %3457 = vmatpush.bf16.msrb.mxu1 %v6148_v49  ;;  %3426 = vmatmul.bf16.vlgmr.msra.gmra.mxu2 %v7628_v27  ;;  %v5793_v24 = vld [vmem:[%s10249_s1 + $0xc30] sm:$0xf0]  ;;  %v6853_v30 = vld [vmem:[%s10249_s1 + $0xf24] sm:$0xf]  ;;  %v5972_v32 = vor.u32 %v6801_v16, %v5969_v20  ;;  %v3181_v44 = vadd.f32 %v3180_v35, %v8360_v63  ;;  %v4487_v63 = vld [vmem:[%s10249_s1 + $0x1e8] sm:$0xf] }
  0xe9   :  { %3473 = vmatpush.bf16.msrb.mxu2 %v6228_v53  ;;  %v6097_v29 = vld [vmem:[%s10249_s1 + $0xe90] sm:$0xf0]  ;;  %v6753_v33 = vld [vmem:[%s10249_s1 + $0xc04] sm:$0xf]  ;;  %v5796_v36 = vor.u32 %v6757_v14, %v5793_v24  ;;  %v6396_v10 = vld [vmem:[%s10249_s1 + $0xd4] sm:$0xf0] }
  0xea   :  { %3434 = vmatpush.bf16.msrb.mxu3 %v5844_v48  ;;  %v6177_v31 = vld [vmem:[%s10249_s1 + $0xf30] sm:$0xf0]  ;;  %v6100_v39 = vor.u32 %v6833_v28, %v6097_v29  ;;  %v6797_v43 = vld [vmem:[%s10249_s1 + $0xd64] sm:$0xf]  ;;  %v3194_v52 = vadd.f32 %v3193_v46, %v3181_v44 }
  0xeb   :  { %3445 = vmatpush.bf16.msrb.mxu0 %v6004_v59  ;;  %v5777_v42 = vld [vmem:[%s10249_s1 + $0xc10] sm:$0xf0]  ;;  %v6180_v45 = vor.u32 %v6853_v30, %v6177_v31  ;;  %v6829_v47 = vld [vmem:[%s10249_s1 + $0xe64] sm:$0xf]  ;;  %v4344_v31 = vor.u32 %v6396_v10, %v4343_v7  ;;  %v4295_v7 = vld [vmem:[%s10249_s1 + $0x68] sm:$0xf] }
  0xec   :  { %3458 = vmatpush.bf16.msrb.mxu1 %v6132_v61  ;;  %v5953_v6 = vld [vmem:[%s10249_s1 + $0xd70] sm:$0xf0]  ;;  %v6849_v49 = vld [vmem:[%s10249_s1 + $0xf04] sm:$0xf]  ;;  %v5780_v56 = vor.u32 %v6753_v33, %v5777_v42  ;;  %v4488_v61 = vor.u32 %v6432_v51, %v4487_v63  ;;  %v3195_v29 = vpop.f32.mrf.mxu1  ;;  %v6424_v33 = vld [vmem:[%s10249_s1 + $0x1b4] sm:$0xf0] }
  0xed   :  { %3474 = vmatpush.bf16.msrb.mxu2 %v6212_v2  ;;  %v6081_v48 = vld [vmem:[%s10249_s1 + $0xe70] sm:$0xf0]  ;;  %v5956_v53 = vor.u32 %v6797_v43, %v5953_v6  ;;  %v6793_v58 = vld [vmem:[%s10249_s1 + $0xd44] sm:$0xf]  ;;  %v4471_v2 = vld [vmem:[%s10249_s1 + $0x1c8] sm:$0xf]  ;;  %v3206_v4 = vpop.f32.mrf.mxu2 }
  0xee   :  { %3435 = vmatpush.bf16.msrb.mxu3 %v5828_v60  ;;  %v6161_v50 = vld [vmem:[%s10249_s1 + $0xf10] sm:$0xf0]  ;;  %v6084_v57 = vor.u32 %v6829_v47, %v6081_v48  ;;  %v6825_v62 = vld [vmem:[%s10249_s1 + $0xe44] sm:$0xf]  ;;  %v4439_v47 = vld [vmem:[%s10249_s1 + $0x188] sm:$0xf] }
  0xef   :  { %3446 = vmatpush.bf16.msrb.mxu0 %v5988_v11  ;;  %v5937_v59 = vld [vmem:[%s10249_s1 + $0xd50] sm:$0xf0]  ;;  %v6164_v60 = vor.u32 %v6849_v49, %v6161_v50  ;;  %v3207_v11 = vadd.f32 %v3206_v4, %v3194_v52  ;;  %v6789_v14 = vld [vmem:[%s10249_s1 + $0xd24] sm:$0xf]  ;;  %v3182_v20 = vpop.f32.mrf.mxu0  ;;  %v4615_v48 = vld [vmem:[%s10249_s1 + $0x2e8] sm:$0xf] }
  0xf0   :  { %3459 = vmatpush.bf16.msrb.mxu1 %v6116_v13  ;;  %v6065_v0 = vld [vmem:[%s10249_s1 + $0xe50] sm:$0xf0]  ;;  %v5940_v5 = vor.u32 %v6793_v58, %v5937_v59  ;;  %v6821_v24 = vld [vmem:[%s10249_s1 + $0xe24] sm:$0xf]  ;;  %v6464_v49 = vld [vmem:[%s10249_s1 + $0x2f4] sm:$0xf0] }
  0xf1   :  { %3475 = vmatpush.bf16.msrb.mxu2 %v6196_v21  ;;  %v6068_v13 = vor.u32 %v6825_v62, %v6065_v0  ;;  %v5921_v16 = vld [vmem:[%s10249_s1 + $0xd30] sm:$0xf0]  ;;  %v4472_v21 = vor.u32 %v6428_v3, %v4471_v2  ;;  %v6785_v42 = vld [vmem:[%s10249_s1 + $0xd04] sm:$0xf]  ;;  %v6420_v63 = vld [vmem:[%s10249_s1 + $0x194] sm:$0xf0]  ;;  %v4616_v58 = vor.u32 %v6464_v49, %v4615_v48  ;;  %v4312_v2 = vor.u32 %v6388_v55, %v4311_v54 }
  0xf2   :  { %3436 = vmatpush.bf16.msrb.mxu3 %v5812_v12  ;;  %v3219_v12 = vpop.f32.mrf.mxu3  ;;  %v6049_v28 = vld [vmem:[%s10249_s1 + $0xe30] sm:$0xf0]  ;;  %v5924_v35 = vor.u32 %v6789_v14, %v5921_v16  ;;  %v6817_v44 = vld [vmem:[%s10249_s1 + $0xe04] sm:$0xf]  ;;  %v4743_v51 = vld [vmem:[%s10249_s1 + $0x3e8] sm:$0xf] }
  0xf3   :  { %3447 = vmatpush.bf16.msrb.mxu0 %v5972_v32  ;;  %v8568_v30 = vadd.f32 %v3219_v12, %v3207_v11  ;;  %v4455_v32 = vld [vmem:[%s10249_s1 + $0x1a8] sm:$0xf]  ;;  %v6052_v43 = vor.u32 %v6821_v24, %v6049_v28  ;;  %v5905_v6 = vld [vmem:[%s10249_s1 + $0xd10] sm:$0xf0]  ;;  %v6496_v52 = vld [vmem:[%s10249_s1 + $0x3f4] sm:$0xf0] }
  0xf4   :  { %3460 = vmatpush.bf16.msrb.mxu1 %v6100_v39  ;;  %v6392_v39 = vld [vmem:[%s10249_s1 + $0xb4] sm:$0xf0]  ;;  %v4456_v46 = vor.u32 %v6424_v33, %v4455_v32  ;;  %v4423_v62 = vld [vmem:[%s10249_s1 + $0x168] sm:$0xf] }
  0xf5   :  { %3476 = vmatpush.bf16.msrb.mxu2 %v6180_v45  ;;  %v6033_v45 = vld [vmem:[%s10249_s1 + $0xe10] sm:$0xf0]  ;;  %v4599_v0 = vld [vmem:[%s10249_s1 + $0x2c8] sm:$0xf]  ;;  %v6416_v3 = vld [vmem:[%s10249_s1 + $0x174] sm:$0xf0] }
  0xf6   :  { %3437 = vmatpush.bf16.msrb.mxu3 %v5796_v36  ;;  %v4327_v36 = vld [vmem:[%s10249_s1 + $0xa8] sm:$0xf]  ;;  %v6384_v10 = vld [vmem:[%s10249_s1 + $0x74] sm:$0xf0]  ;;  %v4424_v12 = vor.u32 %v6416_v3, %v4423_v62 }
  0xf7   :  { %3448 = vmatpush.bf16.msrb.mxu0 %v5956_v53  ;;  %v4328_v50 = vor.u32 %v6392_v39, %v4327_v36  ;;  %v5908_v53 = vor.u32 %v6785_v42, %v5905_v6  ;;  %v4727_v4 = vld [vmem:[%s10249_s1 + $0x3c8] sm:$0xf]  ;;  %v6456_v20 = vld [vmem:[%s10249_s1 + $0x2b4] sm:$0xf0] }
  0xf8   :  { %3461 = vmatpush.bf16.msrb.mxu1 %v6084_v57  ;;  %v6036_v57 = vor.u32 %v6817_v44, %v6033_v45  ;;  %v4407_v14 = vld [vmem:[%s10249_s1 + $0x148] sm:$0xf]  ;;  %v6412_v24 = vld [vmem:[%s10249_s1 + $0x154] sm:$0xf0] }
  0xf9   :  { %3477 = vmatpush.bf16.msrb.mxu2 %v6164_v60  ;;  %v4440_v60 = vor.u32 %v6420_v63, %v4439_v47  ;;  %v4583_v16 = vld [vmem:[%s10249_s1 + $0x2a8] sm:$0xf]  ;;  %v6488_v29 = vld [vmem:[%s10249_s1 + $0x3b4] sm:$0xf0] }
  0xfa   :  { %3438 = vmatpush.bf16.msrb.mxu3 %v5780_v56  ;;  %v3208_v56 = vpop.f32.mrf.mxu2  ;;  %v3221_v59 = vpop.f32.mrf.mxu3  ;;  %v4711_v28 = vld [vmem:[%s10249_s1 + $0x3a8] sm:$0xf]  ;;  %v6380_v32 = vld [vmem:[%s10249_s1 + $0x54] sm:$0xf0]  ;;  %v4584_v33 = vor.u32 %v6456_v20, %v4583_v16 }
  0xfb   :  { %3449 = vmatpush.bf16.msrb.mxu0 %v5940_v5  ;;  %v6492_v5 = vld [vmem:[%s10249_s1 + $0x3d4] sm:$0xf0]  ;;  %v4712_v36 = vor.u32 %v6488_v29, %v4711_v28  ;;  %v4391_v39 = vld [vmem:[%s10249_s1 + $0x128] sm:$0xf] }
  0xfc   :  { %3462 = vmatpush.bf16.msrb.mxu1 %v6068_v13  ;;  %6238 = vmatmul.msk.bf16.vlgmr.msrb.gmra.mxu2 %vm3063_vm0, %v7757_v41  ;;  %v4728_v13 = vor.u32 %v6492_v5, %v4727_v4  ;;  %v4567_v42 = vld [vmem:[%s10249_s1 + $0x288] sm:$0xf]  ;;  %v6408_v44 = vld [vmem:[%s10249_s1 + $0x134] sm:$0xf0] }
  0xfd   :  { %3483 = vmatpush.bf16.msra.mxu2 %v4360_v1  ;;  %3439 = vmatmul.bf16.vlgmr.msrb.gmra.mxu3 %v7833_v17  ;;  %v6460_v1 = vld [vmem:[%s10249_s1 + $0x2d4] sm:$0xf0]  ;;  %v4695_v45 = vld [vmem:[%s10249_s1 + $0x388] sm:$0xf]  ;;  %v4392_v63 = vor.u32 %v6408_v44, %v4391_v39 }
  0xfe   :  { %3496 = vmatpush.bf16.msra.mxu3 %v4488_v61  ;;  %v4744_v61 = vor.u32 %v6496_v52, %v4743_v51  ;;  %v4600_v11 = vor.u32 %v6460_v1, %v4599_v0  ;;  %v4263_v48 = vld [vmem:[%s10249_s1 + $0x28] sm:$0xf]  ;;  %v6376_v49 = vld [vmem:[%s10249_s1 + $0x34] sm:$0xf0] }
  0xff   :  { %3450 = vmatpush.bf16.msrb.mxu0 %v5924_v35  ;;  %v4408_v35 = vor.u32 %v6412_v24, %v4407_v14  ;;  %v4247_v52 = vld [vmem:[%s10249_s1 + $0x8] sm:$0xf]  ;;  %v6448_v55 = vld [vmem:[%s10249_s1 + $0x274] sm:$0xf0] }
 0x100   :  { %3463 = vmatpush.bf16.msrb.mxu1 %v6052_v43  ;;  %v6452_v43 = vld [vmem:[%s10249_s1 + $0x294] sm:$0xf0]  ;;  %v4551_v54 = vld [vmem:[%s10249_s1 + $0x268] sm:$0xf] }
 0x101   :  { %3484 = vmatpush.bf16.msra.mxu2 %v4344_v31  ;;  %v4279_v31 = vld [vmem:[%s10249_s1 + $0x48] sm:$0xf]  ;;  %v6372_v0 = vld [vmem:[%s10249_s1 + $0x14] sm:$0xf0]  ;;  %v4552_v3 = vor.u32 %v6448_v55, %v4551_v54 }
 0x102   :  { %3497 = vmatpush.bf16.msra.mxu3 %v4472_v21  ;;  %v4296_v21 = vor.u32 %v6384_v10, %v4295_v7  ;;  %v4280_v6 = vor.u32 %v6380_v32, %v4279_v31  ;;  %v3271_v47 = vpop.f32.mrf.mxu3  ;;  %v4679_v59 = vld [vmem:[%s10249_s1 + $0x368] sm:$0xf]  ;;  %v6476_v20 = vld [vmem:[%s10249_s1 + $0x354] sm:$0xf0] }
 0x103   :  { %3451 = vmatpush.bf16.msrb.mxu0 %v5908_v53  ;;  %v4375_v53 = vld [vmem:[%s10249_s1 + $0x108] sm:$0xf]  ;;  %v3232_v56 = vpop.f32.mrf.mxu0  ;;  %v6556_v29 = vld [vmem:[%s10249_s1 + $0x5d4] sm:$0xf0] }
 0x104   :  { %3464 = vmatpush.bf16.msrb.mxu1 %v6036_v57  ;;  %v4264_v57 = vor.u32 %v6376_v49, %v4263_v48  ;;  %v3245_v62 = vpop.f32.mrf.mxu1  ;;  %v4999_v1 = vld [vmem:[%s10249_s1 + $0x5e8] sm:$0xf] }
 0x105   :  { %3485 = vmatpush.bf16.msra.mxu2 %v4328_v50  ;;  %v4568_v50 = vor.u32 %v6452_v43, %v4567_v42  ;;  %v4871_v4 = vld [vmem:[%s10249_s1 + $0x4e8] sm:$0xf]  ;;  %v6440_v43 = vld [vmem:[%s10249_s1 + $0x234] sm:$0xf0] }
 0x106   :  { %3498 = vmatpush.bf16.msra.mxu3 %v4456_v46  ;;  %3452 = vmatmul.bf16.vlgmr.msrb.gmra.mxu0 %v7846_v26  ;;  %v6484_v46 = vld [vmem:[%s10249_s1 + $0x394] sm:$0xf0]  ;;  %v4663_v16 = vld [vmem:[%s10249_s1 + $0x348] sm:$0xf] }
 0x107   :  { %3509 = vmatpush.bf16.msra.mxu0 %v4616_v58  ;;  %3465 = vmatmul.bf16.vlgmr.msrb.gmra.mxu1 %v7835_v19  ;;  %v4696_v51 = vor.u32 %v6484_v46, %v4695_v45  ;;  %v6404_v58 = vld [vmem:[%s10249_s1 + $0x114] sm:$0xf0]  ;;  %v4983_v28 = vld [vmem:[%s10249_s1 + $0x5c8] sm:$0xf]  ;;  %v4664_v39 = vor.u32 %v6476_v20, %v4663_v16 }
 0x108   :  { %3522 = vmatpush.bf16.msra.mxu1 %v4744_v61  ;;  %v3233_v61 = vadd.f32 %v3232_v56, %v8568_v30  ;;  %v6528_v30 = vld [vmem:[%s10249_s1 + $0x4f4] sm:$0xf0]  ;;  %v4376_v7 = vor.u32 %v6404_v58, %v4375_v53  ;;  %v4519_v42 = vld [vmem:[%s10249_s1 + $0x228] sm:$0xf] }
 0x109   :  { %3486 = vmatpush.bf16.msra.mxu2 %v4312_v2  ;;  %v6560_v2 = vld [vmem:[%s10249_s1 + $0x5f4] sm:$0xf0]  ;;  %v4872_v24 = vor.u32 %v6528_v30, %v4871_v4  ;;  %v4647_v44 = vld [vmem:[%s10249_s1 + $0x328] sm:$0xf] }
 0x10a   :  { %3499 = vmatpush.bf16.msra.mxu3 %v4440_v60  ;;  %v6480_v60 = vld [vmem:[%s10249_s1 + $0x374] sm:$0xf0]  ;;  %v3246_v5 = vadd.f32 %v3245_v62, %v3233_v61  ;;  %v5000_v14 = vor.u32 %v6560_v2, %v4999_v1  ;;  %v4839_v53 = vld [vmem:[%s10249_s1 + $0x4a8] sm:$0xf] }
 0x10b   :  { %3510 = vmatpush.bf16.msra.mxu0 %v4600_v11  ;;  %v4680_v10 = vor.u32 %v6480_v60, %v4679_v59  ;;  %v4535_v11 = vld [vmem:[%s10249_s1 + $0x248] sm:$0xf]  ;;  %v3258_v31 = vpop.f32.mrf.mxu2  ;;  %v6472_v45 = vld [vmem:[%s10249_s1 + $0x334] sm:$0xf0]  ;;  %v3234_v46 = vpop.f32.mrf.mxu0 }
 0x10c   :  { %3523 = vmatpush.bf16.msra.mxu1 %v4728_v13  ;;  %v4248_v13 = vor.u32 %v6372_v0, %v4247_v52  ;;  %v4520_v52 = vor.u32 %v6440_v43, %v4519_v42  ;;  %v4503_v54 = vld [vmem:[%s10249_s1 + $0x208] sm:$0xf]  ;;  %v4648_v55 = vor.u32 %v6472_v45, %v4647_v44  ;;  %v6436_v56 = vld [vmem:[%s10249_s1 + $0x214] sm:$0xf0] }
 0x10d   :  { %3487 = vmatpush.bf16.msra.mxu2 %v4296_v21  ;;  %v3273_v21 = vpop.f32.mrf.mxu3  ;;  %v6468_v58 = vld [vmem:[%s10249_s1 + $0x314] sm:$0xf0]  ;;  %v4951_v60 = vld [vmem:[%s10249_s1 + $0x588] sm:$0xf]  ;;  %v4504_v4 = vor.u32 %v6436_v56, %v4503_v54 }
 0x10e   :  { %3500 = vmatpush.bf16.msra.mxu3 %v4424_v12  ;;  %v6444_v12 = vld [vmem:[%s10249_s1 + $0x254] sm:$0xf0]  ;;  %v5127_v61 = vld [vmem:[%s10249_s1 + $0x6e8] sm:$0xf] }
 0x10f   :  { %3511 = vmatpush.bf16.msra.mxu0 %v4584_v33  ;;  %v4536_v32 = vor.u32 %v6444_v12, %v4535_v11  ;;  %v4855_v33 = vld [vmem:[%s10249_s1 + $0x4c8] sm:$0xf]  ;;  %v6592_v62 = vld [vmem:[%s10249_s1 + $0x6f4] sm:$0xf0] }
 0x110   :  { %3524 = vmatpush.bf16.msra.mxu1 %v4712_v36  ;;  %v3259_v36 = vadd.f32 %v3258_v31, %v3246_v5  ;;  %v6548_v1 = vld [vmem:[%s10249_s1 + $0x594] sm:$0xf0]  ;;  %v5255_v2 = vld [vmem:[%s10249_s1 + $0x7e8] sm:$0xf]  ;;  %v5128_v11 = vor.u32 %v6592_v62, %v5127_v61 }
 0x111   :  { %3488 = vmatpush.bf16.msra.mxu2 %v4280_v6  ;;  %v4984_v6 = vor.u32 %v6556_v29, %v4983_v28  ;;  %v4823_v30 = vld [vmem:[%s10249_s1 + $0x488] sm:$0xf]  ;;  %v6516_v5 = vld [vmem:[%s10249_s1 + $0x494] sm:$0xf0]  ;;  %v4952_v12 = vor.u32 %v6548_v1, %v4951_v60 }
 0x112   :  { %3501 = vmatpush.bf16.msra.mxu3 %v4408_v35  ;;  %v6524_v35 = vld [vmem:[%s10249_s1 + $0x4d4] sm:$0xf0]  ;;  %v8768_v48 = vadd.f32 %v3271_v47, %v3259_v36  ;;  %v5111_v16 = vld [vmem:[%s10249_s1 + $0x6c8] sm:$0xf]  ;;  %v4824_v21 = vor.u32 %v6516_v5, %v4823_v30 }
 0x113   :  { %3512 = vmatpush.bf16.msra.mxu0 %v4568_v50  ;;  %v4856_v49 = vor.u32 %v6524_v35, %v4855_v33  ;;  %v4967_v50 = vld [vmem:[%s10249_s1 + $0x5a8] sm:$0xf]  ;;  %v6520_v47 = vld [vmem:[%s10249_s1 + $0x4b4] sm:$0xf0] }
 0x114   :  { %3525 = vmatpush.bf16.msra.mxu1 %v4696_v51  ;;  %v3247_v51 = vpop.f32.mrf.mxu1  ;;  %v4840_v0 = vor.u32 %v6520_v47, %v4839_v53  ;;  %v6588_v20 = vld [vmem:[%s10249_s1 + $0x6d4] sm:$0xf0]  ;;  %v5239_v28 = vld [vmem:[%s10249_s1 + $0x7c8] sm:$0xf] }
 0x115   :  { %3489 = vmatpush.bf16.msra.mxu2 %v4264_v57  ;;  %v4631_v57 = vld [vmem:[%s10249_s1 + $0x308] sm:$0xf]  ;;  %v6620_v29 = vld [vmem:[%s10249_s1 + $0x7d4] sm:$0xf0]  ;;  %v5112_v33 = vor.u32 %v6588_v20, %v5111_v16 }
 0x116   :  { %3502 = vmatpush.bf16.msra.mxu3 %v4392_v63  ;;  %v6552_v63 = vld [vmem:[%s10249_s1 + $0x5b4] sm:$0xf0]  ;;  %v4807_v31 = vld [vmem:[%s10249_s1 + $0x468] sm:$0xf]  ;;  %v5240_v36 = vor.u32 %v6620_v29, %v5239_v28 }
 0x117   :  { %3513 = vmatpush.bf16.msra.mxu0 %v4552_v3  ;;  %v4968_v59 = vor.u32 %v6552_v63, %v4967_v50  ;;  %v6624_v3 = vld [vmem:[%s10249_s1 + $0x7f4] sm:$0xf0]  ;;  %v5095_v42 = vld [vmem:[%s10249_s1 + $0x6a8] sm:$0xf]  ;;  %v6906_v63 = vld [vmem:[%s10251_s2] sm:$0xf] }
 0x118   :  { %3526 = vmatpush.bf16.msra.mxu1 %v4680_v10  ;;  %v4632_v10 = vor.u32 %v6468_v58, %v4631_v57  ;;  %v6584_v43 = vld [vmem:[%s10249_s1 + $0x6b4] sm:$0xf0]  ;;  %v5223_v45 = vld [vmem:[%s10249_s1 + $0x7a8] sm:$0xf]  ;;  %v556_v51 = vperm.slane %v6906_v63, 1 }
 0x119   :  { %3490 = vmatpush.bf16.msra.mxu2 %v4248_v13  ;;  %v5256_v13 = vor.u32 %v6624_v3, %v5255_v2  ;;  %v6540_v44 = vld [vmem:[%s10249_s1 + $0x554] sm:$0xf0]  ;;  %v4903_v54 = vld [vmem:[%s10249_s1 + $0x528] sm:$0xf] }
 0x11a   :  { %3503 = vmatpush.bf16.msra.mxu3 %v4376_v7  ;;  %v3260_v7 = vpop.f32.mrf.mxu2  ;;  %v6616_v46 = vld [vmem:[%s10249_s1 + $0x7b4] sm:$0xf0]  ;;  %v4775_v62 = vld [vmem:[%s10249_s1 + $0x428] sm:$0xf] }
 0x11b   :  { %3514 = vmatpush.bf16.msra.mxu0 %v4536_v32  ;;  %v6512_v32 = vld [vmem:[%s10249_s1 + $0x474] sm:$0xf0]  ;;  %v5224_v47 = vor.u32 %v6616_v46, %v5223_v45  ;;  %v4759_v30 = vld [vmem:[%s10249_s1 + $0x408] sm:$0xf] }
 0x11c   :  { %3527 = vmatpush.bf16.msra.mxu1 %v4664_v39  ;;  %3491 = vmatmul.bf16.vlgmr.msra.gmra.mxu2 %v7219_v9  ;;  %v4919_v39 = vld [vmem:[%s10249_s1 + $0x548] sm:$0xf]  ;;  %v6508_v50 = vld [vmem:[%s10249_s1 + $0x454] sm:$0xf0] }
 0x11d   :  { %3535 = vmatpush.bf16.msrb.mxu2 %v4872_v24  ;;  %3504 = vmatmul.bf16.vlgmr.msra.gmra.mxu3 %v7256_v25  ;;  %v6544_v24 = vld [vmem:[%s10249_s1 + $0x574] sm:$0xf0]  ;;  %v4920_v53 = vor.u32 %v6540_v44, %v4919_v39  ;;  %v4887_v5 = vld [vmem:[%s10249_s1 + $0x508] sm:$0xf] }
 0x11e   :  { %3548 = vmatpush.bf16.msrb.mxu3 %v5000_v14  ;;  %v4935_v14 = vld [vmem:[%s10249_s1 + $0x568] sm:$0xf]  ;;  %v6580_v56 = vld [vmem:[%s10249_s1 + $0x694] sm:$0xf0] }
 0x11f   :  { %3515 = vmatpush.bf16.msra.mxu0 %v4520_v52  ;;  %v4936_v35 = vor.u32 %v6544_v24, %v4935_v14  ;;  %v5096_v52 = vor.u32 %v6584_v43, %v5095_v42  ;;  %v6536_v58 = vld [vmem:[%s10249_s1 + $0x534] sm:$0xf0]  ;;  %v5063_v7 = vld [vmem:[%s10249_s1 + $0x668] sm:$0xf] }
 0x120   :  { %3528 = vmatpush.bf16.msra.mxu1 %v4648_v55  ;;  %v5079_v55 = vld [vmem:[%s10249_s1 + $0x688] sm:$0xf]  ;;  %v6612_v60 = vld [vmem:[%s10249_s1 + $0x794] sm:$0xf0]  ;;  %v3284_v61 = vpop.f32.mrf.mxu3  ;;  %v4904_v3 = vor.u32 %v6536_v58, %v4903_v54 }
 0x121   :  { %3536 = vmatpush.bf16.msrb.mxu2 %v4856_v49  ;;  %v4791_v49 = vld [vmem:[%s10249_s1 + $0x448] sm:$0xf]  ;;  %v3285_v1 = vadd.f32 %v3284_v61, %v556_v51  ;;  %v5080_v2 = vor.u32 %v6580_v56, %v5079_v55  ;;  %v6608_v14 = vld [vmem:[%s10249_s1 + $0x774] sm:$0xf0] }
 0x122   :  { %3549 = vmatpush.bf16.msrb.mxu3 %v4984_v6  ;;  %v4808_v6 = vor.u32 %v6512_v32, %v4807_v31  ;;  %v4792_v57 = vor.u32 %v6508_v50, %v4791_v49  ;;  %v6500_v20 = vld [vmem:[%s10249_s1 + $0x414] sm:$0xf0]  ;;  %v5383_v32 = vld [vmem:[%s10249_s1 + $0x8e8] sm:$0xf] }
 0x123   :  { %3516 = vmatpush.bf16.msra.mxu0 %v4504_v4  ;;  %v3297_v16 = vpop.f32.mrf.mxu0  ;;  %v6688_v24 = vld [vmem:[%s10249_s1 + $0x9f4] sm:$0xf0]  ;;  %v5047_v39 = vld [vmem:[%s10249_s1 + $0x648] sm:$0xf] }
 0x124   :  { %3529 = vmatpush.bf16.msra.mxu1 %v4632_v10  ;;  %v6576_v10 = vld [vmem:[%s10249_s1 + $0x674] sm:$0xf0]  ;;  %v3298_v28 = vadd.f32 %v3297_v16, %v3285_v1  ;;  %v3310_v29 = vpop.f32.mrf.mxu1  ;;  %v5175_v45 = vld [vmem:[%s10249_s1 + $0x748] sm:$0xf] }
 0x125   :  { %3537 = vmatpush.bf16.msrb.mxu2 %v4840_v0  ;;  %v6504_v0 = vld [vmem:[%s10249_s1 + $0x434] sm:$0xf0]  ;;  %v5064_v31 = vor.u32 %v6576_v10, %v5063_v7  ;;  %v5495_v63 = vld [vmem:[%s10249_s1 + $0x9c8] sm:$0xf] }
 0x126   :  { %3550 = vmatpush.bf16.msrb.mxu3 %v4968_v59  ;;  %3517 = vmatmul.bf16.vlgmr.msra.gmra.mxu0 %v7217_v8  ;;  %v5207_v59 = vld [vmem:[%s10249_s1 + $0x788] sm:$0xf]  ;;  %v6572_v42 = vld [vmem:[%s10249_s1 + $0x654] sm:$0xf0]  ;;  %v3311_v43 = vadd.f32 %v3310_v29, %v3298_v28 }
 0x127   :  { %3561 = vmatpush.bf16.msrb.mxu0 %v5128_v11  ;;  %3530 = vmatmul.bf16.vlgmr.msra.gmra.mxu1 %v7233_v15  ;;  %v5208_v4 = vor.u32 %v6612_v60, %v5207_v59  ;;  %v4776_v11 = vor.u32 %v6504_v0, %v4775_v62  ;;  %v6604_v46 = vld [vmem:[%s10249_s1 + $0x754] sm:$0xf0]  ;;  %v5031_v55 = vld [vmem:[%s10249_s1 + $0x628] sm:$0xf] }
 0x128   :  { %3574 = vmatpush.bf16.msrb.mxu1 %v5256_v13  ;;  %v5191_v13 = vld [vmem:[%s10249_s1 + $0x768] sm:$0xf]  ;;  %v3286_v49 = vpop.f32.mrf.mxu3  ;;  %v6684_v51 = vld [vmem:[%s10249_s1 + $0x9d4] sm:$0xf0]  ;;  %v5176_v54 = vor.u32 %v6604_v46, %v5175_v45 }
 0x129   :  { %3538 = vmatpush.bf16.msrb.mxu2 %v4824_v21  ;;  %v5511_v21 = vld [vmem:[%s10249_s1 + $0x9e8] sm:$0xf]  ;;  %v6568_v56 = vld [vmem:[%s10249_s1 + $0x634] sm:$0xf0]  ;;  %v5496_v58 = vor.u32 %v6684_v51, %v5495_v63 }
 0x12a   :  { %3551 = vmatpush.bf16.msrb.mxu3 %v4952_v12  ;;  %v6532_v12 = vld [vmem:[%s10249_s1 + $0x514] sm:$0xf0]  ;;  %v5512_v44 = vor.u32 %v6688_v24, %v5511_v21  ;;  %v5159_v59 = vld [vmem:[%s10249_s1 + $0x728] sm:$0xf] }
 0x12b   :  { %3562 = vmatpush.bf16.msrb.mxu0 %v5112_v33  ;;  %v6656_v33 = vld [vmem:[%s10249_s1 + $0x8f4] sm:$0xf0]  ;;  %v3299_v62 = vpop.f32.mrf.mxu0  ;;  %v5479_v1 = vld [vmem:[%s10249_s1 + $0x9a8] sm:$0xf] }
 0x12c   :  { %3575 = vmatpush.bf16.msrb.mxu1 %v5240_v36  ;;  %v5192_v36 = vor.u32 %v6608_v14, %v5191_v13  ;;  %v5384_v50 = vor.u32 %v6656_v33, %v5383_v32  ;;  %v6600_v60 = vld [vmem:[%s10249_s1 + $0x734] sm:$0xf0]  ;;  %v5015_v7 = vld [vmem:[%s10249_s1 + $0x608] sm:$0xf] }
 0x12d   :  { %3539 = vmatpush.bf16.msrb.mxu2 %v4808_v6  ;;  %v4760_v6 = vor.u32 %v6500_v20, %v4759_v30  ;;  %v5351_v30 = vld [vmem:[%s10249_s1 + $0x8a8] sm:$0xf]  ;;  %v5160_v10 = vor.u32 %v6600_v60, %v5159_v59  ;;  %v6596_v13 = vld [vmem:[%s10249_s1 + $0x714] sm:$0xf0] }
 0x12e   :  { %3552 = vmatpush.bf16.msrb.mxu3 %v4936_v35  ;;  %v4888_v35 = vor.u32 %v6532_v12, %v4887_v5  ;;  %v6648_v5 = vld [vmem:[%s10249_s1 + $0x8b4] sm:$0xf0]  ;;  %v5143_v12 = vld [vmem:[%s10249_s1 + $0x708] sm:$0xf] }
 0x12f   :  { %3563 = vmatpush.bf16.msrb.mxu0 %v5096_v52  ;;  %v5048_v52 = vor.u32 %v6572_v42, %v5047_v39  ;;  %v5463_v16 = vld [vmem:[%s10249_s1 + $0x988] sm:$0xf]  ;;  %v6720_v21 = vld [vmem:[%s10249_s1 + $0xaf4] sm:$0xf0]  ;;  %v5352_v24 = vor.u32 %v6648_v5, %v5351_v30 }
 0x130   :  { %3576 = vmatpush.bf16.msrb.mxu1 %v5224_v47  ;;  %v6652_v47 = vld [vmem:[%s10249_s1 + $0x8d4] sm:$0xf0]  ;;  %v5639_v20 = vld [vmem:[%s10249_s1 + $0xae8] sm:$0xf] }
 0x131   :  { %3540 = vmatpush.bf16.msrb.mxu2 %v4792_v57  ;;  %v3323_v57 = vpop.f32.mrf.mxu2  ;;  %v6676_v28 = vld [vmem:[%s10249_s1 + $0x994] sm:$0xf0]  ;;  %v5767_v29 = vld [vmem:[%s10249_s1 + $0xbe8] sm:$0xf]  ;;  %v5640_v39 = vor.u32 %v6720_v21, %v5639_v20 }
 0x132   :  { %3553 = vmatpush.bf16.msrb.mxu3 %v4920_v53  ;;  %v5367_v53 = vld [vmem:[%s10249_s1 + $0x8c8] sm:$0xf]  ;;  %v8969_v61 = vadd.f32 %v3323_v57, %v3311_v43  ;;  %v5464_v43 = vor.u32 %v6676_v28, %v5463_v16  ;;  %v6716_v46 = vld [vmem:[%s10249_s1 + $0xad4] sm:$0xf0] }
 0x133   :  { %3564 = vmatpush.bf16.msrb.mxu0 %v5080_v2  ;;  %v5368_v0 = vor.u32 %v6652_v47, %v5367_v53  ;;  %v6680_v2 = vld [vmem:[%s10249_s1 + $0x9b4] sm:$0xf0]  ;;  %v5335_v33 = vld [vmem:[%s10249_s1 + $0x888] sm:$0xf] }
 0x134   :  { %3577 = vmatpush.bf16.msrb.mxu1 %v5208_v4  ;;  %v5032_v4 = vor.u32 %v6568_v56, %v5031_v55  ;;  %v5480_v14 = vor.u32 %v6680_v2, %v5479_v1  ;;  %v5623_v45 = vld [vmem:[%s10249_s1 + $0xac8] sm:$0xf]  ;;  %v6748_v51 = vld [vmem:[%s10249_s1 + $0xbd4] sm:$0xf0] }
 0x135   :  { %3541 = vmatpush.bf16.msrb.mxu2 %v4776_v11  ;;  %v6564_v11 = vld [vmem:[%s10249_s1 + $0x614] sm:$0xf0]  ;;  %v5751_v63 = vld [vmem:[%s10249_s1 + $0xbc8] sm:$0xf]  ;;  %v5624_v47 = vor.u32 %v6716_v46, %v5623_v45 }
 0x136   :  { %3554 = vmatpush.bf16.msrb.mxu3 %v4904_v3  ;;  %v3312_v3 = vpop.f32.mrf.mxu1  ;;  %v5016_v32 = vor.u32 %v6564_v11, %v5015_v7  ;;  %v6640_v53 = vld [vmem:[%s10249_s1 + $0x874] sm:$0xf0]  ;;  %v5752_v55 = vor.u32 %v6748_v51, %v5751_v63  ;;  %v5431_v56 = vld [vmem:[%s10249_s1 + $0x948] sm:$0xf] }
 0x137   :  { %3565 = vmatpush.bf16.msrb.mxu0 %v5064_v31  ;;  %v6752_v31 = vld [vmem:[%s10249_s1 + $0xbf4] sm:$0xf0]  ;;  %v5607_v57 = vld [vmem:[%s10249_s1 + $0xaa8] sm:$0xf] }
 0x138   :  { %3578 = vmatpush.bf16.msrb.mxu1 %v5192_v36  ;;  %v5144_v36 = vor.u32 %v6596_v13, %v5143_v12  ;;  %v6668_v60 = vld [vmem:[%s10249_s1 + $0x954] sm:$0xf0]  ;;  %v5735_v62 = vld [vmem:[%s10249_s1 + $0xba8] sm:$0xf] }
 0x139   :  { %3542 = vmatpush.bf16.msrb.mxu2 %v4760_v6  ;;  %v3325_v42 = vpop.f32.mrf.mxu2  ;;  %v5768_v6 = vor.u32 %v6752_v31, %v5767_v29  ;;  %v5303_v1 = vld [vmem:[%s10249_s1 + $0x848] sm:$0xf]  ;;  %v6636_v2 = vld [vmem:[%s10249_s1 + $0x854] sm:$0xf0] }
 0x13a   :  { %3555 = vmatpush.bf16.msrb.mxu3 %v4888_v35  ;;  %v6644_v35 = vld [vmem:[%s10249_s1 + $0x894] sm:$0xf0]  ;;  %v5415_v5 = vld [vmem:[%s10249_s1 + $0x928] sm:$0xf]  ;;  %v5304_v12 = vor.u32 %v6636_v2, %v5303_v1 }
 0x13b   :  { %3566 = vmatpush.bf16.msrb.mxu0 %v5048_v52  ;;  %v5336_v49 = vor.u32 %v6644_v35, %v5335_v33  ;;  %v5319_v52 = vld [vmem:[%s10249_s1 + $0x868] sm:$0xf]  ;;  %v6664_v13 = vld [vmem:[%s10249_s1 + $0x934] sm:$0xf0] }
 0x13c   :  { %3579 = vmatpush.bf16.msrb.mxu1 %v5176_v54  ;;  %3543 = vmatmul.bf16.vlgmr.msrb.gmra.mxu2 %v7408_v37  ;;  %v5320_v59 = vor.u32 %v6640_v53, %v5319_v52  ;;  %v5591_v7 = vld [vmem:[%s10249_s1 + $0xa88] sm:$0xf]  ;;  %v6740_v16 = vld [vmem:[%s10249_s1 + $0xb94] sm:$0xf0]  ;;  %v5416_v29 = vor.u32 %v6664_v13, %v5415_v5 }
 0x13d   :  { %3587 = vmatpush.bf16.msra.mxu2 %v5384_v50  ;;  %3556 = vmatmul.bf16.vlgmr.msrb.gmra.mxu3 %v7412_v40  ;;  %v6672_v50 = vld [vmem:[%s10249_s1 + $0x974] sm:$0xf0]  ;;  %v5287_v21 = vld [vmem:[%s10249_s1 + $0x828] sm:$0xf] }
 0x13e   :  { %3600 = vmatpush.bf16.msra.mxu3 %v5512_v44  ;;  %v5447_v44 = vld [vmem:[%s10249_s1 + $0x968] sm:$0xf]  ;;  %v6704_v35 = vld [vmem:[%s10249_s1 + $0xa74] sm:$0xf0] }
 0x13f   :  { %3567 = vmatpush.bf16.msrb.mxu0 %v5032_v4  ;;  %v5448_v54 = vor.u32 %v6672_v50, %v5447_v44  ;;  %v5432_v4 = vor.u32 %v6668_v60, %v5431_v56  ;;  %v5575_v33 = vld [vmem:[%s10249_s1 + $0xa68] sm:$0xf]  ;;  %v6628_v44 = vld [vmem:[%s10249_s1 + $0x814] sm:$0xf0] }
 0x140   :  { %3580 = vmatpush.bf16.msrb.mxu1 %v5160_v10  ;;  %v6708_v10 = vld [vmem:[%s10249_s1 + $0xa94] sm:$0xf0]  ;;  %v3336_v11 = vpop.f32.mrf.mxu3  ;;  %v5703_v42 = vld [vmem:[%s10249_s1 + $0xb68] sm:$0xf]  ;;  %v5576_v63 = vor.u32 %v6704_v35, %v5575_v33 }
 0x141   :  { %3588 = vmatpush.bf16.msra.mxu2 %v5368_v0  ;;  %v6744_v0 = vld [vmem:[%s10249_s1 + $0xbb4] sm:$0xf0]  ;;  %v3337_v20 = vadd.f32 %v3336_v11, %v8969_v61  ;;  %v5592_v28 = vor.u32 %v6708_v10, %v5591_v7  ;;  %v5399_v61 = vld [vmem:[%s10249_s1 + $0x908] sm:$0xf] }
 0x142   :  { %3601 = vmatpush.bf16.msra.mxu3 %v5496_v58  ;;  %v6712_v58 = vld [vmem:[%s10249_s1 + $0xab4] sm:$0xf0]  ;;  %v5736_v30 = vor.u32 %v6744_v0, %v5735_v62  ;;  %v6023_v46 = vld [vmem:[%s10249_s1 + $0xde8] sm:$0xf] }
 0x143   :  { %3568 = vmatpush.bf16.msrb.mxu0 %v5016_v32  ;;  %v5608_v3 = vor.u32 %v6712_v58, %v5607_v57  ;;  %v5271_v32 = vld [vmem:[%s10249_s1 + $0x808] sm:$0xf]  ;;  %v6784_v52 = vld [vmem:[%s10249_s1 + $0xcf4] sm:$0xf0] }
 0x144   :  { %3581 = vmatpush.bf16.msrb.mxu1 %v5144_v36  ;;  %v3362_v45 = vpop.f32.mrf.mxu1  ;;  %v5895_v51 = vld [vmem:[%s10249_s1 + $0xce8] sm:$0xf]  ;;  %v5272_v57 = vor.u32 %v6628_v44, %v5271_v32  ;;  %v6732_v62 = vld [vmem:[%s10249_s1 + $0xb54] sm:$0xf0] }
 0x145   :  { %3589 = vmatpush.bf16.msra.mxu2 %v5352_v24  ;;  %v6632_v24 = vld [vmem:[%s10249_s1 + $0x834] sm:$0xf0]  ;;  %v5687_v60 = vld [vmem:[%s10249_s1 + $0xb48] sm:$0xf]  ;;  %v5896_v0 = vor.u32 %v6784_v52, %v5895_v51 }
 0x146   :  { %3602 = vmatpush.bf16.msra.mxu3 %v5480_v14  ;;  %3569 = vmatmul.bf16.vlgmr.msrb.gmra.mxu0 %v7400_v34  ;;  %v5719_v14 = vld [vmem:[%s10249_s1 + $0xb88] sm:$0xf]  ;;  %v5288_v36 = vor.u32 %v6632_v24, %v5287_v21  ;;  %v6812_v2 = vld [vmem:[%s10249_s1 + $0xdd4] sm:$0xf0]  ;;  %v5688_v5 = vor.u32 %v6732_v62, %v5687_v60 }
 0x147   :  { %3613 = vmatpush.bf16.msra.mxu0 %v5640_v39  ;;  %3582 = vmatmul.bf16.vlgmr.msrb.gmra.mxu1 %v7410_v38  ;;  %v5720_v31 = vor.u32 %v6740_v16, %v5719_v14  ;;  %v6660_v39 = vld [vmem:[%s10249_s1 + $0x914] sm:$0xf0]  ;;  %v6007_v1 = vld [vmem:[%s10249_s1 + $0xdc8] sm:$0xf] }
 0x148   :  { %3626 = vmatpush.bf16.msra.mxu1 %v5768_v6  ;;  %v3349_v6 = vpop.f32.mrf.mxu0  ;;  %v5400_v53 = vor.u32 %v6660_v39, %v5399_v61  ;;  %v3338_v56 = vpop.f32.mrf.mxu3  ;;  %v5543_v7 = vld [vmem:[%s10249_s1 + $0xa28] sm:$0xf]  ;;  %v6696_v10 = vld [vmem:[%s10249_s1 + $0xa34] sm:$0xf0] }
 0x149   :  { %3590 = vmatpush.bf16.msra.mxu2 %v5336_v49  ;;  %v6816_v49 = vld [vmem:[%s10249_s1 + $0xdf4] sm:$0xf0]  ;;  %v3350_v50 = vadd.f32 %v3349_v6, %v3337_v20  ;;  %v5671_v13 = vld [vmem:[%s10249_s1 + $0xb28] sm:$0xf] }
 0x14a   :  { %3603 = vmatpush.bf16.msra.mxu3 %v5464_v43  ;;  %v6736_v43 = vld [vmem:[%s10249_s1 + $0xb74] sm:$0xf0]  ;;  %v5991_v21 = vld [vmem:[%s10249_s1 + $0xda8] sm:$0xf] }
 0x14b   :  { %3614 = vmatpush.bf16.msra.mxu0 %v5624_v47  ;;  %v5704_v47 = vor.u32 %v6736_v43, %v5703_v42  ;;  %v3363_v58 = vadd.f32 %v3362_v45, %v3350_v50  ;;  %v3375_v11 = vpop.f32.mrf.mxu2  ;;  %v6728_v14 = vld [vmem:[%s10249_s1 + $0xb34] sm:$0xf0]  ;;  %v5863_v32 = vld [vmem:[%s10249_s1 + $0xca8] sm:$0xf] }
 0x14c   :  { %3627 = vmatpush.bf16.msra.mxu1 %v5752_v55  ;;  %v6700_v55 = vld [vmem:[%s10249_s1 + $0xa54] sm:$0xf0]  ;;  %v5527_v33 = vld [vmem:[%s10249_s1 + $0xa08] sm:$0xf]  ;;  %v5672_v35 = vor.u32 %v6728_v14, %v5671_v13 }
 0x14d   :  { %3591 = vmatpush.bf16.msra.mxu2 %v5320_v59  ;;  %v6024_v59 = vor.u32 %v6816_v49, %v6023_v46  ;;  %v9168_v16 = vadd.f32 %v3375_v11, %v3363_v58  ;;  %v6808_v24 = vld [vmem:[%s10249_s1 + $0xdb4] sm:$0xf0]  ;;  %v5655_v39 = vld [vmem:[%s10249_s1 + $0xb08] sm:$0xf] }
 0x14e   :  { %3604 = vmatpush.bf16.msra.mxu3 %v5448_v54  ;;  %v5559_v54 = vld [vmem:[%s10249_s1 + $0xa48] sm:$0xf]  ;;  %v6776_v61 = vld [vmem:[%s10249_s1 + $0xcb4] sm:$0xf0]  ;;  %v5992_v43 = vor.u32 %v6808_v24, %v5991_v21 }
 0x14f   :  { %3615 = vmatpush.bf16.msra.mxu0 %v5608_v3  ;;  %v5560_v3 = vor.u32 %v6700_v55, %v5559_v54  ;;  %v6724_v42 = vld [vmem:[%s10249_s1 + $0xb14] sm:$0xf0]  ;;  %v5975_v6 = vld [vmem:[%s10249_s1 + $0xd88] sm:$0xf]  ;;  %v5864_v46 = vor.u32 %v6776_v61, %v5863_v32 }
 0x150   :  { %3628 = vmatpush.bf16.msra.mxu1 %v5736_v30  ;;  %v6780_v30 = vld [vmem:[%s10249_s1 + $0xcd4] sm:$0xf0]  ;;  %v6151_v44 = vld [vmem:[%s10249_s1 + $0xee8] sm:$0xf] }
 0x151   :  { %3592 = vmatpush.bf16.msra.mxu2 %v5304_v12  ;;  %v6008_v12 = vor.u32 %v6812_v2, %v6007_v1  ;;  %v6848_v45 = vld [vmem:[%s10249_s1 + $0xef4] sm:$0xf0]  ;;  %v6231_v50 = vld [vmem:[%s10249_s1 + $0xf88] sm:$0xf] }
 0x152   :  { %3605 = vmatpush.bf16.msra.mxu3 %v5432_v4  ;;  %v5879_v4 = vld [vmem:[%s10249_s1 + $0xcc8] sm:$0xf]  ;;  %v6804_v49 = vld [vmem:[%s10249_s1 + $0xd94] sm:$0xf0]  ;;  %v6152_v54 = vor.u32 %v6848_v45, %v6151_v44 }
 0x153   :  { %3616 = vmatpush.bf16.msra.mxu0 %v5592_v28  ;;  %v5880_v20 = vor.u32 %v6780_v30, %v5879_v4  ;;  %v3351_v28 = vpop.f32.mrf.mxu0  ;;  %v5847_v52 = vld [vmem:[%s10249_s1 + $0xc88] sm:$0xf]  ;;  %v5976_v55 = vor.u32 %v6804_v49, %v5975_v6  ;;  %v3377_v60 = vpop.f32.mrf.mxu2  ;;  %v6864_v2 = vld [vmem:[%s10249_s1 + $0xf74] sm:$0xf0] }
 0x154   :  { %3629 = vmatpush.bf16.msra.mxu1 %v5720_v31  ;;  %v5544_v31 = vor.u32 %v6696_v10, %v5543_v7  ;;  %v6135_v58 = vld [vmem:[%s10249_s1 + $0xec8] sm:$0xf]  ;;  %v6768_v4 = vld [vmem:[%s10249_s1 + $0xc74] sm:$0xf0]  ;;  %v4361_v60 = vld [vmem:[%s10249_s1 + $0xf8] sm:$0xf0] }
 0x155   :  { %3593 = vmatpush.bf16.msra.mxu2 %v5288_v36  ;;  %v6692_v36 = vld [vmem:[%s10249_s1 + $0xa14] sm:$0xf0]  ;;  %v6215_v1 = vld [vmem:[%s10249_s1 + $0xf68] sm:$0xf] }
 0x156   :  { %3606 = vmatpush.bf16.msra.mxu3 %v5416_v29  ;;  %v3364_v29 = vpop.f32.mrf.mxu1  ;;  %v5528_v51 = vor.u32 %v6692_v36, %v5527_v33  ;;  %v6216_v7 = vor.u32 %v6864_v2, %v6215_v1  ;;  %v5943_v10 = vld [vmem:[%s10249_s1 + $0xd48] sm:$0xf]  ;;  %v6796_v14 = vld [vmem:[%s10249_s1 + $0xd54] sm:$0xf0] }
 0x157   :  { %3617 = vmatpush.bf16.msra.mxu0 %v5576_v63  ;;  %v6868_v63 = vld [vmem:[%s10249_s1 + $0xf94] sm:$0xf0]  ;;  %v6119_v11 = vld [vmem:[%s10249_s1 + $0xea8] sm:$0xf]  ;;  %v5944_v32 = vor.u32 %v6796_v14, %v5943_v10 }
 0x158   :  { %3630 = vmatpush.bf16.msra.mxu1 %v5704_v47  ;;  %v5656_v47 = vor.u32 %v6724_v42, %v5655_v39  ;;  %v6232_v56 = vor.u32 %v6868_v63, %v6231_v50  ;;  %v6860_v21 = vld [vmem:[%s10249_s1 + $0xf54] sm:$0xf0]  ;;  %v5815_v24 = vld [vmem:[%s10249_s1 + $0xc48] sm:$0xf] }
 0x159   :  { %3594 = vmatpush.bf16.msra.mxu2 %v5272_v57  ;;  %v5959_v57 = vld [vmem:[%s10249_s1 + $0xd68] sm:$0xf]  ;;  %v6764_v28 = vld [vmem:[%s10249_s1 + $0xc54] sm:$0xf0] }
 0x15a   :  { %3607 = vmatpush.bf16.msra.mxu3 %v5400_v53  ;;  %v6772_v53 = vld [vmem:[%s10249_s1 + $0xc94] sm:$0xf0]  ;;  %v5927_v33 = vld [vmem:[%s10249_s1 + $0xd28] sm:$0xf]  ;;  %v5816_v42 = vor.u32 %v6764_v28, %v5815_v24  ;;  %v6394_v28 = vld [vmem:[%s10249_s1 + $0xcc] sm:$0xf] }
 0x15b   :  { %3618 = vmatpush.bf16.msra.mxu0 %v5560_v3  ;;  %v5848_v62 = vor.u32 %v6772_v53, %v5847_v52  ;;  %v5831_v3 = vld [vmem:[%s10249_s1 + $0xc68] sm:$0xf]  ;;  %v6836_v36 = vld [vmem:[%s10249_s1 + $0xe94] sm:$0xf0] }
 0x15c   :  { %3595 = vmatmul.bf16.vlgmr.msra.gmra.mxu2 %v7607_v18  ;;  %3631 = vmatpush.bf16.msra.mxu1 %v5688_v5  ;;  %v5832_v13 = vor.u32 %v6768_v4, %v5831_v3  ;;  %v6183_v6 = vld [vmem:[%s10249_s1 + $0xf28] sm:$0xf]  ;;  %v6856_v44 = vld [vmem:[%s10249_s1 + $0xf34] sm:$0xf0]  ;;  %v4489_v3 = vld [vmem:[%s10249_s1 + $0x1f8] sm:$0xf0] }
 0x15d   :  { %3639 = vmatpush.bf16.msrb.mxu2 %v5896_v0  ;;  %3608 = vmatmul.bf16.vlgmr.msra.gmra.mxu3 %v7620_v23  ;;  %v6800_v0 = vld [vmem:[%s10249_s1 + $0xd74] sm:$0xf0]  ;;  %v5799_v45 = vld [vmem:[%s10249_s1 + $0xc28] sm:$0xf]  ;;  %v6184_v50 = vor.u32 %v6856_v44, %v6183_v6  ;;  %v6462_v4 = vld [vmem:[%s10249_s1 + $0x2ec] sm:$0xf] }
 0x15e   :  { %3652 = vmatpush.bf16.msrb.mxu3 %v6024_v59  ;;  %v6844_v59 = vld [vmem:[%s10249_s1 + $0xed4] sm:$0xf0]  ;;  %v5960_v5 = vor.u32 %v6800_v0, %v5959_v57  ;;  %v5783_v63 = vld [vmem:[%s10249_s1 + $0xc08] sm:$0xf] }
 0x15f   :  { %3619 = vmatpush.bf16.msra.mxu0 %v5544_v31  ;;  %v6136_v30 = vor.u32 %v6844_v59, %v6135_v58  ;;  %v5911_v52 = vld [vmem:[%s10249_s1 + $0xd08] sm:$0xf]  ;;  %v6852_v57 = vld [vmem:[%s10249_s1 + $0xf14] sm:$0xf0]  ;;  %v6398_v59 = vld [vmem:[%s10249_s1 + $0xec] sm:$0xf] }
 0x160   :  { %3632 = vmatpush.bf16.msra.mxu1 %v5672_v35  ;;  %v3388_v31 = vpop.f32.mrf.mxu3  ;;  %v6103_v35 = vld [vmem:[%s10249_s1 + $0xe88] sm:$0xf] }
 0x161   :  { %3640 = vmatpush.bf16.msrb.mxu2 %v5880_v20  ;;  %v6199_v20 = vld [vmem:[%s10249_s1 + $0xf48] sm:$0xf]  ;;  %v3389_v39 = vadd.f32 %v3388_v31, %v9168_v16  ;;  %v6760_v16 = vld [vmem:[%s10249_s1 + $0xc34] sm:$0xf0]  ;;  %v6426_v31 = vld [vmem:[%s10249_s1 + $0x1cc] sm:$0xf] }
 0x162   :  { %3653 = vmatpush.bf16.msrb.mxu3 %v6008_v12  ;;  %v6840_v12 = vld [vmem:[%s10249_s1 + $0xeb4] sm:$0xf0]  ;;  %v6200_v61 = vor.u32 %v6860_v21, %v6199_v20  ;;  %v6087_v53 = vld [vmem:[%s10249_s1 + $0xe68] sm:$0xf]  ;;  %v4364_v20 = vor.u32 %v6398_v59, %v4361_v60 }
 0x163   :  { %3620 = vmatpush.bf16.msra.mxu0 %v5528_v51  ;;  %v6120_v29 = vor.u32 %v6840_v12, %v6119_v11  ;;  %v6756_v51 = vld [vmem:[%s10249_s1 + $0xc14] sm:$0xf0]  ;;  %v3401_v58 = vpop.f32.mrf.mxu0  ;;  %v6071_v10 = vld [vmem:[%s10249_s1 + $0xe48] sm:$0xf] }
 0x164   :  { %3633 = vmatpush.bf16.msra.mxu1 %v5656_v47  ;;  %v6832_v47 = vld [vmem:[%s10249_s1 + $0xe74] sm:$0xf0]  ;;  %v3402_v0 = vadd.f32 %v3401_v58, %v3389_v39  ;;  %v3414_v1 = vpop.f32.mrf.mxu1  ;;  %v5784_v14 = vor.u32 %v6756_v51, %v5783_v63  ;;  %v4457_v51 = vld [vmem:[%s10249_s1 + $0x1b8] sm:$0xf0] }
 0x165   :  { %3641 = vmatpush.bf16.msrb.mxu2 %v5864_v46  ;;  %v6104_v46 = vor.u32 %v6836_v36, %v6103_v35  ;;  %v6088_v2 = vor.u32 %v6832_v47, %v6087_v53  ;;  %v6828_v11 = vld [vmem:[%s10249_s1 + $0xe54] sm:$0xf0]  ;;  %v4601_v35 = vld [vmem:[%s10249_s1 + $0x2d8] sm:$0xf0]  ;;  %v6055_v36 = vld [vmem:[%s10249_s1 + $0xe28] sm:$0xf] }
 0x166   :  { %3654 = vmatpush.bf16.msrb.mxu3 %v5992_v43  ;;  %3621 = vmatmul.bf16.vlgmr.msra.gmra.mxu0 %v7618_v22  ;;  %v6792_v43 = vld [vmem:[%s10249_s1 + $0xd34] sm:$0xf0]  ;;  %v4585_v53 = vld [vmem:[%s10249_s1 + $0x2b8] sm:$0xf0] }
 0x167   :  { %3665 = vmatpush.bf16.msrb.mxu0 %v6152_v54  ;;  %3634 = vmatmul.bf16.vlgmr.msra.gmra.mxu1 %v7628_v27  ;;  %v5928_v49 = vor.u32 %v6792_v43, %v5927_v33  ;;  %v5800_v54 = vor.u32 %v6760_v16, %v5799_v45  ;;  %v6458_v33 = vld [vmem:[%s10249_s1 + $0x2cc] sm:$0xf]  ;;  %v6824_v39 = vld [vmem:[%s10249_s1 + $0xe34] sm:$0xf0]  ;;  %v4745_v58 = vld [vmem:[%s10249_s1 + $0x3f8] sm:$0xf0] }
 0x168   :  { %3681 = vmatpush.bf16.msrb.mxu1 %v6232_v56  ;;  %v6167_v56 = vld [vmem:[%s10249_s1 + $0xf08] sm:$0xf]  ;;  %v3390_v12 = vpop.f32.mrf.mxu3  ;;  %v4604_v45 = vor.u32 %v6458_v33, %v4601_v35  ;;  %v6390_v16 = vld [vmem:[%s10249_s1 + $0xac] sm:$0xf]  ;;  %v6056_v63 = vor.u32 %v6824_v39, %v6055_v36  ;;  %v4713_v35 = vld [vmem:[%s10249_s1 + $0x3b8] sm:$0xf0] }
 0x169   :  { %3642 = vmatpush.bf16.msrb.mxu2 %v5848_v62  ;;  %v6430_v62 = vld [vmem:[%s10249_s1 + $0x1ec] sm:$0xf]  ;;  %v4729_v12 = vld [vmem:[%s10249_s1 + $0x3d8] sm:$0xf0] }
 0x16a   :  { %3655 = vmatpush.bf16.msrb.mxu3 %v5976_v55  ;;  %v6788_v55 = vld [vmem:[%s10249_s1 + $0xd14] sm:$0xf0]  ;;  %v4492_v21 = vor.u32 %v6430_v62, %v4489_v3  ;;  %v6386_v62 = vld [vmem:[%s10249_s1 + $0x8c] sm:$0xf]  ;;  %v4441_v3 = vld [vmem:[%s10249_s1 + $0x198] sm:$0xf0] }
 0x16b   :  { %3666 = vmatpush.bf16.msrb.mxu0 %v6136_v30  ;;  %v4617_v30 = vld [vmem:[%s10249_s1 + $0x2f8] sm:$0xf0]  ;;  %v6486_v33 = vld [vmem:[%s10249_s1 + $0x3ac] sm:$0xf] }
 0x16c   :  { %3682 = vmatpush.bf16.msrb.mxu1 %v6216_v7  ;;  %v6168_v7 = vor.u32 %v6852_v57, %v6167_v56  ;;  %v4620_v24 = vor.u32 %v6462_v4, %v4617_v30  ;;  %v3416_v47 = vpop.f32.mrf.mxu1  ;;  %v6494_v57 = vld [vmem:[%s10249_s1 + $0x3ec] sm:$0xf]  ;;  %v4569_v30 = vld [vmem:[%s10249_s1 + $0x298] sm:$0xf0] }
 0x16d   :  { %3643 = vmatpush.bf16.msrb.mxu2 %v5832_v13  ;;  %v3415_v13 = vadd.f32 %v3414_v1, %v3402_v0  ;;  %v4313_v0 = vld [vmem:[%s10249_s1 + $0x98] sm:$0xf0]  ;;  %v6418_v1 = vld [vmem:[%s10249_s1 + $0x18c] sm:$0xf] }
 0x16e   :  { %3656 = vmatpush.bf16.msrb.mxu3 %v5960_v5  ;;  %v5912_v5 = vor.u32 %v6788_v55, %v5911_v52  ;;  %v6454_v52 = vld [vmem:[%s10249_s1 + $0x2ac] sm:$0xf]  ;;  %v6820_v55 = vld [vmem:[%s10249_s1 + $0xe14] sm:$0xf0] }
 0x16f   :  { %3667 = vmatpush.bf16.msrb.mxu0 %v6120_v29  ;;  %v4345_v29 = vld [vmem:[%s10249_s1 + $0xd8] sm:$0xf0]  ;;  %v4588_v60 = vor.u32 %v6454_v52, %v4585_v53  ;;  %v6450_v4 = vld [vmem:[%s10249_s1 + $0x28c] sm:$0xf] }
 0x170   :  { %3683 = vmatpush.bf16.msrb.mxu1 %v6200_v61  ;;  %v4473_v61 = vld [vmem:[%s10249_s1 + $0x1d8] sm:$0xf0]  ;;  %v4348_v43 = vor.u32 %v6394_v28, %v4345_v29  ;;  %v6446_v29 = vld [vmem:[%s10249_s1 + $0x26c] sm:$0xf] }
 0x171   :  { %3644 = vmatpush.bf16.msrb.mxu2 %v5816_v42  ;;  %v3427_v42 = vpop.f32.mrf.mxu2  ;;  %v4476_v44 = vor.u32 %v6426_v31, %v4473_v61  ;;  %v4425_v28 = vld [vmem:[%s10249_s1 + $0x178] sm:$0xf0] }
 0x172   :  { %3657 = vmatpush.bf16.msrb.mxu3 %v5944_v32  ;;  %v6072_v32 = vor.u32 %v6828_v11, %v6071_v10  ;;  %v9367_v6 = vadd.f32 %v3427_v42, %v3415_v13  ;;  %v6490_v11 = vld [vmem:[%s10249_s1 + $0x3cc] sm:$0xf]  ;;  %v4444_v13 = vor.u32 %v6418_v1, %v4441_v3  ;;  %v4553_v31 = vld [vmem:[%s10249_s1 + $0x278] sm:$0xf0] }
 0x173   :  { %3668 = vmatpush.bf16.msrb.mxu0 %v6104_v46  ;;  %v4329_v46 = vld [vmem:[%s10249_s1 + $0xb8] sm:$0xf0]  ;;  %v4556_v39 = vor.u32 %v6446_v29, %v4553_v31  ;;  %v6378_v42 = vld [vmem:[%s10249_s1 + $0x4c] sm:$0xf] }
 0x174   :  { %3684 = vmatpush.bf16.msrb.mxu1 %v6184_v50  ;;  %v3403_v50 = vpop.f32.mrf.mxu0  ;;  %v4332_v56 = vor.u32 %v6390_v16, %v4329_v46  ;;  %v6442_v16 = vld [vmem:[%s10249_s1 + $0x24c] sm:$0xf]  ;;  %v4537_v46 = vld [vmem:[%s10249_s1 + $0x258] sm:$0xf0] }
 0x175   :  { %3645 = vmatpush.bf16.msrb.mxu2 %v5800_v54  ;;  %v6039_v54 = vld [vmem:[%s10249_s1 + $0xe08] sm:$0xf]  ;;  %v4540_v47 = vor.u32 %v6442_v16, %v4537_v46  ;;  %v6370_v1 = vld [vmem:[%s10249_s1 + $0xc] sm:$0xf]  ;;  %v5001_v31 = vld [vmem:[%s10249_s1 + $0x5f8] sm:$0xf0] }
 0x176   :  { %3658 = vmatpush.bf16.msrb.mxu3 %v5928_v49  ;;  %v6422_v49 = vld [vmem:[%s10249_s1 + $0x1ac] sm:$0xf] }
 0x177   :  { %3669 = vmatpush.bf16.msrb.mxu0 %v6088_v2  ;;  %v4460_v59 = vor.u32 %v6422_v49, %v4457_v51  ;;  %v6040_v2 = vor.u32 %v6820_v55, %v6039_v54  ;;  %v4716_v49 = vor.u32 %v6486_v33, %v4713_v35  ;;  %v4697_v51 = vld [vmem:[%s10249_s1 + $0x398] sm:$0xf0]  ;;  %v6374_v54 = vld [vmem:[%s10249_s1 + $0x2c] sm:$0xf] }
 0x178   :  { %3685 = vmatpush.bf16.msrb.mxu1 %v6168_v7  ;;  %v4316_v7 = vor.u32 %v6386_v62, %v4313_v0  ;;  %v4265_v55 = vld [vmem:[%s10249_s1 + $0x38] sm:$0xf0]  ;;  %v6478_v3 = vld [vmem:[%s10249_s1 + $0x36c] sm:$0xf] }
 0x179   :  { %3646 = vmatpush.bf16.msrb.mxu2 %v5784_v14  ;;  %v3429_v10 = vpop.f32.mrf.mxu2  ;;  %v4572_v14 = vor.u32 %v6450_v4, %v4569_v30  ;;  %v4681_v4 = vld [vmem:[%s10249_s1 + $0x378] sm:$0xf0]  ;;  %v6558_v29 = vld [vmem:[%s10249_s1 + $0x5ec] sm:$0xf] }
 0x17a   :  { %3659 = vmatpush.bf16.msrb.mxu3 %v5912_v5  ;;  %v4748_v5 = vor.u32 %v6494_v57, %v4745_v58  ;;  %v4393_v58 = vld [vmem:[%s10249_s1 + $0x138] sm:$0xf0]  ;;  %v6474_v35 = vld [vmem:[%s10249_s1 + $0x34c] sm:$0xf]  ;;  %v5004_v16 = vor.u32 %v6558_v29, %v5001_v31 }
 0x17b   :  { %3670 = vmatpush.bf16.msrb.mxu0 %v6072_v32  ;;  %6239 = vmatmul.msk.bf16.vlgmr.msrb.gmra.mxu1 %vm3063_vm0, %v7757_v41  ;;  %v4732_v32 = vor.u32 %v6490_v11, %v4729_v12  ;;  %v4377_v10 = vld [vmem:[%s10249_s1 + $0x118] sm:$0xf0]  ;;  %v6434_v11 = vld [vmem:[%s10249_s1 + $0x20c] sm:$0xf] }
 0x17c   :  { %3691 = vmatpush.bf16.msra.mxu1 %v4364_v20  ;;  %3647 = vmatmul.bf16.vlgmr.msrb.gmra.mxu2 %v7833_v17  ;;  %v6382_v20 = vld [vmem:[%s10249_s1 + $0x6c] sm:$0xf]  ;;  %v5129_v33 = vld [vmem:[%s10249_s1 + $0x6f8] sm:$0xf0] }
 0x17d   :  { %3704 = vmatpush.bf16.msra.mxu2 %v4492_v21  ;;  %3660 = vmatmul.bf16.vlgmr.msrb.gmra.mxu3 %v7846_v26  ;;  %v4297_v21 = vld [vmem:[%s10249_s1 + $0x78] sm:$0xf0]  ;;  %v6522_v46 = vld [vmem:[%s10249_s1 + $0x4cc] sm:$0xf] }
 0x17e   :  { %3717 = vmatpush.bf16.msra.mxu3 %v4620_v24  ;;  %v6414_v24 = vld [vmem:[%s10249_s1 + $0x16c] sm:$0xf]  ;;  %v4300_v61 = vor.u32 %v6382_v20, %v4297_v21  ;;  %v4873_v20 = vld [vmem:[%s10249_s1 + $0x4f8] sm:$0xf0] }
 0x17f   :  { %3671 = vmatpush.bf16.msrb.mxu0 %v6056_v63  ;;  %v4428_v36 = vor.u32 %v6414_v24, %v4425_v28  ;;  %v6482_v63 = vld [vmem:[%s10249_s1 + $0x38c] sm:$0xf]  ;;  %v4684_v28 = vor.u32 %v6478_v3, %v4681_v4  ;;  %v4969_v3 = vld [vmem:[%s10249_s1 + $0x5b8] sm:$0xf0] }
 0x180   :  { %3692 = vmatpush.bf16.msra.mxu1 %v4348_v43  ;;  %v4281_v43 = vld [vmem:[%s10249_s1 + $0x58] sm:$0xf0]  ;;  %v3440_v52 = vpop.f32.mrf.mxu3  ;;  %v4700_v0 = vor.u32 %v6482_v63, %v4697_v51  ;;  %v6582_v4 = vld [vmem:[%s10249_s1 + $0x6ac] sm:$0xf] }
 0x181   :  { %3705 = vmatpush.bf16.msra.mxu2 %v4476_v44  ;;  %v6410_v44 = vld [vmem:[%s10249_s1 + $0x14c] sm:$0xf]  ;;  %v4284_v50 = vor.u32 %v6378_v42, %v4281_v43  ;;  %v3441_v57 = vadd.f32 %v3440_v52, %v9367_v6  ;;  %v3479_v62 = vpop.f32.mrf.mxu2  ;;  %v4268_v6 = vor.u32 %v6374_v54, %v4265_v55  ;;  %v5113_v55 = vld [vmem:[%s10249_s1 + $0x6d8] sm:$0xf0] }
 0x182   :  { %3718 = vmatpush.bf16.msra.mxu3 %v4604_v45  ;;  %v4409_v45 = vld [vmem:[%s10249_s1 + $0x158] sm:$0xf0]  ;;  %v6586_v54 = vld [vmem:[%s10249_s1 + $0x6cc] sm:$0xf] }
 0x183   :  { %3672 = vmatpush.bf16.msrb.mxu0 %v6040_v2  ;;  %v4412_v53 = vor.u32 %v6410_v44, %v4409_v45  ;;  %v4249_v2 = vld [vmem:[%s10249_s1 + $0x18] sm:$0xf0]  ;;  %v3453_v12 = vpop.f32.mrf.mxu0 }
 0x184   :  { %3693 = vmatpush.bf16.msra.mxu1 %v4332_v56  ;;  %v6406_v56 = vld [vmem:[%s10249_s1 + $0x12c] sm:$0xf]  ;;  %v3454_v21 = vadd.f32 %v3453_v12, %v3441_v57  ;;  %v3466_v24 = vpop.f32.mrf.mxu1  ;;  %v4649_v57 = vld [vmem:[%s10249_s1 + $0x338] sm:$0xf0] }
 0x185   :  { %3706 = vmatpush.bf16.msra.mxu2 %v4460_v59  ;;  %v6438_v59 = vld [vmem:[%s10249_s1 + $0x22c] sm:$0xf]  ;;  %v4396_v30 = vor.u32 %v6406_v56, %v4393_v58  ;;  %v5257_v12 = vld [vmem:[%s10249_s1 + $0x7f8] sm:$0xf0] }
 0x186   :  { %3719 = vmatpush.bf16.msra.mxu3 %v4588_v60  ;;  %3673 = vmatmul.bf16.vlgmr.msrb.gmra.mxu0 %v7835_v19  ;;  %v4521_v60 = vld [vmem:[%s10249_s1 + $0x238] sm:$0xf0]  ;;  %v6470_v56 = vld [vmem:[%s10249_s1 + $0x32c] sm:$0xf] }
 0x187   :  { %3730 = vmatpush.bf16.msra.mxu0 %v4748_v5  ;;  %v4524_v5 = vor.u32 %v6438_v59, %v4521_v60  ;;  %v6518_v60 = vld [vmem:[%s10249_s1 + $0x4ac] sm:$0xf]  ;;  %v5081_v29 = vld [vmem:[%s10249_s1 + $0x698] sm:$0xf0] }
 0x188   :  { %3694 = vmatpush.bf16.msra.mxu1 %v4316_v7  ;;  %v6402_v7 = vld [vmem:[%s10249_s1 + $0x10c] sm:$0xf]  ;;  %v3442_v44 = vpop.f32.mrf.mxu3 }
 0x189   :  { %3707 = vmatpush.bf16.msra.mxu2 %v4444_v13  ;;  %v4505_v13 = vld [vmem:[%s10249_s1 + $0x218] sm:$0xf0]  ;;  %v4380_v42 = vor.u32 %v6402_v7, %v4377_v10  ;;  %v6466_v7 = vld [vmem:[%s10249_s1 + $0x30c] sm:$0xf] }
 0x18a   :  { %3720 = vmatpush.bf16.msra.mxu3 %v4572_v14  ;;  %v6526_v14 = vld [vmem:[%s10249_s1 + $0x4ec] sm:$0xf]  ;;  %v4508_v43 = vor.u32 %v6434_v11, %v4505_v13  ;;  %v4633_v10 = vld [vmem:[%s10249_s1 + $0x318] sm:$0xf0] }
 0x18b   :  { %3731 = vmatpush.bf16.msra.mxu0 %v4732_v32  ;;  %v6590_v32 = vld [vmem:[%s10249_s1 + $0x6ec] sm:$0xf]  ;;  %v4876_v45 = vor.u32 %v6526_v14, %v4873_v20  ;;  %v4636_v20 = vor.u32 %v6466_v7, %v4633_v10  ;;  %v4937_v44 = vld [vmem:[%s10249_s1 + $0x578] sm:$0xf0] }
 0x18c   :  { %3695 = vmatpush.bf16.msra.mxu1 %v4300_v61  ;;  %v4252_v61 = vor.u32 %v6370_v1, %v4249_v2  ;;  %v5132_v51 = vor.u32 %v6590_v32, %v5129_v33  ;;  %v5116_v1 = vor.u32 %v6586_v54, %v5113_v55  ;;  %v6550_v2 = vld [vmem:[%s10249_s1 + $0x5ac] sm:$0xf]  ;;  %v4793_v54 = vld [vmem:[%s10249_s1 + $0x458] sm:$0xf0] }
 0x18d   :  { %3708 = vmatpush.bf16.msra.mxu2 %v4428_v36  ;;  %v4665_v36 = vld [vmem:[%s10249_s1 + $0x358] sm:$0xf0]  ;;  %v6622_v11 = vld [vmem:[%s10249_s1 + $0x7ec] sm:$0xf]  ;;  %v4972_v14 = vor.u32 %v6550_v2, %v4969_v3 }
 0x18e   :  { %3721 = vmatpush.bf16.msra.mxu3 %v4556_v39  ;;  %v3467_v39 = vadd.f32 %v3466_v24, %v3454_v21  ;;  %v4668_v52 = vor.u32 %v6474_v35, %v4665_v36  ;;  %v4825_v21 = vld [vmem:[%s10249_s1 + $0x498] sm:$0xf0]  ;;  %v5260_v31 = vor.u32 %v6622_v11, %v5257_v12  ;;  %v6618_v32 = vld [vmem:[%s10249_s1 + $0x7cc] sm:$0xf] }
 0x18f   :  { %3732 = vmatpush.bf16.msra.mxu0 %v4716_v49  ;;  %v4857_v49 = vld [vmem:[%s10249_s1 + $0x4d8] sm:$0xf0]  ;;  %v6510_v36 = vld [vmem:[%s10249_s1 + $0x46c] sm:$0xf] }
 0x190   :  { %3696 = vmatpush.bf16.msra.mxu1 %v4284_v50  ;;  %v3481_v50 = vpop.f32.mrf.mxu2  ;;  %v9549_v63 = vadd.f32 %v3479_v62, %v3467_v39  ;;  %v4860_v58 = vor.u32 %v6522_v46, %v4857_v49  ;;  %v4841_v62 = vld [vmem:[%s10249_s1 + $0x4b8] sm:$0xf0]  ;;  %v6614_v49 = vld [vmem:[%s10249_s1 + $0x7ac] sm:$0xf] }
 0x191   :  { %3709 = vmatpush.bf16.msra.mxu2 %v4412_v53  ;;  %v6554_v53 = vld [vmem:[%s10249_s1 + $0x5cc] sm:$0xf]  ;;  %v4844_v13 = vor.u32 %v6518_v60, %v4841_v62  ;;  %v4953_v24 = vld [vmem:[%s10249_s1 + $0x598] sm:$0xf0]  ;;  %v9672_v60 = vld [vmem:[%s10251_s2] sm:$0xf] }
 0x192   :  { %3722 = vmatpush.bf16.msra.mxu3 %v4540_v47  ;;  %v4985_v47 = vld [vmem:[%s10249_s1 + $0x5d8] sm:$0xf0]  ;;  %v6538_v55 = vld [vmem:[%s10249_s1 + $0x54c] sm:$0xf]  ;;  %v557_v62 = vperm.slane %v9672_v60, 2 }
 0x193   :  { %3733 = vmatpush.bf16.msra.mxu0 %v4700_v0  ;;  %v4988_v59 = vor.u32 %v6554_v53, %v4985_v47  ;;  %v3455_v0 = vpop.f32.mrf.mxu0  ;;  %v5225_v50 = vld [vmem:[%s10249_s1 + $0x7b8] sm:$0xf0]  ;;  %v6506_v53 = vld [vmem:[%s10249_s1 + $0x44c] sm:$0xf] }
 0x194   :  { %3697 = vmatpush.bf16.msra.mxu1 %v4268_v6  ;;  %v4652_v6 = vor.u32 %v6470_v56, %v4649_v57  ;;  %v4921_v56 = vld [vmem:[%s10249_s1 + $0x558] sm:$0xf0]  ;;  %v6570_v57 = vld [vmem:[%s10249_s1 + $0x64c] sm:$0xf] }
 0x195   :  { %3710 = vmatpush.bf16.msra.mxu2 %v4396_v30  ;;  %v3468_v30 = vpop.f32.mrf.mxu1  ;;  %v5209_v0 = vld [vmem:[%s10249_s1 + $0x798] sm:$0xf0]  ;;  %v6502_v2 = vld [vmem:[%s10249_s1 + $0x42c] sm:$0xf] }
 0x196   :  { %3723 = vmatpush.bf16.msra.mxu3 %v4524_v5  ;;  %v5097_v5 = vld [vmem:[%s10249_s1 + $0x6b8] sm:$0xf0]  ;;  %v6566_v11 = vld [vmem:[%s10249_s1 + $0x62c] sm:$0xf] }
 0x197   :  { %3734 = vmatpush.bf16.msra.mxu0 %v4684_v28  ;;  %v6578_v28 = vld [vmem:[%s10249_s1 + $0x68c] sm:$0xf]  ;;  %v4777_v30 = vld [vmem:[%s10249_s1 + $0x438] sm:$0xf0] }
 0x198   :  { %3698 = vmatpush.bf16.msra.mxu1 %v4252_v61  ;;  %v5241_v61 = vld [vmem:[%s10249_s1 + $0x7d8] sm:$0xf0]  ;;  %v5084_v39 = vor.u32 %v6578_v28, %v5081_v29  ;;  %v6530_v28 = vld [vmem:[%s10249_s1 + $0x50c] sm:$0xf] }
 0x199   :  { %3711 = vmatpush.bf16.msra.mxu2 %v4380_v42  ;;  %v4809_v42 = vld [vmem:[%s10249_s1 + $0x478] sm:$0xf0]  ;;  %v5244_v46 = vor.u32 %v6618_v32, %v5241_v61  ;;  %v6562_v61 = vld [vmem:[%s10249_s1 + $0x60c] sm:$0xf] }
 0x19a   :  { %3724 = vmatpush.bf16.msra.mxu3 %v4508_v43  ;;  %v6542_v43 = vld [vmem:[%s10249_s1 + $0x56c] sm:$0xf]  ;;  %v4905_v7 = vld [vmem:[%s10249_s1 + $0x538] sm:$0xf0] }
 0x19b   :  { %3735 = vmatpush.bf16.msra.mxu0 %v4668_v52  ;;  %3699 = vmatmul.bf16.vlgmr.msra.gmra.mxu1 %v7219_v9  ;;  %v6546_v9 = vld [vmem:[%s10249_s1 + $0x58c] sm:$0xf]  ;;  %v4940_v52 = vor.u32 %v6542_v43, %v4937_v44  ;;  %v5033_v12 = vld [vmem:[%s10249_s1 + $0x638] sm:$0xf0] }
 0x19c   :  { %3743 = vmatpush.bf16.msrb.mxu1 %v4876_v45  ;;  %3712 = vmatmul.bf16.vlgmr.msra.gmra.mxu2 %v7256_v25  ;;  %v6514_v25 = vld [vmem:[%s10249_s1 + $0x48c] sm:$0xf]  ;;  %v4956_v35 = vor.u32 %v6546_v9, %v4953_v24  ;;  %v4761_v24 = vld [vmem:[%s10249_s1 + $0x418] sm:$0xf0] }
 0x19d   :  { %3756 = vmatpush.bf16.msrb.mxu2 %v5004_v16  ;;  %3725 = vmatmul.bf16.vlgmr.msra.gmra.mxu3 %v7217_v8  ;;  %v5100_v8 = vor.u32 %v6582_v4, %v5097_v5  ;;  %v4828_v33 = vor.u32 %v6514_v25, %v4825_v21  ;;  %v6574_v45 = vld [vmem:[%s10249_s1 + $0x66c] sm:$0xf]  ;;  %v5065_v16 = vld [vmem:[%s10249_s1 + $0x678] sm:$0xf0] }
 0x19e   :  { %3769 = vmatpush.bf16.msrb.mxu3 %v5132_v51  ;;  %v4812_v51 = vor.u32 %v6510_v36, %v4809_v42  ;;  %v5068_v47 = vor.u32 %v6574_v45, %v5065_v16  ;;  %v6534_v5 = vld [vmem:[%s10249_s1 + $0x52c] sm:$0xf]  ;;  %v4889_v32 = vld [vmem:[%s10249_s1 + $0x518] sm:$0xf0] }
 0x19f   :  { %3736 = vmatpush.bf16.msra.mxu0 %v4652_v6  ;;  %v4924_v6 = vor.u32 %v6538_v55, %v4921_v56  ;;  %v3492_v10 = vpop.f32.mrf.mxu2  ;;  %v6606_v25 = vld [vmem:[%s10249_s1 + $0x76c] sm:$0xf]  ;;  %v4908_v21 = vor.u32 %v6534_v5, %v4905_v7  ;;  %v5385_v42 = vld [vmem:[%s10249_s1 + $0x8f8] sm:$0xf0] }
 0x1a0   :  { %3744 = vmatpush.bf16.msrb.mxu1 %v4860_v58  ;;  %v5049_v58 = vld [vmem:[%s10249_s1 + $0x658] sm:$0xf0]  ;;  %v3505_v3 = vpop.f32.mrf.mxu3  ;;  %v6498_v9 = vld [vmem:[%s10249_s1 + $0x40c] sm:$0xf] }
 0x1a1   :  { %3757 = vmatpush.bf16.msrb.mxu2 %v4988_v59  ;;  %v5228_v59 = vor.u32 %v6614_v49, %v5225_v50  ;;  %v5052_v4 = vor.u32 %v6570_v57, %v5049_v58  ;;  %v6686_v43 = vld [vmem:[%s10249_s1 + $0x9ec] sm:$0xf]  ;;  %v5513_v16 = vld [vmem:[%s10249_s1 + $0x9f8] sm:$0xf0]  ;;  %v4764_v50 = vor.u32 %v6498_v9, %v4761_v24 }
 0x1a2   :  { %3770 = vmatpush.bf16.msrb.mxu3 %v5116_v1  ;;  %v4796_v1 = vor.u32 %v6506_v53, %v4793_v54  ;;  %v5641_v49 = vld [vmem:[%s10249_s1 + $0xaf8] sm:$0xf0]  ;;  %v5516_v58 = vor.u32 %v6686_v43, %v5513_v16  ;;  %v6594_v24 = vld [vmem:[%s10249_s1 + $0x70c] sm:$0xf] }
 0x1a3   :  { %3737 = vmatpush.bf16.msra.mxu0 %v4636_v20  ;;  %v4780_v20 = vor.u32 %v6502_v2, %v4777_v30  ;;  %v5177_v53 = vld [vmem:[%s10249_s1 + $0x758] sm:$0xf0]  ;;  %v6714_v2 = vld [vmem:[%s10249_s1 + $0xacc] sm:$0xf] }
 0x1a4   :  { %3745 = vmatpush.bf16.msrb.mxu1 %v4844_v13  ;;  %v3531_v45 = vpop.f32.mrf.mxu1  ;;  %v5161_v30 = vld [vmem:[%s10249_s1 + $0x738] sm:$0xf0] }
 0x1a5   :  { %3758 = vmatpush.bf16.msrb.mxu2 %v4972_v14  ;;  %v3493_v14 = vadd.f32 %v3492_v10, %v557_v62  ;;  %v6650_v62 = vld [vmem:[%s10249_s1 + $0x8cc] sm:$0xf]  ;;  %v5609_v9 = vld [vmem:[%s10249_s1 + $0xab8] sm:$0xf0] }
 0x1a6   :  { %3771 = vmatpush.bf16.msrb.mxu3 %v5100_v8  ;;  %3738 = vmatmul.bf16.vlgmr.msra.gmra.mxu0 %v7233_v15  ;;  %v6610_v15 = vld [vmem:[%s10249_s1 + $0x78c] sm:$0xf]  ;;  %v5193_v8 = vld [vmem:[%s10249_s1 + $0x778] sm:$0xf0] }
 0x1a7   :  { %3782 = vmatpush.bf16.msrb.mxu0 %v5260_v31  ;;  %v5212_v13 = vor.u32 %v6610_v15, %v5209_v0  ;;  %v3506_v29 = vadd.f32 %v3505_v3, %v3493_v14  ;;  %v5036_v31 = vor.u32 %v6566_v11, %v5033_v12  ;;  %v5196_v36 = vor.u32 %v6606_v25, %v5193_v8  ;;  %v3494_v57 = vpop.f32.mrf.mxu2  ;;  %v5369_v15 = vld [vmem:[%s10249_s1 + $0x8d8] sm:$0xf0]  ;;  %v6682_v0 = vld [vmem:[%s10249_s1 + $0x9cc] sm:$0xf] }
 0x1a8   :  { %3746 = vmatpush.bf16.msrb.mxu1 %v4828_v33  ;;  %v5017_v33 = vld [vmem:[%s10249_s1 + $0x618] sm:$0xf0]  ;;  %v3507_v54 = vpop.f32.mrf.mxu3  ;;  %v5372_v5 = vor.u32 %v6650_v62, %v5369_v15  ;;  %v6646_v12 = vld [vmem:[%s10249_s1 + $0x8ac] sm:$0xf] }
 0x1a9   :  { %3759 = vmatpush.bf16.msrb.mxu2 %v4956_v35  ;;  %v3518_v35 = vpop.f32.mrf.mxu0  ;;  %v5020_v55 = vor.u32 %v6562_v61, %v5017_v33  ;;  %v5625_v3 = vld [vmem:[%s10249_s1 + $0xad8] sm:$0xf0]  ;;  %v6678_v14 = vld [vmem:[%s10249_s1 + $0x9ac] sm:$0xf] }
 0x1aa   :  { %3772 = vmatpush.bf16.msrb.mxu3 %v5084_v39  ;;  %v6654_v39 = vld [vmem:[%s10249_s1 + $0x8ec] sm:$0xf]  ;;  %v3519_v44 = vadd.f32 %v3518_v35, %v3506_v29  ;;  %v5628_v11 = vor.u32 %v6714_v2, %v5625_v3  ;;  %v5753_v16 = vld [vmem:[%s10249_s1 + $0xbd8] sm:$0xf0] }
 0x1ab   :  { %3783 = vmatpush.bf16.msrb.mxu0 %v5244_v46  ;;  %v6718_v46 = vld [vmem:[%s10249_s1 + $0xaec] sm:$0xf]  ;;  %v5388_v56 = vor.u32 %v6654_v39, %v5385_v42  ;;  %v5593_v42 = vld [vmem:[%s10249_s1 + $0xa98] sm:$0xf0] }
 0x1ac   :  { %3747 = vmatpush.bf16.msrb.mxu1 %v4812_v51  ;;  %v4892_v51 = vor.u32 %v6530_v28, %v4889_v32  ;;  %v3533_v25 = vpop.f32.mrf.mxu1  ;;  %v6750_v29 = vld [vmem:[%s10249_s1 + $0xbec] sm:$0xf]  ;;  %v5433_v2 = vld [vmem:[%s10249_s1 + $0x958] sm:$0xf0] }
 0x1ad   :  { %3760 = vmatpush.bf16.msrb.mxu2 %v4940_v52  ;;  %v6602_v52 = vld [vmem:[%s10249_s1 + $0x74c] sm:$0xf]  ;;  %v5289_v25 = vld [vmem:[%s10249_s1 + $0x838] sm:$0xf0] }
 0x1ae   :  { %3773 = vmatpush.bf16.msrb.mxu3 %v5068_v47  ;;  %v9747_v47 = vadd.f32 %v3531_v45, %v3519_v44  ;;  %v6642_v61 = vld [vmem:[%s10249_s1 + $0x88c] sm:$0xf] }
 0x1af   :  { %3784 = vmatpush.bf16.msrb.mxu0 %v5228_v59  ;;  %v5644_v59 = vor.u32 %v6718_v46, %v5641_v49  ;;  %v6674_v33 = vld [vmem:[%s10249_s1 + $0x98c] sm:$0xf] }
 0x1b0   :  { %3748 = vmatpush.bf16.msrb.mxu1 %v4796_v1  ;;  %v5180_v1 = vor.u32 %v6602_v52, %v5177_v53  ;;  %v6706_v39 = vld [vmem:[%s10249_s1 + $0xa8c] sm:$0xf]  ;;  %v5449_v53 = vld [vmem:[%s10249_s1 + $0x978] sm:$0xf0] }
 0x1b1   :  { %3761 = vmatpush.bf16.msrb.mxu2 %v4924_v6  ;;  %v5497_v6 = vld [vmem:[%s10249_s1 + $0x9d8] sm:$0xf0]  ;;  %v3520_v7 = vpop.f32.mrf.mxu0  ;;  %v6746_v45 = vld [vmem:[%s10249_s1 + $0xbcc] sm:$0xf]  ;;  %v5596_v49 = vor.u32 %v6706_v39, %v5593_v42 }
 0x1b2   :  { %3774 = vmatpush.bf16.msrb.mxu3 %v5052_v4  ;;  %v6598_v4 = vld [vmem:[%s10249_s1 + $0x72c] sm:$0xf]  ;;  %v5500_v10 = vor.u32 %v6682_v0, %v5497_v6  ;;  %v5721_v7 = vld [vmem:[%s10249_s1 + $0xb98] sm:$0xf0] }
 0x1b3   :  { %3785 = vmatpush.bf16.msrb.mxu0 %v5212_v13  ;;  %v5353_v13 = vld [vmem:[%s10249_s1 + $0x8b8] sm:$0xf0]  ;;  %v5164_v8 = vor.u32 %v6598_v4, %v5161_v30  ;;  %v6670_v52 = vld [vmem:[%s10249_s1 + $0x96c] sm:$0xf] }
 0x1b4   :  { %3749 = vmatpush.bf16.msrb.mxu1 %v4780_v20  ;;  %v5481_v20 = vld [vmem:[%s10249_s1 + $0x9b8] sm:$0xf0]  ;;  %v5356_v28 = vor.u32 %v6646_v12, %v5353_v13  ;;  %v6702_v54 = vld [vmem:[%s10249_s1 + $0xa6c] sm:$0xf]  ;;  %v5452_v62 = vor.u32 %v6670_v52, %v5449_v53 }
 0x1b5   :  { %3762 = vmatpush.bf16.msrb.mxu2 %v4908_v21  ;;  %v6710_v21 = vld [vmem:[%s10249_s1 + $0xaac] sm:$0xf]  ;;  %v5561_v4 = vld [vmem:[%s10249_s1 + $0xa58] sm:$0xf0] }
 0x1b6   :  { %3775 = vmatpush.bf16.msrb.mxu3 %v5036_v31  ;;  %v5484_v31 = vor.u32 %v6678_v14, %v5481_v20  ;;  %v5612_v32 = vor.u32 %v6710_v21, %v5609_v9  ;;  %v6634_v0 = vld [vmem:[%s10249_s1 + $0x84c] sm:$0xf]  ;;  %v5417_v20 = vld [vmem:[%s10249_s1 + $0x938] sm:$0xf0] }
 0x1b7   :  { %3786 = vmatpush.bf16.msrb.mxu0 %v5196_v36  ;;  %v5465_v36 = vld [vmem:[%s10249_s1 + $0x998] sm:$0xf0]  ;;  %v6666_v6 = vld [vmem:[%s10249_s1 + $0x94c] sm:$0xf] }
 0x1b8   :  { %3750 = vmatpush.bf16.msrb.mxu1 %v4764_v50  ;;  %v5468_v46 = vor.u32 %v6674_v33, %v5465_v36  ;;  %v6638_v50 = vld [vmem:[%s10249_s1 + $0x86c] sm:$0xf]  ;;  %v5545_v9 = vld [vmem:[%s10249_s1 + $0xa38] sm:$0xf0] }
 0x1b9   :  { %3763 = vmatpush.bf16.msrb.mxu2 %v4892_v51  ;;  %v5321_v51 = vld [vmem:[%s10249_s1 + $0x878] sm:$0xf0]  ;;  %v6698_v3 = vld [vmem:[%s10249_s1 + $0xa4c] sm:$0xf] }
 0x1ba   :  { %3776 = vmatpush.bf16.msrb.mxu3 %v5020_v55  ;;  %v5577_v55 = vld [vmem:[%s10249_s1 + $0xa78] sm:$0xf0]  ;;  %v5324_v57 = vor.u32 %v6638_v50, %v5321_v51  ;;  %v5564_v12 = vor.u32 %v6698_v3, %v5561_v4  ;;  %v6630_v14 = vld [vmem:[%s10249_s1 + $0x82c] sm:$0xf] }
 0x1bb   :  { %3787 = vmatpush.bf16.msrb.mxu0 %v5180_v1  ;;  %3751 = vmatmul.bf16.vlgmr.msrb.gmra.mxu1 %v7408_v37  ;;  %v5337_v37 = vld [vmem:[%s10249_s1 + $0x898] sm:$0xf0]  ;;  %v5580_v15 = vor.u32 %v6702_v54, %v5577_v55  ;;  %v6694_v21 = vld [vmem:[%s10249_s1 + $0xa2c] sm:$0xf] }
 0x1bc   :  { %3795 = vmatpush.bf16.msra.mxu1 %v5388_v56  ;;  %3764 = vmatmul.bf16.vlgmr.msrb.gmra.mxu2 %v7412_v40  ;;  %v5145_v40 = vld [vmem:[%s10249_s1 + $0x718] sm:$0xf0]  ;;  %v5340_v44 = vor.u32 %v6642_v61, %v5337_v37  ;;  %v5756_v56 = vor.u32 %v6746_v45, %v5753_v16  ;;  %v6658_v33 = vld [vmem:[%s10249_s1 + $0x90c] sm:$0xf] }
 0x1bd   :  { %3808 = vmatpush.bf16.msra.mxu2 %v5516_v58  ;;  %3777 = vmatmul.bf16.vlgmr.msrb.gmra.mxu3 %v7400_v34  ;;  %v5769_v34 = vld [vmem:[%s10249_s1 + $0xbf8] sm:$0xf0]  ;;  %v5148_v35 = vor.u32 %v6594_v24, %v5145_v40  ;;  %v6742_v58 = vld [vmem:[%s10249_s1 + $0xbac] sm:$0xf]  ;;  %v5292_v40 = vor.u32 %v6630_v14, %v5289_v25 }
 0x1be   :  { %3821 = vmatpush.bf16.msra.mxu3 %v5644_v59  ;;  %v5772_v43 = vor.u32 %v6750_v29, %v5769_v34  ;;  %v5737_v59 = vld [vmem:[%s10249_s1 + $0xbb8] sm:$0xf0]  ;;  %v6734_v29 = vld [vmem:[%s10249_s1 + $0xb6c] sm:$0xf] }
 0x1bf   :  { %3788 = vmatpush.bf16.msrb.mxu0 %v5164_v8  ;;  %v5305_v1 = vld [vmem:[%s10249_s1 + $0x858] sm:$0xf0]  ;;  %v5740_v30 = vor.u32 %v6742_v58, %v5737_v59  ;;  %v9881_v13 = vpop.f32.mrf.mxu2  ;;  %v6662_v8 = vld [vmem:[%s10249_s1 + $0x92c] sm:$0xf] }
 0x1c0   :  { %3796 = vmatpush.bf16.msra.mxu1 %v5372_v5  ;;  %v5308_v5 = vor.u32 %v6634_v0, %v5305_v1  ;;  %v5705_v34 = vld [vmem:[%s10249_s1 + $0xb78] sm:$0xf0]  ;;  %v6690_v36 = vld [vmem:[%s10249_s1 + $0xa0c] sm:$0xf] }
 0x1c1   :  { %3809 = vmatpush.bf16.msra.mxu2 %v5500_v10  ;;  %v9879_v10 = vpop.f32.mrf.mxu3  ;;  %v5273_v37 = vld [vmem:[%s10249_s1 + $0x818] sm:$0xf0]  ;;  %v6814_v16 = vld [vmem:[%s10249_s1 + $0xdec] sm:$0xf] }
 0x1c2   :  { %3822 = vmatpush.bf16.msra.mxu3 %v5628_v11  ;;  %v5436_v11 = vor.u32 %v6666_v6, %v5433_v2  ;;  %v5529_v39 = vld [vmem:[%s10249_s1 + $0xa18] sm:$0xf0]  ;;  %v6846_v50 = vld [vmem:[%s10249_s1 + $0xeec] sm:$0xf] }
 0x1c3   :  { %3789 = vmatpush.bf16.msrb.mxu0 %v5148_v35  ;;  %v9910_v61 = vpop.f32.mrf.mxu0  ;;  %v5401_v35 = vld [vmem:[%s10249_s1 + $0x918] sm:$0xf0]  ;;  %v5532_v54 = vor.u32 %v6690_v36, %v5529_v39  ;;  %v6730_v55 = vld [vmem:[%s10249_s1 + $0xb4c] sm:$0xf] }
 0x1c4   :  { %3797 = vmatpush.bf16.msra.mxu1 %v5356_v28  ;;  %v6626_v28 = vld [vmem:[%s10249_s1 + $0x80c] sm:$0xf]  ;;  %v9927_v42 = vpop.f32.mrf.mxu1  ;;  %v5897_v45 = vld [vmem:[%s10249_s1 + $0xcf8] sm:$0xf0]  ;;  %v5404_v53 = vor.u32 %v6658_v33, %v5401_v35 }
 0x1c5   :  { %3810 = vmatpush.bf16.msra.mxu2 %v5484_v31  ;;  %v5420_v31 = vor.u32 %v6662_v8, %v5417_v20  ;;  %v6153_v51 = vld [vmem:[%s10249_s1 + $0xef8] sm:$0xf0]  ;;  %v6810_v1 = vld [vmem:[%s10249_s1 + $0xdcc] sm:$0xf] }
 0x1c6   :  { %3823 = vmatpush.bf16.msra.mxu3 %v5612_v32  ;;  %3790 = vmatmul.bf16.vlgmr.msrb.gmra.mxu0 %v7410_v38  ;;  %v6738_v38 = vld [vmem:[%s10249_s1 + $0xb8c] sm:$0xf]  ;;  %v5548_v32 = vor.u32 %v6694_v21, %v5545_v9  ;;  %v5881_v0 = vld [vmem:[%s10249_s1 + $0xcd8] sm:$0xf0] }
 0x1c7   :  { %3834 = vmatpush.bf16.msra.mxu0 %v5772_v43  ;;  %v5724_v24 = vor.u32 %v6738_v38, %v5721_v7  ;;  %v6782_v43 = vld [vmem:[%s10249_s1 + $0xcec] sm:$0xf]  ;;  %v6009_v6 = vld [vmem:[%s10249_s1 + $0xdd8] sm:$0xf0] }
 0x1c8   :  { %3798 = vmatpush.bf16.msra.mxu1 %v5340_v44  ;;  %v5708_v44 = vor.u32 %v6734_v29, %v5705_v34  ;;  %v5900_v58 = vor.u32 %v6782_v43, %v5897_v45  ;;  %v6842_v3 = vld [vmem:[%s10249_s1 + $0xecc] sm:$0xf]  ;;  %v6137_v4 = vld [vmem:[%s10249_s1 + $0xed8] sm:$0xf0] }
 0x1c9   :  { %3811 = vmatpush.bf16.msra.mxu2 %v5468_v46  ;;  %v6025_v46 = vld [vmem:[%s10249_s1 + $0xdf8] sm:$0xf0]  ;;  %v3559_v52 = vpop.f32.mrf.mxu3  ;;  %v6140_v25 = vor.u32 %v6842_v3, %v6137_v4  ;;  %v6806_v20 = vld [vmem:[%s10249_s1 + $0xdac] sm:$0xf] }
 0x1ca   :  { %3824 = vmatpush.bf16.msra.mxu3 %v5596_v49  ;;  %v5276_v49 = vor.u32 %v6626_v28, %v5273_v37  ;;  %v6028_v59 = vor.u32 %v6814_v16, %v6025_v46  ;;  %v5865_v8 = vld [vmem:[%s10249_s1 + $0xcb8] sm:$0xf0]  ;;  %v6770_v34 = vld [vmem:[%s10249_s1 + $0xc8c] sm:$0xf] }
 0x1cb   :  { %3835 = vmatpush.bf16.msra.mxu0 %v5756_v56  ;;  %v5689_v56 = vld [vmem:[%s10249_s1 + $0xb58] sm:$0xf0]  ;;  %v3572_v38 = vpop.f32.mrf.mxu0  ;;  %v6802_v33 = vld [vmem:[%s10249_s1 + $0xd8c] sm:$0xf] }
 0x1cc   :  { %3799 = vmatpush.bf16.msra.mxu1 %v5324_v57  ;;  %v3546_v57 = vpop.f32.mrf.mxu2  ;;  %v5692_v2 = vor.u32 %v6730_v55, %v5689_v56  ;;  %v3585_v14 = vpop.f32.mrf.mxu1  ;;  %v5993_v21 = vld [vmem:[%s10249_s1 + $0xdb8] sm:$0xf0]  ;;  %v6834_v39 = vld [vmem:[%s10249_s1 + $0xe8c] sm:$0xf] }
 0x1cd   :  { %3812 = vmatpush.bf16.msra.mxu2 %v5452_v62  ;;  %v6778_v62 = vld [vmem:[%s10249_s1 + $0xccc] sm:$0xf]  ;;  %v5996_v29 = vor.u32 %v6806_v20, %v5993_v21  ;;  %v5849_v37 = vld [vmem:[%s10249_s1 + $0xc98] sm:$0xf0] }
 0x1ce   :  { %3825 = vmatpush.bf16.msra.mxu3 %v5580_v15  ;;  %v6156_v15 = vor.u32 %v6846_v50, %v6153_v51  ;;  %v5884_v7 = vor.u32 %v6778_v62, %v5881_v0  ;;  %v5977_v35 = vld [vmem:[%s10249_s1 + $0xd98] sm:$0xf0]  ;;  %v5852_v45 = vor.u32 %v6770_v34, %v5849_v37  ;;  %v6766_v46 = vld [vmem:[%s10249_s1 + $0xc6c] sm:$0xf] }
 0x1cf   :  { %3836 = vmatpush.bf16.msra.mxu0 %v5740_v30  ;;  %v6726_v30 = vld [vmem:[%s10249_s1 + $0xb2c] sm:$0xf]  ;;  %v6105_v43 = vld [vmem:[%s10249_s1 + $0xe98] sm:$0xf0]  ;;  %v5980_v16 = vor.u32 %v6802_v33, %v5977_v35 }
 0x1d0   :  { %3800 = vmatpush.bf16.msra.mxu1 %v5308_v5  ;;  %v5673_v5 = vld [vmem:[%s10249_s1 + $0xb38] sm:$0xf0]  ;;  %v6108_v51 = vor.u32 %v6834_v39, %v6105_v43  ;;  %v6830_v55 = vld [vmem:[%s10249_s1 + $0xe6c] sm:$0xf] }
 0x1d1   :  { %3813 = vmatpush.bf16.msra.mxu2 %v5436_v11  ;;  %v6012_v11 = vor.u32 %v6810_v1, %v6009_v6  ;;  %v5676_v9 = vor.u32 %v6726_v30, %v5673_v5  ;;  %v6217_v50 = vld [vmem:[%s10249_s1 + $0xf78] sm:$0xf0]  ;;  %v6762_v62 = vld [vmem:[%s10249_s1 + $0xc4c] sm:$0xf] }
 0x1d2   :  { %3826 = vmatpush.bf16.msra.mxu3 %v5564_v12  ;;  %v6774_v12 = vld [vmem:[%s10249_s1 + $0xcac] sm:$0xf]  ;;  %v5833_v52 = vld [vmem:[%s10249_s1 + $0xc78] sm:$0xf0] }
 0x1d3   :  { %3837 = vmatpush.bf16.msra.mxu0 %v5724_v24  ;;  %v6121_v24 = vld [vmem:[%s10249_s1 + $0xeb8] sm:$0xf0]  ;;  %v5868_v28 = vor.u32 %v6774_v12, %v5865_v8  ;;  %v6826_v4 = vld [vmem:[%s10249_s1 + $0xe4c] sm:$0xf] }
 0x1d4   :  { %3801 = vmatpush.bf16.msra.mxu1 %v5292_v40  ;;  %v6722_v40 = vld [vmem:[%s10249_s1 + $0xb0c] sm:$0xf]  ;;  %v6089_v56 = vld [vmem:[%s10249_s1 + $0xe78] sm:$0xf0] }
 0x1d5   :  { %3814 = vmatpush.bf16.msra.mxu2 %v5420_v31  ;;  %v6233_v31 = vld [vmem:[%s10249_s1 + $0xf98] sm:$0xf0]  ;;  %v6092_v1 = vor.u32 %v6830_v55, %v6089_v56  ;;  %v6758_v12 = vld [vmem:[%s10249_s1 + $0xc2c] sm:$0xf]  ;;  %v6875_v55 = vld [vmem:[%s10252_s3 + $0x30] sm:$0xff] }
 0x1d6   :  { %3827 = vmatpush.bf16.msra.mxu3 %v5548_v32  ;;  %v6201_v0 = vld [vmem:[%s10249_s1 + $0xf58] sm:$0xf0]  ;;  %v6854_v14 = vld [vmem:[%s10249_s1 + $0xf2c] sm:$0xf] }
 0x1d7   :  { %3838 = vmatpush.bf16.msra.mxu0 %v5708_v44  ;;  %v5817_v6 = vld [vmem:[%s10249_s1 + $0xc58] sm:$0xf0]  ;;  %v6790_v21 = vld [vmem:[%s10249_s1 + $0xd2c] sm:$0xf] }
 0x1d8   :  { %3802 = vmatpush.bf16.msra.mxu1 %v5276_v49  ;;  %v6862_v49 = vld [vmem:[%s10249_s1 + $0xf6c] sm:$0xf]  ;;  %v5945_v3 = vld [vmem:[%s10249_s1 + $0xd58] sm:$0xf0] }
 0x1d9   :  { %3815 = vmatpush.bf16.msra.mxu2 %v5404_v53  ;;  %v6798_v53 = vld [vmem:[%s10249_s1 + $0xd6c] sm:$0xf]  ;;  %v6220_v57 = vor.u32 %v6862_v49, %v6217_v50  ;;  %v5801_v20 = vld [vmem:[%s10249_s1 + $0xc38] sm:$0xf0] }
 0x1da   :  { %3828 = vmatpush.bf16.msra.mxu3 %v5532_v54  ;;  %v5961_v54 = vld [vmem:[%s10249_s1 + $0xd78] sm:$0xf0]  ;;  %v6786_v33 = vld [vmem:[%s10249_s1 + $0xd0c] sm:$0xf] }
 0x1db   :  { %3803 = vmatmul.bf16.vlgmr.msra.gmra.mxu1 %v7607_v18  ;;  %3839 = vmatpush.bf16.msra.mxu0 %v5692_v2  ;;  %v6838_v18 = vld [vmem:[%s10249_s1 + $0xeac] sm:$0xf]  ;;  %v5913_v35 = vld [vmem:[%s10249_s1 + $0xd18] sm:$0xf0] }
 0x1dc   :  { %3847 = vmatpush.bf16.msrb.mxu1 %v5900_v58  ;;  %3816 = vmatmul.bf16.vlgmr.msra.gmra.mxu2 %v7620_v23  ;;  %v5657_v23 = vld [vmem:[%s10249_s1 + $0xb18] sm:$0xf0]  ;;  %v6124_v32 = vor.u32 %v6838_v18, %v6121_v24  ;;  %v5836_v58 = vor.u32 %v6766_v46, %v5833_v52  ;;  %v6794_v2 = vld [vmem:[%s10249_s1 + $0xd4c] sm:$0xf]  ;;  %v5916_v46 = vor.u32 %v6786_v33, %v5913_v35 }
 0x1dd   :  { %3860 = vmatpush.bf16.msrb.mxu2 %v6028_v59  ;;  %3829 = vmatmul.bf16.vlgmr.msra.gmra.mxu3 %v7618_v22  ;;  %v6866_v22 = vld [vmem:[%s10249_s1 + $0xf8c] sm:$0xf]  ;;  %v5660_v36 = vor.u32 %v6722_v40, %v5657_v23  ;;  %v5964_v59 = vor.u32 %v6798_v53, %v5961_v54  ;;  %v6057_v24 = vld [vmem:[%s10249_s1 + $0xe38] sm:$0xf0]  ;;  %v3545_v23 = vadd.f32 %v9881_v13, %v9747_v47 }
 0x1de   :  { %3873 = vmatpush.bf16.msrb.mxu3 %v6156_v15  ;;  %v6236_v44 = vor.u32 %v6866_v22, %v6233_v31  ;;  %v6858_v15 = vld [vmem:[%s10249_s1 + $0xf4c] sm:$0xf]  ;;  %v5785_v13 = vld [vmem:[%s10249_s1 + $0xc18] sm:$0xf0] }
 0x1df   :  { %3840 = vmatpush.bf16.msra.mxu0 %v5676_v9  ;;  %v6204_v5 = vor.u32 %v6858_v15, %v6201_v0  ;;  %v10079_v38 = vpop.f32.mrf.mxu2  ;;  %v5929_v9 = vld [vmem:[%s10249_s1 + $0xd38] sm:$0xf0]  ;;  %v6822_v18 = vld [vmem:[%s10249_s1 + $0xe2c] sm:$0xf]  ;;  %v6889_v15 = vld [vmem:[%s10252_s3 + $0xa0] sm:$0xff] }
 0x1e0   :  { %3848 = vmatpush.bf16.msrb.mxu1 %v5884_v7  ;;  %v10077_v30 = vpop.f32.mrf.mxu3  ;;  %v5820_v7 = vor.u32 %v6762_v62, %v5817_v6  ;;  %v5932_v34 = vor.u32 %v6790_v21, %v5929_v9  ;;  %v6754_v22 = vld [vmem:[%s10249_s1 + $0xc0c] sm:$0xf]  ;;  %v6060_v37 = vor.u32 %v6822_v18, %v6057_v24  ;;  %v6041_v39 = vld [vmem:[%s10249_s1 + $0xe18] sm:$0xf0] }
 0x1e1   :  { %3861 = vmatpush.bf16.msrb.mxu2 %v6012_v11  ;;  %v5948_v11 = vor.u32 %v6794_v2, %v5945_v3  ;;  %v6850_v31 = vld [vmem:[%s10249_s1 + $0xf0c] sm:$0xf]  ;;  %v6884_v52 = vld [vmem:[%s10252_s3 + $0x78] sm:$0xff] }
 0x1e2   :  { %3874 = vmatpush.bf16.msrb.mxu3 %v6140_v25  ;;  %v6185_v25 = vld [vmem:[%s10249_s1 + $0xf38] sm:$0xf0]  ;;  %v6886_v21 = vld [vmem:[%s10252_s3 + $0x88] sm:$0xff] }
 0x1e3   :  { %3841 = vmatpush.bf16.msra.mxu0 %v5660_v36  ;;  %v6188_v40 = vor.u32 %v6854_v14, %v6185_v25  ;;  %v6818_v36 = vld [vmem:[%s10249_s1 + $0xe0c] sm:$0xf]  ;;  %v6892_v53 = vld [vmem:[%s10252_s3 + $0xb8] sm:$0xff] }
 0x1e4   :  { %3849 = vmatpush.bf16.msrb.mxu1 %v5868_v28  ;;  %v3622_v28 = vpop.f32.mrf.mxu0  ;;  %v3635_v47 = vpop.f32.mrf.mxu1  ;;  %v6044_v50 = vor.u32 %v6818_v36, %v6041_v39  ;;  %v6872_v6 = vld [vmem:[%s10252_s3 + $0x18] sm:$0xff]  ;;  %v6870_v25 = vld [vmem:[%s10252_s3 + $0x8] sm:$0xff] }
 0x1e5   :  { %3862 = vmatpush.bf16.msrb.mxu2 %v5996_v29  ;;  %v5804_v29 = vor.u32 %v6758_v12, %v5801_v20  ;;  %v6880_v2 = vld [vmem:[%s10252_s3 + $0x58] sm:$0xff]  ;;  %v6878_v20 = vld [vmem:[%s10252_s3 + $0x48] sm:$0xff] }
 0x1e6   :  { %3875 = vmatpush.bf16.msrb.mxu3 %v6124_v32  ;;  %3842 = vmatmul.bf16.vlgmr.msra.gmra.mxu0 %v7628_v27  ;;  %v6073_v27 = vld [vmem:[%s10249_s1 + $0xe58] sm:$0xf0] }
 0x1e7   :  { %3889 = vmatpush.bf16.msrb.mxu0 %v6236_v44  ;;  %v6076_v8 = vor.u32 %v6826_v4, %v6073_v27  ;;  %v6169_v32 = vld [vmem:[%s10249_s1 + $0xf18] sm:$0xf0]  ;;  %v3598_v49 = vpop.f32.mrf.mxu2 }
 0x1e8   :  { %3850 = vmatpush.bf16.msrb.mxu1 %v5852_v45  ;;  %v6172_v43 = vor.u32 %v6850_v31, %v6169_v32  ;;  %v3611_v44 = vpop.f32.mrf.mxu3  ;;  %v3558_v45 = vadd.f32 %v9879_v10, %v3545_v23  ;;  %v6888_v3 = vld [vmem:[%s10252_s3 + $0x98] sm:$0xff] }
 0x1e9   :  { %3863 = vmatpush.bf16.msrb.mxu2 %v5980_v16  ;;  %v5788_v16 = vor.u32 %v6754_v22, %v5785_v13  ;;  %v3900_v22 = vmax.f32 %v9549_v63, 0.0  ;;  %v558_v13 = vperm.slane %v9672_v60, 3 }
 0x1ea   :  { %3876 = vmatpush.bf16.msrb.mxu3 %v6108_v51  ;;  %v6876_v51 = vld [vmem:[%s10252_s3 + $0x38] sm:$0xff]  ;;  %v3571_v10 = vadd.f32 %v9910_v61, %v3558_v45  ;;  %v6891_v61 = vld [vmem:[%s10252_s3 + $0xb0] sm:$0xff] }
 0x1eb   :  { %3890 = vmatpush.bf16.msrb.mxu0 %v6220_v57  ;;  %v6883_v57 = vld [vmem:[%s10252_s3 + $0x70] sm:$0xff] }
 0x1ec   :  { %3851 = vmatpush.bf16.msrb.mxu1 %v5836_v58  ;;  %v3624_v54 = vpop.f32.mrf.mxu0  ;;  %v3637_v56 = vpop.f32.mrf.mxu1  ;;  %v3584_v58 = vadd.f32 %v9927_v42, %v3571_v10  ;;  %v6881_v42 = vld [vmem:[%s10252_s3 + $0x60] sm:$0xff]  ;;  %v6900_v10 = vld [vmem:[%s10252_s3 + $0xf8] sm:$0xff] }
 0x1ed   :  { %3864 = vmatpush.bf16.msrb.mxu2 %v5964_v59  ;;  %v6874_v59 = vld [vmem:[%s10252_s3 + $0x28] sm:$0xff]  ;;  %v6899_v54 = vld [vmem:[%s10252_s3 + $0xf0] sm:$0xff] }
 0x1ee   :  { %3877 = vmatpush.bf16.msrb.mxu3 %v6092_v1  ;;  %v3597_v62 = vadd.f32 %v10079_v38, %v3584_v58  ;;  %v6897_v58 = vld [vmem:[%s10252_s3 + $0xe0] sm:$0xff] }
 0x1ef   :  { %3891 = vmatpush.bf16.msrb.mxu0 %v6204_v5  ;;  %v6871_v5 = vld [vmem:[%s10252_s3 + $0x10] sm:$0xff] }
 0x1f0   :  { %3852 = vmatpush.bf16.msrb.mxu1 %v5820_v7  ;;  %v6879_v7 = vld [vmem:[%s10252_s3 + $0x50] sm:$0xff] }
 0x1f1   :  { %3865 = vmatpush.bf16.msrb.mxu2 %v5948_v11  ;;  %v6887_v11 = vld [vmem:[%s10252_s3 + $0x90] sm:$0xff] }
 0x1f2   :  { %3878 = vmatpush.bf16.msrb.mxu3 %v6076_v8 }
 0x1f3   :  { %3892 = vmatpush.bf16.msrb.mxu0 %v6188_v40  ;;  %v6869_v40 = vld [vmem:[%s10252_s3] sm:$0xff] }
 0x1f4   :  { %3853 = vmatpush.bf16.msrb.mxu1 %v5804_v29  ;;  %v6877_v29 = vld [vmem:[%s10252_s3 + $0x40] sm:$0xff] }
 0x1f5   :  { %3866 = vmatpush.bf16.msrb.mxu2 %v5932_v34  ;;  %v6885_v34 = vld [vmem:[%s10252_s3 + $0x80] sm:$0xff] }
 0x1f6   :  { %3879 = vmatpush.bf16.msrb.mxu3 %v6060_v37 }
 0x1f7   :  { %3893 = vmatpush.bf16.msrb.mxu0 %v6172_v43 }
 0x1f8   :  { %3854 = vmatpush.bf16.msrb.mxu1 %v5788_v16  ;;  %v3687_v0 = vpop.f32.mrf.mxu1 }
 0x1f9   :  { %3867 = vmatpush.bf16.msrb.mxu2 %v5916_v46 }
 0x1fa   :  { %3880 = vmatpush.bf16.msrb.mxu3 %v6044_v50  ;;  %6240 = vmatmul.msk.bf16.vlgmr.msrb.gmra.mxu0 %vm3063_vm0, %v7757_v41  ;;  %v6873_v41 = vld [vmem:[%s10252_s3 + $0x20] sm:$0xff] }
 0x1fb   :  { %4167 = vmatpush.bf16.msra.mxu0 %v6876_v51  ;;  %3855 = vmatmul.bf16.vlgmr.msrb.gmra.mxu1 %v7833_v17  ;;  %v6882_v17 = vld [vmem:[%s10252_s3 + $0x68] sm:$0xff] }
 0x1fc   :  { %4180 = vmatpush.bf16.msra.mxu1 %v6884_v52  ;;  %3868 = vmatmul.bf16.vlgmr.msrb.gmra.mxu2 %v7846_v26  ;;  %v3610_v26 = vadd.f32 %v10077_v30, %v3597_v62 }
 0x1fd   :  { %4193 = vmatpush.bf16.msra.mxu2 %v6892_v53  ;;  %3881 = vmatmul.bf16.vlgmr.msrb.gmra.mxu3 %v7835_v19  ;;  %v6890_v19 = vld [vmem:[%s10252_s3 + $0xa8] sm:$0xff] }
 0x1fe   :  { %v3623_v1 = vadd.f32 %v3622_v28, %v3610_v26  ;;  %v3899_v28 = vmax.f32 %v8768_v48, 0.0  ;;  %v3904_v48 = vpack.c.bf16 %v3900_v22, %v3900_v22  ;;  %4206 = vmatpush.bf16.msra.mxu3 %v6900_v10  ;;  %v6894_v26 = vld [vmem:[%s10252_s3 + $0xc8] sm:$0xff] }
 0x1ff   :  { %4168 = vmatpush.bf16.msra.mxu0 %v6875_v55  ;;  %v3648_v30 = vpop.f32.mrf.mxu2 }
 0x200   :  { %4181 = vmatpush.bf16.msra.mxu1 %v6883_v57  ;;  %v3636_v4 = vadd.f32 %v3635_v47, %v3623_v1  ;;  %v3661_v27 = vpop.f32.mrf.mxu3  ;;  %v3689_v12 = vpop.f32.mrf.mxu1  ;;  %v3903_v37 = vpack.c.bf16 %v3899_v28, %v3899_v28  ;;  %v6898_v57 = vld [vmem:[%s10252_s3 + $0xe8] sm:$0xff]  ;;  %v6893_v1 = vld [vmem:[%s10252_s3 + $0xc0] sm:$0xff] }
 0x201   :  { %4194 = vmatpush.bf16.msra.mxu2 %v6891_v61 }
 0x202   :  { %v3649_v38 = vadd.f32 %v3648_v30, %v3636_v4  ;;  %4207 = vmatpush.bf16.msra.mxu3 %v6899_v54 }
 0x203   :  { %4169 = vmatpush.bf16.msra.mxu0 %v6874_v59  ;;  %v3674_v8 = vpop.f32.mrf.mxu0  ;;  %v6896_v59 = vld [vmem:[%s10252_s3 + $0xd8] sm:$0xff] }
 0x204   :  { %4182 = vmatpush.bf16.msra.mxu1 %v6882_v17  ;;  %v3662_v14 = vadd.f32 %v3661_v27, %v3649_v38  ;;  %v6895_v17 = vld [vmem:[%s10252_s3 + $0xd0] sm:$0xff] }
 0x205   :  { %4195 = vmatpush.bf16.msra.mxu2 %v6890_v19 }
 0x206   :  { %v3675_v9 = vadd.f32 %v3674_v8, %v3662_v14  ;;  %4208 = vmatpush.bf16.msra.mxu3 %v6898_v57 }
 0x207   :  { %4170 = vmatpush.bf16.msra.mxu0 %v6873_v41  ;;  %v3650_v23 = vpop.f32.mrf.mxu2 }
 0x208   :  { %4183 = vmatpush.bf16.msra.mxu1 %v6881_v42  ;;  %v3663_v18 = vpop.f32.mrf.mxu3  ;;  %v3688_v24 = vadd.f32 %v3687_v0, %v3675_v9 }
 0x209   :  { %4196 = vmatpush.bf16.msra.mxu2 %v6889_v15 }
 0x20a   :  { %v3901_v31 = vmax.f32 %v3688_v24, 0.0  ;;  %4209 = vmatpush.bf16.msra.mxu3 %v6897_v58 }
 0x20b   :  { %4171 = vmatpush.bf16.msra.mxu0 %v6872_v6  ;;  %v3676_v47 = vpop.f32.mrf.mxu0 }
 0x20c   :  { %4184 = vmatpush.bf16.msra.mxu1 %v6880_v2  ;;  %v3905_v32 = vpack.c.bf16 %v3901_v31, %v3901_v31  ;;  %v6901_v31 = vld [vmem:[%s10253_s4] ss:$0 sm:$0xff] }
 0x20d   :  { %4197 = vmatpush.bf16.msra.mxu2 %v6888_v3 }
 0x20e   :  { %4210 = vmatpush.bf16.msra.mxu3 %v6896_v59 }
 0x20f   :  { %4172 = vmatpush.bf16.msra.mxu0 %v6871_v5 }
 0x210   :  { %4185 = vmatpush.bf16.msra.mxu1 %v6879_v7 }
 0x211   :  { %4198 = vmatpush.bf16.msra.mxu2 %v6887_v11 }
 0x212   :  { %4211 = vmatpush.bf16.msra.mxu3 %v6895_v17 }
 0x213   :  { %4173 = vmatpush.bf16.msra.mxu0 %v6870_v25 }
 0x214   :  { %4186 = vmatpush.bf16.msra.mxu1 %v6878_v20 }
 0x215   :  { %4199 = vmatpush.bf16.msra.mxu2 %v6886_v21 }
 0x216   :  { %4212 = vmatpush.bf16.msra.mxu3 %v6894_v26 }
 0x217   :  { %4174 = vmatpush.bf16.msra.mxu0 %v6869_v40 }
 0x218   :  { %4187 = vmatpush.bf16.msra.mxu1 %v6877_v29  ;;  %v3700_v33 = vpop.f32.mrf.mxu1 }
 0x219   :  { %4200 = vmatpush.bf16.msra.mxu2 %v6885_v34  ;;  %v3701_v35 = vadd.f32 %v3700_v33, %v558_v13 }
 0x21a   :  { %4175 = vmatmul.bf16.vlgmr.msra.gmra.mxu0 %v3903_v37  ;;  %4213 = vmatpush.bf16.msra.mxu3 %v6893_v1 }
 0x21b   :  { %4188 = vmatmul.bf16.vlgmr.msra.gmra.mxu1 %v3904_v48 }
 0x21c   :  { %4201 = vmatmul.bf16.vlgmr.msra.gmra.mxu2 %v3905_v32 }
 0x21f   :  { %v3713_v36 = vpop.f32.mrf.mxu2 }
 0x220   :  { %v3726_v39 = vpop.f32.mrf.mxu3  ;;  %v3714_v43 = vadd.f32 %v3713_v36, %v3701_v35  ;;  %v3702_v63 = vpop.f32.mrf.mxu1 }
 0x222   :  { %v3727_v44 = vadd.f32 %v3726_v39, %v3714_v43 }
 0x223   :  { %v3739_v45 = vpop.f32.mrf.mxu0 }
 0x224   :  { %v3740_v19 = vadd.f32 %v3739_v45, %v3727_v44 }
 0x227   :  { %v3715_v16 = vpop.f32.mrf.mxu2 }
 0x228   :  { %v3728_v46 = vpop.f32.mrf.mxu3 }
 0x22b   :  { %v3741_v49 = vpop.f32.mrf.mxu0 }
 0x238   :  { %v3752_v50 = vpop.f32.mrf.mxu1 }
 0x239   :  { %v3753_v0 = vadd.f32 %v3752_v50, %v3740_v19 }
 0x23f   :  { %v3765_v51 = vpop.f32.mrf.mxu2 }
 0x240   :  { %v3778_v52 = vpop.f32.mrf.mxu3  ;;  %v3754_v53 = vpop.f32.mrf.mxu1  ;;  %v3766_v2 = vadd.f32 %v3765_v51, %v3753_v0 }
 0x242   :  { %v3779_v27 = vadd.f32 %v3778_v52, %v3766_v2 }
 0x243   :  { %v3791_v60 = vpop.f32.mrf.mxu0 }
 0x244   :  { %v3792_v5 = vadd.f32 %v3791_v60, %v3779_v27 }
 0x247   :  { %v3767_v55 = vpop.f32.mrf.mxu2 }
 0x248   :  { %v3780_v56 = vpop.f32.mrf.mxu3 }
 0x24b   :  { %v3793_v61 = vpop.f32.mrf.mxu0 }
 0x258   :  { %v3804_v62 = vpop.f32.mrf.mxu1 }
 0x259   :  { %v3805_v38 = vadd.f32 %v3804_v62, %v3792_v5 }
 0x25f   :  { %v3817_v41 = vpop.f32.mrf.mxu2 }
 0x260   :  { %v3830_v42 = vpop.f32.mrf.mxu3  ;;  %v3806_v15 = vpop.f32.mrf.mxu1  ;;  %v3818_v7 = vadd.f32 %v3817_v41, %v3805_v38 }
 0x262   :  { %v3831_v12 = vadd.f32 %v3830_v42, %v3818_v7 }
 0x263   :  { %v3843_v6 = vpop.f32.mrf.mxu0 }
 0x264   :  { %v3844_v25 = vadd.f32 %v3843_v6, %v3831_v12 }
 0x267   :  { %v3819_v3 = vpop.f32.mrf.mxu2 }
 0x268   :  { %v3832_v4 = vpop.f32.mrf.mxu3 }
 0x26b   :  { %v3845_v30 = vpop.f32.mrf.mxu0 }
 0x277   :  { %v3895_v14 = vpop.f32.mrf.mxu0 }
 0x278   :  { %v3856_v11 = vpop.f32.mrf.mxu1 }
 0x279   :  { %v3857_v8 = vadd.f32 %v3856_v11, %v3844_v25 }
 0x27f   :  { %v3869_v20 = vpop.f32.mrf.mxu2  ;;  %v3897_v40 = vpop.f32.mrf.mxu0 }
 0x280   :  { %v3870_v21 = vadd.f32 %v3869_v20, %v3857_v8  ;;  %v3882_v9 = vpop.f32.mrf.mxu3  ;;  %v3858_v18 = vpop.f32.mrf.mxu1 }
 0x282   :  { %v3883_v24 = vadd.f32 %v3882_v9, %v3870_v21 }
 0x284   :  { %v3896_v23 = vadd.f32 %v3895_v14, %v3883_v24 }
 0x286   :  { %v3902_v28 = vmax.f32 %v3896_v23, 0.0 }
 0x287   :  { %v3871_v29 = vpop.f32.mrf.mxu2 }
 0x288   :  { %v3906_v34 = vpack.c.bf16 %v3902_v28, %v3902_v28  ;;  %v3884_v22 = vpop.f32.mrf.mxu3 }
 0x28a   :  { %4214 = vmatmul.bf16.vlgmr.msra.gmra.mxu3 %v3906_v34 }
 0x297   :  { %v4176_v32 = vpop.f32.mrf.mxu0 }
 0x298   :  { %v4177_v37 = vadd.f32 %v6901_v31, %v4176_v32  ;;  %v4189_v47 = vpop.f32.mrf.mxu1 }
 0x29a   :  { %v4190_v48 = vadd.f32 %v4189_v47, %v4177_v37 }
 0x29f   :  { %v4202_v13 = vpop.f32.mrf.mxu2  ;;  %v4178_v35 = vpop.f32.mrf.mxu0 }
 0x2a0   :  { %v4203_v33 = vadd.f32 %v4202_v13, %v4190_v48  ;;  %v4191_v36 = vpop.f32.mrf.mxu1 }
 0x2a7   :  { %v4204_v39 = vpop.f32.mrf.mxu2 }
 0x30d   :  { %v4215_v43 = vpop.f32.mrf.mxu3 }
 0x30e   :  { %v4216_v44 = vadd.f32 %v4215_v43, %v4203_v33 }
 0x310   :  { %v4220_v63 = vsel %vm4219_vm1, %v4216_v44, -inf }
 0x311   :  { %4221 = vmax.xlane.f32.xlu0 %v4220_v63 }
 0x315   :  { %v4217_v45 = vpop.f32.mrf.mxu3 }
 0x384   :  { %v4222_v16 = vpop.xlane.xlu0 %4221 }
 0x385   :  { %v4223_v46 = vsub.f32 %v4216_v44, %v4222_v16 }
 0x387   :  { %v4224_v49 = vmul.f32 1.442695, %v4223_v46 }
 0x389   :  { %6902 = vpow2.f32 %v4224_v49 }
 0x38f   :  { %v6903_v50 = vpop.eup %6902 }
 0x390   :  { %v4226_v51 = vsel %vm4219_vm1, %v6903_v50, 0.0 }
 0x391   :  { %4227 = vadd.xlane.f32.xlu0 %v4226_v51 }
 0x404   :  { %v4228_v52 = vpop.xlane.xlu0 %4227 }
 0x405   :  { %6904 = vlog2.f32 %v4228_v52 }
 0x40b   :  { %v6905_v53 = vpop.eup %6904 }
 0x40c   :  { %v4230_v10 = vmul.f32 0.6931472, %v6905_v53 }
 0x40e   :  { %v4231_v60 = vsub.f32 %v4223_v46, %v4230_v10 }
 0x410   :  { %4232 = vst.msk [vmem:[%s10254_s5] sm:$0xff] %vm4219_vm1, %v4231_v60 }

</bundles_post_ra>
